<compile_context>
chip_gen: v6e
topology: v6e:2x2x1
jax: 0.10.0
libtpu: 0.0.40
codegen_flags: <defaults>
</compile_context>

<pallas_src>
import math
import functools

import jax
import jax.numpy as jnp
from jax.experimental import pallas as pl
from jax.experimental.pallas import tpu as pltpu


# ----------------------------------------------------------------------------
# In-kernel helpers (pure jnp on VMEM-resident values)
# ----------------------------------------------------------------------------

def _bdot(x, w):
    """bf16 MXU matmul with f32 accumulation (w is already bf16)."""
    return jnp.dot(x.astype(jnp.bfloat16), w, preferred_element_type=jnp.float32)


def _layernorm(z, g, b, eps=1e-5):
    mu = jnp.mean(z, axis=-1, keepdims=True)
    d = z - mu
    var = jnp.mean(d * d, axis=-1, keepdims=True)
    return d * jax.lax.rsqrt(var + eps) * g + b


def _gelu(x):
    # tanh-form GELU (jnp.tanh -> EUP slot). torch F.gelu uses exact erf;
    # the numeric delta is tiny and accepted by the perf review.
    c = 0.7978845608028654  # sqrt(2/pi)
    return 0.5 * x * (1.0 + jnp.tanh(c * (x + 0.044715 * x * x * x)))


def _elu(x):
    return jnp.where(x > 0.0, x, jnp.exp(jnp.minimum(x, 0.0)) - 1.0)


def _circular_conv3(x, w_ref, bias):
    """k=3 / padding=1 / padding_mode='circular' Conv1d on (L, C_in).
    The +-1 circular shifts are XLU sublane rotations (pltpu.roll), not
    permutation GEMMs.  w_ref: (3, C_in, C_out) bf16 taps, bias: (1, C_out)."""
    L = x.shape[0]
    xm1 = pltpu.roll(x, 1, axis=0)        # x[(i-1) mod L]
    xp1 = pltpu.roll(x, L - 1, axis=0)    # x[(i+1) mod L]
    return (_bdot(xm1, w_ref[0]) + _bdot(x, w_ref[1]) + _bdot(xp1, w_ref[2])
            + bias)


def _mha(xq, xkv, w_ref, b_ref, *, n_heads, causal, mix_scratch=None):
    """FullAttention multi-head attention + output projection, fully in VMEM.

    xq: (L, D) f32 queries, xkv: (S, D) f32 keys/values.
    w_ref: (4, D, D) bf16 stacked [Wq, Wk, Wv, Wo]; b_ref: (4, 1, D) f32 biases.
    Heads are static lane slices; the softmax scale is folded into Q.
    If mix_scratch (VMEM (H*L, E) f32) is given, the torch mix=True regroup
    (out.transpose(2,1).contiguous().view(B,L,-1)) is reproduced with
    contiguous writes + strided pl.ds reads of the scratch."""
    L, D = xq.shape
    S = xkv.shape[0]
    H = n_heads
    E = D // H
    scale = 1.0 / math.sqrt(E)

    wq, wk, wv, wo = w_ref[0], w_ref[1], w_ref[2], w_ref[3]       # bf16 (D, D)
    bq, bk, bv, bo = b_ref[0], b_ref[1], b_ref[2], b_ref[3]       # f32 (1, D)

    q = (_bdot(xq, wq) + bq) * scale                              # scale folded into Q
    k = _bdot(xkv, wk) + bk
    v = _bdot(xkv, wv) + bv
    qb = q.astype(jnp.bfloat16)
    kb = k.astype(jnp.bfloat16)
    vb = v.astype(jnp.bfloat16)

    if causal:
        row = jax.lax.broadcasted_iota(jnp.int32, (L, S), 0)
        col = jax.lax.broadcasted_iota(jnp.int32, (L, S), 1)
        causal_mask = col > row

    out = None
    for h in range(H):
        qh = qb[:, h * E:(h + 1) * E]                             # (L, E) lane slice
        kh = kb[:, h * E:(h + 1) * E]                             # (S, E)
        vh = vb[:, h * E:(h + 1) * E]                             # (S, E)
        s = jax.lax.dot_general(qh, kh, (((1,), (1,)), ((), ())),
                                preferred_element_type=jnp.float32)   # (L, S)
        if causal:
            s = jnp.where(causal_mask, -jnp.inf, s)   # masked_fill(-inf); scale>0 so order-safe
        m = jnp.max(s, axis=-1, keepdims=True)
        p = jnp.exp(s - m)
        inv = pl.reciprocal(jnp.sum(p, axis=-1, keepdims=True), approx=True)
        oh = jnp.dot((p * inv).astype(jnp.bfloat16), vh,
                     preferred_element_type=jnp.float32)          # (L, E)
        if mix_scratch is None:
            contrib = _bdot(oh, wo[h * E:(h + 1) * E, :])         # accumulate O-proj in-loop
            out = contrib if out is None else out + contrib
        else:
            mix_scratch[pl.ds(h * L, L), :] = oh                  # cat row h*L + l'

    if mix_scratch is not None:
        # torch mix: view the row-major (H, L, E) buffer as (L, H*E); chunk a of
        # row l is cat[l*H + a] -> strided sublane reads replace the old
        # (L, H*L) selection GEMMs.
        for a in range(H):
            blk = mix_scratch[pl.ds(a, L, stride=H), :]           # (L, E)
            contrib = _bdot(blk, wo[a * E:(a + 1) * E, :])
            out = contrib if out is None else out + contrib
    return out + bo


# ----------------------------------------------------------------------------
# Pallas kernels
# ----------------------------------------------------------------------------

def _embed_kernel(x_ref, w_ref, b_ref, extra_ref, o_ref):
    # TokenEmbedding (circular k=3 conv) + positional/temporal embeddings.
    x = x_ref[0].astype(jnp.float32)                                  # (L, Cin)
    y = _circular_conv3(x, w_ref, b_ref[...]) + extra_ref[0].astype(jnp.float32)
    o_ref[0] = y.astype(o_ref.dtype)


def _encoder_layer_kernel(x_ref, aw_ref, ab_ref, g1_ref, b1_ref,
                          w1_ref, bf1_ref, w2_ref, bf2_ref, g2_ref, b2_ref,
                          o_ref, *, n_heads, tq):
    # Query-row-tiled encoder layer: Q rows come from this grid step's tile,
    # K/V from the full sequence block.
    x_full = x_ref[0].astype(jnp.float32)                             # (L, D)
    start = pl.multiple_of(pl.program_id(1) * tq, tq)
    xq = x_ref[0, pl.ds(start, tq), :].astype(jnp.float32)            # (TQ, D)
    attn = _mha(xq, x_full, aw_ref, ab_ref, n_heads=n_heads, causal=False)
    x1 = _layernorm(xq + attn, g1_ref[...], b1_ref[...])              # norm1(x+attn)
    h = _gelu(_bdot(x1, w1_ref[...]) + bf1_ref[...])
    y = _bdot(h, w2_ref[...]) + bf2_ref[...]
    o_ref[0] = _layernorm(x1 + y, g2_ref[...], b2_ref[...]).astype(o_ref.dtype)


def _decoder_layer_kernel(x_ref, cross_ref, saw_ref, sab_ref, caw_ref, cab_ref,
                          g1_ref, b1_ref, g2_ref, b2_ref,
                          w1_ref, bf1_ref, w2_ref, bf2_ref, g3_ref, b3_ref,
                          o_ref, mix_scratch, *, n_heads, mix):
    x = x_ref[0].astype(jnp.float32)                                  # (L, D)
    cross = cross_ref[0].astype(jnp.float32)                          # (S, D)
    sa = _mha(x, x, saw_ref, sab_ref, n_heads=n_heads, causal=True,
              mix_scratch=mix_scratch if mix else None)
    x = _layernorm(x + sa, g1_ref[...], b1_ref[...])
    ca = _mha(x, cross, caw_ref, cab_ref, n_heads=n_heads, causal=False)
    x = _layernorm(x + ca, g2_ref[...], b2_ref[...])
    h = _gelu(_bdot(x, w1_ref[...]) + bf1_ref[...])
    y = _bdot(h, w2_ref[...]) + bf2_ref[...]
    o_ref[0] = _layernorm(x + y, g3_ref[...], b3_ref[...]).astype(o_ref.dtype)


def _distil_conv_kernel(x_ref, w_ref, bias_ref, g_ref, beta_ref, o_ref):
    # Distilling ConvLayer: circular conv -> BatchNorm1d -> ELU (MaxPool outside).
    # Batch statistics via per-batch partial sums (no concatenate/slice copies).
    B, L, _ = x_ref.shape
    bias = bias_ref[...]
    ys = []
    s = None
    for b in range(B):
        yb = _circular_conv3(x_ref[b].astype(jnp.float32), w_ref, bias)
        ys.append(yb)
        sb = jnp.sum(yb, axis=0, keepdims=True)
        s = sb if s is None else s + sb
    inv_n = 1.0 / float(B * L)
    mu = s * inv_n
    v = None
    for b in range(B):
        d = ys[b] - mu
        vb = jnp.sum(d * d, axis=0, keepdims=True)
        v = vb if v is None else v + vb
    # TODO(synk): BatchNorm1d evaluated with training-mode batch statistics
    # (the torch module as constructed is in train() mode).
    inv = jax.lax.rsqrt(v * inv_n + 1e-5) * g_ref[...]
    for b in range(B):
        o_ref[b] = _elu((ys[b] - mu) * inv + beta_ref[...]).astype(o_ref.dtype)


def _ln_kernel(x_ref, g_ref, b_ref, o_ref, *, eps):
    o_ref[...] = _layernorm(x_ref[...].astype(jnp.float32),
                            g_ref[...], b_ref[...], eps).astype(o_ref.dtype)


def _ln_proj_kernel(x_ref, g_ref, b_ref, w_ref, bw_ref, o_ref, *, eps):
    y = _layernorm(x_ref[...].astype(jnp.float32), g_ref[...], b_ref[...], eps)
    o_ref[...] = (_bdot(y, w_ref[...]) + bw_ref[...]).astype(o_ref.dtype)


# ----------------------------------------------------------------------------
# pallas_call wrappers
# ----------------------------------------------------------------------------

_VMEM_LIMIT = 48 * 1024 * 1024   # safe cap on v5e/v6e (128 MiB) and v7x (64 MiB)


def _cparams(*sems):
    return pltpu.CompilerParams(dimension_semantics=sems,
                                vmem_limit_bytes=_VMEM_LIMIT)


def _pick_tile(n, target):
    """Largest multiple-of-8 divisor of n that is <= target (else n itself)."""
    if n <= target:
        return n
    t = (target // 8) * 8
    while t >= 8:
        if n % t == 0:
            return t
        t -= 8
    return n


def pallas_embedding(p, x, extra):
    B, L, c_in = x.shape
    D = p['token_b'].shape[1]
    return pl.pallas_call(
        _embed_kernel,
        out_shape=jax.ShapeDtypeStruct((B, L, D), jnp.float32),
        grid=(B,),
        in_specs=[pl.BlockSpec((1, L, c_in), lambda b: (b, 0, 0)),
                  pl.BlockSpec((3, c_in, D), lambda b: (0, 0, 0)),
                  pl.BlockSpec((1, D), lambda b: (0, 0)),
                  pl.BlockSpec((1, L, D), lambda b: (b, 0, 0))],
        out_specs=pl.BlockSpec((1, L, D), lambda b: (b, 0, 0)),
        compiler_params=_cparams("parallel"),
    )(x, p['token_w'], p['token_b'], extra)


def fused_encoder_layer(p, x, *, n_heads):
    B, L, D = x.shape
    d_ff = p['conv1']['w'].shape[1]
    tq = _pick_tile(L, 256)                 # flash-style query-row tiles
    n_q = L // tq
    return pl.pallas_call(
        functools.partial(_encoder_layer_kernel, n_heads=n_heads, tq=tq),
        out_shape=jax.ShapeDtypeStruct((B, L, D), x.dtype),
        grid=(B, n_q),
        in_specs=[pl.BlockSpec((1, L, D), lambda b, q: (b, 0, 0)),   # x (full seq)
                  pl.BlockSpec((4, D, D), lambda b, q: (0, 0, 0)),   # attn W stack (bf16)
                  pl.BlockSpec((4, 1, D), lambda b, q: (0, 0, 0)),   # attn b stack
                  pl.BlockSpec((1, D), lambda b, q: (0, 0)),         # norm1 g
                  pl.BlockSpec((1, D), lambda b, q: (0, 0)),         # norm1 b
                  pl.BlockSpec((D, d_ff), lambda b, q: (0, 0)),      # conv1 w (bf16)
                  pl.BlockSpec((1, d_ff), lambda b, q: (0, 0)),      # conv1 b
                  pl.BlockSpec((d_ff, D), lambda b, q: (0, 0)),      # conv2 w (bf16)
                  pl.BlockSpec((1, D), lambda b, q: (0, 0)),         # conv2 b
                  pl.BlockSpec((1, D), lambda b, q: (0, 0)),         # norm2 g
                  pl.BlockSpec((1, D), lambda b, q: (0, 0))],        # norm2 b
        out_specs=pl.BlockSpec((1, tq, D), lambda b, q: (b, q, 0)),
        compiler_params=_cparams("parallel", "parallel"),
    )(x, p['attn']['w'], p['attn']['b'],
      p['norm1']['g'], p['norm1']['b'],
      p['conv1']['w'], p['conv1']['b'], p['conv2']['w'], p['conv2']['b'],
      p['norm2']['g'], p['norm2']['b'])


def fused_decoder_layer(p, x, cross, *, n_heads, mix):
    B, L, D = x.shape
    S = cross.shape[1]
    d_ff = p['conv1']['w'].shape[1]
    E = D // n_heads
    return pl.pallas_call(
        functools.partial(_decoder_layer_kernel, n_heads=n_heads, mix=mix),
        out_shape=jax.ShapeDtypeStruct((B, L, D), x.dtype),
        grid=(B,),
        in_specs=[pl.BlockSpec((1, L, D), lambda b: (b, 0, 0)),   # x
                  pl.BlockSpec((1, S, D), lambda b: (b, 0, 0)),   # cross
                  pl.BlockSpec((4, D, D), lambda b: (0, 0, 0)),   # self attn W (bf16)
                  pl.BlockSpec((4, 1, D), lambda b: (0, 0, 0)),   # self attn b
                  pl.BlockSpec((4, D, D), lambda b: (0, 0, 0)),   # cross attn W (bf16)
                  pl.BlockSpec((4, 1, D), lambda b: (0, 0, 0)),   # cross attn b
                  pl.BlockSpec((1, D), lambda b: (0, 0)),         # norm1 g
                  pl.BlockSpec((1, D), lambda b: (0, 0)),         # norm1 b
                  pl.BlockSpec((1, D), lambda b: (0, 0)),         # norm2 g
                  pl.BlockSpec((1, D), lambda b: (0, 0)),         # norm2 b
                  pl.BlockSpec((D, d_ff), lambda b: (0, 0)),      # conv1 w (bf16)
                  pl.BlockSpec((1, d_ff), lambda b: (0, 0)),      # conv1 b
                  pl.BlockSpec((d_ff, D), lambda b: (0, 0)),      # conv2 w (bf16)
                  pl.BlockSpec((1, D), lambda b: (0, 0)),         # conv2 b
                  pl.BlockSpec((1, D), lambda b: (0, 0)),         # norm3 g
                  pl.BlockSpec((1, D), lambda b: (0, 0))],        # norm3 b
        out_specs=pl.BlockSpec((1, L, D), lambda b: (b, 0, 0)),
        scratch_shapes=[pltpu.VMEM((n_heads * L, E), jnp.float32)],  # mix regroup buffer
        compiler_params=_cparams("parallel"),
    )(x, cross,
      p['self_attn']['w'], p['self_attn']['b'],
      p['cross_attn']['w'], p['cross_attn']['b'],
      p['norm1']['g'], p['norm1']['b'], p['norm2']['g'], p['norm2']['b'],
      p['conv1']['w'], p['conv1']['b'], p['conv2']['w'], p['conv2']['b'],
      p['norm3']['g'], p['norm3']['b'])


def fused_conv_layer(p, x):
    B, L, D = x.shape
    y = pl.pallas_call(
        _distil_conv_kernel,
        out_shape=jax.ShapeDtypeStruct((B, L, D), x.dtype),
        grid=(1,),
        in_specs=[pl.BlockSpec((B, L, D), lambda i: (0, 0, 0)),
                  pl.BlockSpec((3, D, D), lambda i: (0, 0, 0)),
                  pl.BlockSpec((1, D), lambda i: (0, 0)),
                  pl.BlockSpec((1, D), lambda i: (0, 0)),
                  pl.BlockSpec((1, D), lambda i: (0, 0))],
        out_specs=pl.BlockSpec((B, L, D), lambda i: (0, 0, 0)),
        compiler_params=_cparams("arbitrary"),
    )(x, p['w'], p['b'], p['bn_g'], p['bn_b'])
    # TODO(synk): MaxPool1d(kernel=3, stride=2, padding=1) kept as XLA glue;
    # fusing it into the distil kernel would need a stride-2 sublane gather.
    return jax.lax.reduce_window(y, -jnp.inf, jax.lax.max,
                                 window_dimensions=(1, 3, 1),
                                 window_strides=(1, 2, 1),
                                 padding=((0, 0), (1, 1), (0, 0)))


def pallas_layernorm(x, p, eps=1e-5):
    B, L, D = x.shape
    M = B * L
    tm = _pick_tile(M, 1024)
    x2 = x.reshape(M, D)
    out = pl.pallas_call(
        functools.partial(_ln_kernel, eps=eps),
        out_shape=jax.ShapeDtypeStruct((M, D), x.dtype),
        grid=(M // tm,),
        in_specs=[pl.BlockSpec((tm, D), lambda i: (i, 0)),
                  pl.BlockSpec((1, D), lambda i: (0, 0)),
                  pl.BlockSpec((1, D), lambda i: (0, 0))],
        out_specs=pl.BlockSpec((tm, D), lambda i: (i, 0)),
        compiler_params=_cparams("parallel"),
    )(x2, p['g'], p['b'])
    return out.reshape(B, L, D)


def pallas_ln_proj(x, ln_p, proj_p, eps=1e-5):
    B, L, D = x.shape
    M = B * L
    N = proj_p['w'].shape[1]
    tm = _pick_tile(M, 1024)
    x2 = x.reshape(M, D)
    out = pl.pallas_call(
        functools.partial(_ln_proj_kernel, eps=eps),
        out_shape=jax.ShapeDtypeStruct((M, N), x.dtype),
        grid=(M // tm,),
        in_specs=[pl.BlockSpec((tm, D), lambda i: (i, 0)),
                  pl.BlockSpec((1, D), lambda i: (0, 0)),
                  pl.BlockSpec((1, D), lambda i: (0, 0)),
                  pl.BlockSpec((D, N), lambda i: (0, 0)),
                  pl.BlockSpec((1, N), lambda i: (0, 0))],
        out_specs=pl.BlockSpec((tm, N), lambda i: (i, 0)),
        compiler_params=_cparams("parallel"),
    )(x2, ln_p['g'], ln_p['b'], proj_p['w'], proj_p['b'])
    return out.reshape(B, L, N)


# ----------------------------------------------------------------------------
# Model glue (plain JAX only for gathers / slicing / concatenation)
# ----------------------------------------------------------------------------

def data_embedding(p, x, x_mark):
    L = x.shape[1]
    pos = p['pe'][:L][None]                                     # PositionalEmbedding
    # TemporalEmbedding('fixed','h'): fixed sinusoid table lookups (gather glue)
    temp = (p['hour'][x_mark[:, :, 3]] + p['weekday'][x_mark[:, :, 2]]
            + p['day'][x_mark[:, :, 1]] + p['month'][x_mark[:, :, 0]])
    extra = (pos + temp).astype(jnp.float32)
    return pallas_embedding(p, x, extra)                        # dropout p=0.0 -> identity


def encoder(p, x, *, n_heads):
    layers, convs = p['layers'], p['convs']
    if len(convs) > 0:
        for lp, cp in zip(layers[:-1], convs):
            x = fused_encoder_layer(lp, x, n_heads=n_heads)
            x = fused_conv_layer(cp, x)
        x = fused_encoder_layer(layers[-1], x, n_heads=n_heads)
    else:
        for lp in layers:
            x = fused_encoder_layer(lp, x, n_heads=n_heads)
    return pallas_layernorm(x, p['norm'])


def encoder_stack(ps, inp_lens, x, *, n_heads):
    outs = []
    for il, ep in zip(inp_lens, ps):
        inp_len = x.shape[1] // (2 ** il)
        outs.append(encoder(ep, x[:, -inp_len:, :], n_heads=n_heads))
    return jnp.concatenate(outs, axis=1)


def decoder_layers(p, x, cross, *, n_heads, mix):
    for lp in p['layers']:
        x = fused_decoder_layer(lp, x, cross, n_heads=n_heads, mix=mix)
    return x                                                     # final norm fused with projection


def informer_stack_forward(params, x_enc, x_mark_enc, x_dec, x_mark_dec, *,
                           n_heads, pred_len, e_layers, mix=True):
    inp_lens = list(range(len(e_layers)))
    enc_out = data_embedding(params['enc_emb'], x_enc, x_mark_enc)
    enc_out = encoder_stack(params['encoders'], inp_lens, enc_out, n_heads=n_heads)
    dec_out = data_embedding(params['dec_emb'], x_dec, x_mark_dec)
    dec_out = decoder_layers(params['decoder'], dec_out, enc_out,
                             n_heads=n_heads, mix=mix)
    dec_out = pallas_ln_proj(dec_out, params['decoder']['norm'], params['projection'])
    return dec_out[:, -pred_len:, :]


# ----------------------------------------------------------------------------
# Deterministic parameter construction (GEMM weights stored in bf16)
# ----------------------------------------------------------------------------

class KeyGen:
    def __init__(self, key):
        self.key = key

    def __call__(self):
        self.key, sub = jax.random.split(self.key)
        return sub


def _normal(kg, shape, scale=0.05, dtype=jnp.float32):
    return (scale * jax.random.normal(kg(), shape, jnp.float32)).astype(dtype)


def init_linear(kg, d_in, d_out):
    return {'w': _normal(kg, (d_in, d_out), dtype=jnp.bfloat16),
            'b': _normal(kg, (1, d_out))}


def init_ln(d):
    return {'g': jnp.ones((1, d), jnp.float32), 'b': jnp.zeros((1, d), jnp.float32)}


def init_attn_layer(kg, d):
    return {'w': _normal(kg, (4, d, d), dtype=jnp.bfloat16),   # stacked [Wq, Wk, Wv, Wo]
            'b': _normal(kg, (4, 1, d))}                       # stacked biases


def init_encoder_layer(kg, d, d_ff):
    return {'attn': init_attn_layer(kg, d),
            'conv1': init_linear(kg, d, d_ff), 'conv2': init_linear(kg, d_ff, d),
            'norm1': init_ln(d), 'norm2': init_ln(d)}


def init_conv_layer(kg, d):
    return {'w': _normal(kg, (3, d, d), dtype=jnp.bfloat16),   # k=3 circular taps
            'b': _normal(kg, (1, d)),
            'bn_g': jnp.ones((1, d), jnp.float32),
            'bn_b': jnp.zeros((1, d), jnp.float32)}


def init_decoder_layer(kg, d, d_ff):
    return {'self_attn': init_attn_layer(kg, d),
            'cross_attn': init_attn_layer(kg, d),
            'conv1': init_linear(kg, d, d_ff), 'conv2': init_linear(kg, d_ff, d),
            'norm1': init_ln(d), 'norm2': init_ln(d), 'norm3': init_ln(d)}


def sinusoid_table(n, d):
    pos = jnp.arange(n, dtype=jnp.float32)[:, None]
    div = jnp.exp(jnp.arange(0, d, 2, dtype=jnp.float32) * (-(math.log(10000.0) / d)))
    tbl = jnp.zeros((n, d), jnp.float32)
    tbl = tbl.at[:, 0::2].set(jnp.sin(pos * div))
    tbl = tbl.at[:, 1::2].set(jnp.cos(pos * div))
    return tbl


def init_embedding(kg, c_in, d):
    return {'token_w': _normal(kg, (3, c_in, d), dtype=jnp.bfloat16),  # circular conv taps
            'token_b': _normal(kg, (1, d)),
            'pe': sinusoid_table(5000, d),
            'month': sinusoid_table(13, d),
            'day': sinusoid_table(32, d),
            'weekday': sinusoid_table(7, d),
            'hour': sinusoid_table(24, d)}


def init_informer_stack(key, enc_in, dec_in, c_out, d_model, d_ff, e_layers, d_layers):
    kg = KeyGen(key)
    return {
        'enc_emb': init_embedding(kg, enc_in, d_model),
        'dec_emb': init_embedding(kg, dec_in, d_model),
        'encoders': [
            {'layers': [init_encoder_layer(kg, d_model, d_ff) for _ in range(el)],
             'convs': [init_conv_layer(kg, d_model) for _ in range(el - 1)],
             'norm': init_ln(d_model)}
            for el in e_layers],
        'decoder': {'layers': [init_decoder_layer(kg, d_model, d_ff)
                               for _ in range(d_layers)],
                    'norm': init_ln(d_model)},
        'projection': init_linear(kg, d_model, c_out),
    }


# ----------------------------------------------------------------------------

if __name__ == "__main__":
    B = 2
    enc_in = dec_in = c_out = 4
    seq_len, label_len, pred_len = 16, 8, 8
    d_model, n_heads, d_ff = 32, 4, 32
    e_layers, d_layers = [2, 1], 1

    params = init_informer_stack(jax.random.PRNGKey(42), enc_in, dec_in, c_out,
                                 d_model, d_ff, e_layers, d_layers)

    key = jax.random.PRNGKey(0)
    k1, k2, k3, k4 = jax.random.split(key, 4)
    x_enc = jax.random.normal(k1, (B, seq_len, enc_in), jnp.float32)
    x_dec = jax.random.normal(k2, (B, label_len + pred_len, dec_in), jnp.float32)

    def make_marks(k, L):
        km, kd, kw, kh = jax.random.split(k, 4)
        return jnp.stack([jax.random.randint(km, (B, L), 0, 13),   # month
                          jax.random.randint(kd, (B, L), 0, 32),   # day
                          jax.random.randint(kw, (B, L), 0, 7),    # weekday
                          jax.random.randint(kh, (B, L), 0, 24)],  # hour
                         axis=-1).astype(jnp.int32)

    x_mark_enc = make_marks(k3, seq_len)
    x_mark_dec = make_marks(k4, label_len + pred_len)

    fwd = jax.jit(functools.partial(informer_stack_forward,
                                    n_heads=n_heads, pred_len=pred_len,
                                    e_layers=e_layers, mix=True))
    out = fwd(params, x_enc, x_mark_enc, x_dec, x_mark_dec)
    jax.block_until_ready(out)
    assert out.shape == (B, pred_len, c_out), out.shape
    print("KERNEL_OK")
</pallas_src>

<mosaic_0001>
module attributes {stable_mosaic.version = 11 : i64} {
  func.func @_distil_conv_kernel(%arg0: i32, %arg1: memref<2x16x32xf32, #tpu.memory_space<vmem>>, %arg2: memref<3x32x32xbf16, #tpu.memory_space<vmem>>, %arg3: memref<1x32xf32, #tpu.memory_space<vmem>>, %arg4: memref<1x32xf32, #tpu.memory_space<vmem>>, %arg5: memref<1x32xf32, #tpu.memory_space<vmem>>, %arg6: memref<2x16x32xf32, #tpu.memory_space<vmem>>) attributes {dimension_semantics = [#tpu.dimension_semantics<arbitrary>], iteration_bounds = array<i64: 1>, scalar_prefetch = 0 : i64, scratch_operands = 0 : i64, tpu.core_type = #tpu.core_type<tc>, window_params = [{pipeline_mode = #tpu.pipeline_mode<synchronous>, transform_indices = @transform_0, window_bounds = array<i64: 2, 16, 32>}, {pipeline_mode = #tpu.pipeline_mode<synchronous>, transform_indices = @transform_1, window_bounds = array<i64: 3, 32, 32>}, {pipeline_mode = #tpu.pipeline_mode<synchronous>, transform_indices = @transform_2, window_bounds = array<i64: 1, 32>}, {pipeline_mode = #tpu.pipeline_mode<synchronous>, transform_indices = @transform_3, window_bounds = array<i64: 1, 32>}, {pipeline_mode = #tpu.pipeline_mode<synchronous>, transform_indices = @transform_4, window_bounds = array<i64: 1, 32>}, {pipeline_mode = #tpu.pipeline_mode<synchronous>, transform_indices = @transform_5, window_bounds = array<i64: 2, 16, 32>}]} {
    %c0 = arith.constant 0 : index
    %c0_0 = arith.constant 0 : index
    %0 = vector.load %arg3[%c0, %c0_0] : memref<1x32xf32, #tpu.memory_space<vmem>>, vector<1x32xf32>
    %c0_1 = arith.constant 0 : index
    %c0_2 = arith.constant 0 : index
    %c0_3 = arith.constant 0 : index
    %1 = vector.load %arg1[%c0_1, %c0_2, %c0_3] : memref<2x16x32xf32, #tpu.memory_space<vmem>>, vector<1x16x32xf32>
    %2 = vector.shape_cast %1 : vector<1x16x32xf32> to vector<16x32xf32>
    %c1_i32 = arith.constant 1 : i32
    %3 = tpu.dynamic_rotate %2 by %c1_i32 dim 0 : vector<16x32xf32>, i32 -> vector<16x32xf32>
    %c15_i32 = arith.constant 15 : i32
    %4 = tpu.dynamic_rotate %2 by %c15_i32 dim 0 : vector<16x32xf32>, i32 -> vector<16x32xf32>
    %c0_4 = arith.constant 0 : index
    %c0_5 = arith.constant 0 : index
    %c0_6 = arith.constant 0 : index
    %5 = vector.load %arg2[%c0_4, %c0_5, %c0_6] : memref<3x32x32xbf16, #tpu.memory_space<vmem>>, vector<1x32x32xbf16>
    %6 = vector.shape_cast %5 : vector<1x32x32xbf16> to vector<32x32xbf16>
    %7 = arith.truncf %3 : vector<16x32xf32> to vector<16x32xbf16>
    %cst = arith.constant dense<0.000000e+00> : vector<16x32xf32>
    %8 = tpu.matmul %7, %6, %cst {dimension_numbers = #tpu.dot_dimension_numbers<[1], [0], [0], [1], [0, 0, 1, 1], [], []>} : vector<16x32xbf16>, vector<32x32xbf16>, vector<16x32xf32> -> vector<16x32xf32>
    %c1 = arith.constant 1 : index
    %c0_7 = arith.constant 0 : index
    %c0_8 = arith.constant 0 : index
    %9 = vector.load %arg2[%c1, %c0_7, %c0_8] : memref<3x32x32xbf16, #tpu.memory_space<vmem>>, vector<1x32x32xbf16>
    %10 = vector.shape_cast %9 : vector<1x32x32xbf16> to vector<32x32xbf16>
    %11 = arith.truncf %2 : vector<16x32xf32> to vector<16x32xbf16>
    %cst_9 = arith.constant dense<0.000000e+00> : vector<16x32xf32>
    %12 = tpu.matmul %11, %10, %cst_9 {dimension_numbers = #tpu.dot_dimension_numbers<[1], [0], [0], [1], [0, 0, 1, 1], [], []>} : vector<16x32xbf16>, vector<32x32xbf16>, vector<16x32xf32> -> vector<16x32xf32>
    %13 = arith.addf %8, %12 : vector<16x32xf32>
    %c2 = arith.constant 2 : index
    %c0_10 = arith.constant 0 : index
    %c0_11 = arith.constant 0 : index
    %14 = vector.load %arg2[%c2, %c0_10, %c0_11] : memref<3x32x32xbf16, #tpu.memory_space<vmem>>, vector<1x32x32xbf16>
    %15 = vector.shape_cast %14 : vector<1x32x32xbf16> to vector<32x32xbf16>
    %16 = arith.truncf %4 : vector<16x32xf32> to vector<16x32xbf16>
    %cst_12 = arith.constant dense<0.000000e+00> : vector<16x32xf32>
    %17 = tpu.matmul %16, %15, %cst_12 {dimension_numbers = #tpu.dot_dimension_numbers<[1], [0], [0], [1], [0, 0, 1, 1], [], []>} : vector<16x32xbf16>, vector<32x32xbf16>, vector<16x32xf32> -> vector<16x32xf32>
    %18 = arith.addf %13, %17 : vector<16x32xf32>
    %19 = vector.broadcast %0 : vector<1x32xf32> to vector<16x32xf32>
    %20 = arith.addf %18, %19 : vector<16x32xf32>
    %cst_13 = arith.constant dense<0.000000e+00> : vector<32xf32>
    %21 = vector.multi_reduction <add>, %20, %cst_13 [0] : vector<16x32xf32> to vector<32xf32>
    %22 = vector.shape_cast %21 : vector<32xf32> to vector<1x32xf32>
    %c1_14 = arith.constant 1 : index
    %c0_15 = arith.constant 0 : index
    %c0_16 = arith.constant 0 : index
    %23 = vector.load %arg1[%c1_14, %c0_15, %c0_16] : memref<2x16x32xf32, #tpu.memory_space<vmem>>, vector<1x16x32xf32>
    %24 = vector.shape_cast %23 : vector<1x16x32xf32> to vector<16x32xf32>
    %c1_i32_17 = arith.constant 1 : i32
    %25 = tpu.dynamic_rotate %24 by %c1_i32_17 dim 0 : vector<16x32xf32>, i32 -> vector<16x32xf32>
    %c15_i32_18 = arith.constant 15 : i32
    %26 = tpu.dynamic_rotate %24 by %c15_i32_18 dim 0 : vector<16x32xf32>, i32 -> vector<16x32xf32>
    %c0_19 = arith.constant 0 : index
    %c0_20 = arith.constant 0 : index
    %c0_21 = arith.constant 0 : index
    %27 = vector.load %arg2[%c0_19, %c0_20, %c0_21] : memref<3x32x32xbf16, #tpu.memory_space<vmem>>, vector<1x32x32xbf16>
    %28 = vector.shape_cast %27 : vector<1x32x32xbf16> to vector<32x32xbf16>
    %29 = arith.truncf %25 : vector<16x32xf32> to vector<16x32xbf16>
    %cst_22 = arith.constant dense<0.000000e+00> : vector<16x32xf32>
    %30 = tpu.matmul %29, %28, %cst_22 {dimension_numbers = #tpu.dot_dimension_numbers<[1], [0], [0], [1], [0, 0, 1, 1], [], []>} : vector<16x32xbf16>, vector<32x32xbf16>, vector<16x32xf32> -> vector<16x32xf32>
    %c1_23 = arith.constant 1 : index
    %c0_24 = arith.constant 0 : index
    %c0_25 = arith.constant 0 : index
    %31 = vector.load %arg2[%c1_23, %c0_24, %c0_25] : memref<3x32x32xbf16, #tpu.memory_space<vmem>>, vector<1x32x32xbf16>
    %32 = vector.shape_cast %31 : vector<1x32x32xbf16> to vector<32x32xbf16>
    %33 = arith.truncf %24 : vector<16x32xf32> to vector<16x32xbf16>
    %cst_26 = arith.constant dense<0.000000e+00> : vector<16x32xf32>
    %34 = tpu.matmul %33, %32, %cst_26 {dimension_numbers = #tpu.dot_dimension_numbers<[1], [0], [0], [1], [0, 0, 1, 1], [], []>} : vector<16x32xbf16>, vector<32x32xbf16>, vector<16x32xf32> -> vector<16x32xf32>
    %35 = arith.addf %30, %34 : vector<16x32xf32>
    %c2_27 = arith.constant 2 : index
    %c0_28 = arith.constant 0 : index
    %c0_29 = arith.constant 0 : index
    %36 = vector.load %arg2[%c2_27, %c0_28, %c0_29] : memref<3x32x32xbf16, #tpu.memory_space<vmem>>, vector<1x32x32xbf16>
    %37 = vector.shape_cast %36 : vector<1x32x32xbf16> to vector<32x32xbf16>
    %38 = arith.truncf %26 : vector<16x32xf32> to vector<16x32xbf16>
    %cst_30 = arith.constant dense<0.000000e+00> : vector<16x32xf32>
    %39 = tpu.matmul %38, %37, %cst_30 {dimension_numbers = #tpu.dot_dimension_numbers<[1], [0], [0], [1], [0, 0, 1, 1], [], []>} : vector<16x32xbf16>, vector<32x32xbf16>, vector<16x32xf32> -> vector<16x32xf32>
    %40 = arith.addf %35, %39 : vector<16x32xf32>
    %41 = vector.broadcast %0 : vector<1x32xf32> to vector<16x32xf32>
    %42 = arith.addf %40, %41 : vector<16x32xf32>
    %cst_31 = arith.constant dense<0.000000e+00> : vector<32xf32>
    %43 = vector.multi_reduction <add>, %42, %cst_31 [0] : vector<16x32xf32> to vector<32xf32>
    %44 = vector.shape_cast %43 : vector<32xf32> to vector<1x32xf32>
    %45 = arith.addf %22, %44 : vector<1x32xf32>
    %cst_32 = arith.constant 3.125000e-02 : f32
    %46 = vector.broadcast %cst_32 : f32 to vector<1x32xf32>
    %47 = arith.mulf %45, %46 : vector<1x32xf32>
    %48 = vector.broadcast %47 : vector<1x32xf32> to vector<16x32xf32>
    %49 = arith.subf %20, %48 : vector<16x32xf32>
    %50 = arith.mulf %49, %49 : vector<16x32xf32>
    %cst_33 = arith.constant dense<0.000000e+00> : vector<32xf32>
    %51 = vector.multi_reduction <add>, %50, %cst_33 [0] : vector<16x32xf32> to vector<32xf32>
    %52 = vector.shape_cast %51 : vector<32xf32> to vector<1x32xf32>
    %53 = vector.broadcast %47 : vector<1x32xf32> to vector<16x32xf32>
    %54 = arith.subf %42, %53 : vector<16x32xf32>
    %55 = arith.mulf %54, %54 : vector<16x32xf32>
    %cst_34 = arith.constant dense<0.000000e+00> : vector<32xf32>
    %56 = vector.multi_reduction <add>, %55, %cst_34 [0] : vector<16x32xf32> to vector<32xf32>
    %57 = vector.shape_cast %56 : vector<32xf32> to vector<1x32xf32>
    %58 = arith.addf %52, %57 : vector<1x32xf32>
    %cst_35 = arith.constant 3.125000e-02 : f32
    %59 = vector.broadcast %cst_35 : f32 to vector<1x32xf32>
    %60 = arith.mulf %58, %59 : vector<1x32xf32>
    %cst_36 = arith.constant 9.99999974E-6 : f32
    %61 = vector.broadcast %cst_36 : f32 to vector<1x32xf32>
    %62 = arith.addf %60, %61 : vector<1x32xf32>
    %63 = math.rsqrt %62 : vector<1x32xf32>
    %c0_37 = arith.constant 0 : index
    %c0_38 = arith.constant 0 : index
    %64 = vector.load %arg4[%c0_37, %c0_38] : memref<1x32xf32, #tpu.memory_space<vmem>>, vector<1x32xf32>
    %65 = arith.mulf %63, %64 : vector<1x32xf32>
    %66 = vector.broadcast %47 : vector<1x32xf32> to vector<16x32xf32>
    %67 = arith.subf %20, %66 : vector<16x32xf32>
    %68 = vector.broadcast %65 : vector<1x32xf32> to vector<16x32xf32>
    %69 = arith.mulf %67, %68 : vector<16x32xf32>
    %c0_39 = arith.constant 0 : index
    %c0_40 = arith.constant 0 : index
    %70 = vector.load %arg5[%c0_39, %c0_40] : memref<1x32xf32, #tpu.memory_space<vmem>>, vector<1x32xf32>
    %71 = vector.broadcast %70 : vector<1x32xf32> to vector<16x32xf32>
    %72 = arith.addf %69, %71 : vector<16x32xf32>
    %cst_41 = arith.constant 0.000000e+00 : f32
    %73 = vector.broadcast %cst_41 : f32 to vector<16x32xf32>
    %74 = arith.cmpf ogt, %72, %73 : vector<16x32xf32>
    %cst_42 = arith.constant 0.000000e+00 : f32
    %75 = vector.broadcast %cst_42 : f32 to vector<16x32xf32>
    %76 = arith.minimumf %72, %75 : vector<16x32xf32>
    %77 = math.exp %76 : vector<16x32xf32>
    %cst_43 = arith.constant 1.000000e+00 : f32
    %78 = vector.broadcast %cst_43 : f32 to vector<16x32xf32>
    %79 = arith.subf %77, %78 : vector<16x32xf32>
    %80 = arith.select %74, %72, %79 : vector<16x32xi1>, vector<16x32xf32>
    %c0_44 = arith.constant 0 : index
    %c0_45 = arith.constant 0 : index
    %c0_46 = arith.constant 0 : index
    %81 = vector.load %arg6[%c0_44, %c0_45, %c0_46] : memref<2x16x32xf32, #tpu.memory_space<vmem>>, vector<1x16x32xf32>
    %82 = vector.shape_cast %81 : vector<1x16x32xf32> to vector<16x32xf32>
    %83 = vector.shape_cast %80 : vector<16x32xf32> to vector<1x16x32xf32>
    tpu.vector_store %arg6[%c0_44, %c0_45, %c0_46], %83 {strides = array<i32>} : memref<2x16x32xf32, #tpu.memory_space<vmem>>, vector<1x16x32xf32>,
    %84 = vector.broadcast %47 : vector<1x32xf32> to vector<16x32xf32>
    %85 = arith.subf %42, %84 : vector<16x32xf32>
    %86 = vector.broadcast %65 : vector<1x32xf32> to vector<16x32xf32>
    %87 = arith.mulf %85, %86 : vector<16x32xf32>
    %c0_47 = arith.constant 0 : index
    %c0_48 = arith.constant 0 : index
    %88 = vector.load %arg5[%c0_47, %c0_48] : memref<1x32xf32, #tpu.memory_space<vmem>>, vector<1x32xf32>
    %89 = vector.broadcast %88 : vector<1x32xf32> to vector<16x32xf32>
    %90 = arith.addf %87, %89 : vector<16x32xf32>
    %cst_49 = arith.constant 0.000000e+00 : f32
    %91 = vector.broadcast %cst_49 : f32 to vector<16x32xf32>
    %92 = arith.cmpf ogt, %90, %91 : vector<16x32xf32>
    %cst_50 = arith.constant 0.000000e+00 : f32
    %93 = vector.broadcast %cst_50 : f32 to vector<16x32xf32>
    %94 = arith.minimumf %90, %93 : vector<16x32xf32>
    %95 = math.exp %94 : vector<16x32xf32>
    %cst_51 = arith.constant 1.000000e+00 : f32
    %96 = vector.broadcast %cst_51 : f32 to vector<16x32xf32>
    %97 = arith.subf %95, %96 : vector<16x32xf32>
    %98 = arith.select %92, %90, %97 : vector<16x32xi1>, vector<16x32xf32>
    %c1_52 = arith.constant 1 : index
    %c0_53 = arith.constant 0 : index
    %c0_54 = arith.constant 0 : index
    %99 = vector.load %arg6[%c1_52, %c0_53, %c0_54] : memref<2x16x32xf32, #tpu.memory_space<vmem>>, vector<1x16x32xf32>
    %100 = vector.shape_cast %99 : vector<1x16x32xf32> to vector<16x32xf32>
    %101 = vector.shape_cast %98 : vector<16x32xf32> to vector<1x16x32xf32>
    tpu.vector_store %arg6[%c1_52, %c0_53, %c0_54], %101 {strides = array<i32>} : memref<2x16x32xf32, #tpu.memory_space<vmem>>, vector<1x16x32xf32>,
    return
  }
  func.func @transform_0(%arg0: i32) -> (i32, i32, i32) {
    %c0_i32 = arith.constant 0 : i32
    %c0_i32_0 = arith.constant 0 : i32
    %c0_i32_1 = arith.constant 0 : i32
    %c0_i32_2 = arith.constant 0 : i32
    return %c0_i32, %c0_i32_0, %c0_i32_1 : i32, i32, i32
  }
  func.func @transform_1(%arg0: i32) -> (i32, i32, i32) {
    %c0_i32 = arith.constant 0 : i32
    %c0_i32_0 = arith.constant 0 : i32
    %c0_i32_1 = arith.constant 0 : i32
    %c0_i32_2 = arith.constant 0 : i32
    return %c0_i32, %c0_i32_0, %c0_i32_1 : i32, i32, i32
  }
  func.func @transform_2(%arg0: i32) -> (i32, i32) {
    %c0_i32 = arith.constant 0 : i32
    %c0_i32_0 = arith.constant 0 : i32
    %c0_i32_1 = arith.constant 0 : i32
    return %c0_i32, %c0_i32_0 : i32, i32
  }
  func.func @transform_3(%arg0: i32) -> (i32, i32) {
    %c0_i32 = arith.constant 0 : i32
    %c0_i32_0 = arith.constant 0 : i32
    %c0_i32_1 = arith.constant 0 : i32
    return %c0_i32, %c0_i32_0 : i32, i32
  }
  func.func @transform_4(%arg0: i32) -> (i32, i32) {
    %c0_i32 = arith.constant 0 : i32
    %c0_i32_0 = arith.constant 0 : i32
    %c0_i32_1 = arith.constant 0 : i32
    return %c0_i32, %c0_i32_0 : i32, i32
  }
  func.func @transform_5(%arg0: i32) -> (i32, i32, i32) {
    %c0_i32 = arith.constant 0 : i32
    %c0_i32_0 = arith.constant 0 : i32
    %c0_i32_1 = arith.constant 0 : i32
    %c0_i32_2 = arith.constant 0 : i32
    return %c0_i32, %c0_i32_0, %c0_i32_1 : i32, i32, i32
  }
}

module attributes {stable_mosaic.version = 11 : i64} {
  func.func @_embed_kernel(%arg0: i32, %arg1: memref<1x16x4xf32, #tpu.memory_space<vmem>>, %arg2: memref<3x4x32xbf16, #tpu.memory_space<vmem>>, %arg3: memref<1x32xf32, #tpu.memory_space<vmem>>, %arg4: memref<1x16x32xf32, #tpu.memory_space<vmem>>, %arg5: memref<1x16x32xf32, #tpu.memory_space<vmem>>) attributes {dimension_semantics = [#tpu.dimension_semantics<parallel>], iteration_bounds = array<i64: 2>, scalar_prefetch = 0 : i64, scratch_operands = 0 : i64, tpu.core_type = #tpu.core_type<tc>, window_params = [{transform_indices = @transform_0, window_bounds = array<i64: 1, 16, 4>}, {pipeline_mode = #tpu.pipeline_mode<synchronous>, transform_indices = @transform_1, window_bounds = array<i64: 3, 4, 32>}, {pipeline_mode = #tpu.pipeline_mode<synchronous>, transform_indices = @transform_2, window_bounds = array<i64: 1, 32>}, {transform_indices = @transform_3, window_bounds = array<i64: 1, 16, 32>}, {transform_indices = @transform_4, window_bounds = array<i64: 1, 16, 32>}]} {
    %c0 = arith.constant 0 : index
    %c0_0 = arith.constant 0 : index
    %c0_1 = arith.constant 0 : index
    %0 = vector.load %arg1[%c0, %c0_0, %c0_1] : memref<1x16x4xf32, #tpu.memory_space<vmem>>, vector<1x16x4xf32>
    %1 = vector.shape_cast %0 : vector<1x16x4xf32> to vector<16x4xf32>
    %c0_2 = arith.constant 0 : index
    %c0_3 = arith.constant 0 : index
    %2 = vector.load %arg3[%c0_2, %c0_3] : memref<1x32xf32, #tpu.memory_space<vmem>>, vector<1x32xf32>
    %c1_i32 = arith.constant 1 : i32
    %3 = tpu.dynamic_rotate %1 by %c1_i32 dim 0 : vector<16x4xf32>, i32 -> vector<16x4xf32>
    %c15_i32 = arith.constant 15 : i32
    %4 = tpu.dynamic_rotate %1 by %c15_i32 dim 0 : vector<16x4xf32>, i32 -> vector<16x4xf32>
    %c0_4 = arith.constant 0 : index
    %c0_5 = arith.constant 0 : index
    %c0_6 = arith.constant 0 : index
    %5 = vector.load %arg2[%c0_4, %c0_5, %c0_6] : memref<3x4x32xbf16, #tpu.memory_space<vmem>>, vector<1x4x32xbf16>
    %6 = vector.shape_cast %5 : vector<1x4x32xbf16> to vector<4x32xbf16>
    %7 = arith.truncf %3 : vector<16x4xf32> to vector<16x4xbf16>
    %cst = arith.constant dense<0.000000e+00> : vector<16x32xf32>
    %8 = tpu.matmul %7, %6, %cst {dimension_numbers = #tpu.dot_dimension_numbers<[1], [0], [0], [1], [0, 0, 1, 1], [], []>} : vector<16x4xbf16>, vector<4x32xbf16>, vector<16x32xf32> -> vector<16x32xf32>
    %c1 = arith.constant 1 : index
    %c0_7 = arith.constant 0 : index
    %c0_8 = arith.constant 0 : index
    %9 = vector.load %arg2[%c1, %c0_7, %c0_8] : memref<3x4x32xbf16, #tpu.memory_space<vmem>>, vector<1x4x32xbf16>
    %10 = vector.shape_cast %9 : vector<1x4x32xbf16> to vector<4x32xbf16>
    %11 = arith.truncf %1 : vector<16x4xf32> to vector<16x4xbf16>
    %cst_9 = arith.constant dense<0.000000e+00> : vector<16x32xf32>
    %12 = tpu.matmul %11, %10, %cst_9 {dimension_numbers = #tpu.dot_dimension_numbers<[1], [0], [0], [1], [0, 0, 1, 1], [], []>} : vector<16x4xbf16>, vector<4x32xbf16>, vector<16x32xf32> -> vector<16x32xf32>
    %13 = arith.addf %8, %12 : vector<16x32xf32>
    %c2 = arith.constant 2 : index
    %c0_10 = arith.constant 0 : index
    %c0_11 = arith.constant 0 : index
    %14 = vector.load %arg2[%c2, %c0_10, %c0_11] : memref<3x4x32xbf16, #tpu.memory_space<vmem>>, vector<1x4x32xbf16>
    %15 = vector.shape_cast %14 : vector<1x4x32xbf16> to vector<4x32xbf16>
    %16 = arith.truncf %4 : vector<16x4xf32> to vector<16x4xbf16>
    %cst_12 = arith.constant dense<0.000000e+00> : vector<16x32xf32>
    %17 = tpu.matmul %16, %15, %cst_12 {dimension_numbers = #tpu.dot_dimension_numbers<[1], [0], [0], [1], [0, 0, 1, 1], [], []>} : vector<16x4xbf16>, vector<4x32xbf16>, vector<16x32xf32> -> vector<16x32xf32>
    %18 = arith.addf %13, %17 : vector<16x32xf32>
    %19 = vector.broadcast %2 : vector<1x32xf32> to vector<16x32xf32>
    %20 = arith.addf %18, %19 : vector<16x32xf32>
    %c0_13 = arith.constant 0 : index
    %c0_14 = arith.constant 0 : index
    %c0_15 = arith.constant 0 : index
    %21 = vector.load %arg4[%c0_13, %c0_14, %c0_15] : memref<1x16x32xf32, #tpu.memory_space<vmem>>, vector<1x16x32xf32>
    %22 = vector.shape_cast %21 : vector<1x16x32xf32> to vector<16x32xf32>
    %23 = arith.addf %20, %22 : vector<16x32xf32>
    %c0_16 = arith.constant 0 : index
    %c0_17 = arith.constant 0 : index
    %c0_18 = arith.constant 0 : index
    %24 = vector.load %arg5[%c0_16, %c0_17, %c0_18] : memref<1x16x32xf32, #tpu.memory_space<vmem>>, vector<1x16x32xf32>
    %25 = vector.shape_cast %24 : vector<1x16x32xf32> to vector<16x32xf32>
    %26 = vector.shape_cast %23 : vector<16x32xf32> to vector<1x16x32xf32>
    tpu.vector_store %arg5[%c0_16, %c0_17, %c0_18], %26 {strides = array<i32>} : memref<1x16x32xf32, #tpu.memory_space<vmem>>, vector<1x16x32xf32>,
    return
  }
  func.func @transform_0(%arg0: i32) -> (i32, i32, i32) {
    %c0_i32 = arith.constant 0 : i32
    %c0_i32_0 = arith.constant 0 : i32
    %c0_i32_1 = arith.constant 0 : i32
    return %arg0, %c0_i32, %c0_i32_0 : i32, i32, i32
  }
  func.func @transform_1(%arg0: i32) -> (i32, i32, i32) {
    %c0_i32 = arith.constant 0 : i32
    %c0_i32_0 = arith.constant 0 : i32
    %c0_i32_1 = arith.constant 0 : i32
    %c0_i32_2 = arith.constant 0 : i32
    return %c0_i32, %c0_i32_0, %c0_i32_1 : i32, i32, i32
  }
  func.func @transform_2(%arg0: i32) -> (i32, i32) {
    %c0_i32 = arith.constant 0 : i32
    %c0_i32_0 = arith.constant 0 : i32
    %c0_i32_1 = arith.constant 0 : i32
    return %c0_i32, %c0_i32_0 : i32, i32
  }
  func.func @transform_3(%arg0: i32) -> (i32, i32, i32) {
    %c0_i32 = arith.constant 0 : i32
    %c0_i32_0 = arith.constant 0 : i32
    %c0_i32_1 = arith.constant 0 : i32
    return %arg0, %c0_i32, %c0_i32_0 : i32, i32, i32
  }
  func.func @transform_4(%arg0: i32) -> (i32, i32, i32) {
    %c0_i32 = arith.constant 0 : i32
    %c0_i32_0 = arith.constant 0 : i32
    %c0_i32_1 = arith.constant 0 : i32
    return %arg0, %c0_i32, %c0_i32_0 : i32, i32, i32
  }
}

module attributes {stable_mosaic.version = 11 : i64} {
  func.func @_encoder_layer_kernel(%arg0: i32, %arg1: i32, %arg2: memref<1x16x32xf32, #tpu.memory_space<vmem>>, %arg3: memref<4x32x32xbf16, #tpu.memory_space<vmem>>, %arg4: memref<4x1x32xf32, #tpu.memory_space<vmem>>, %arg5: memref<1x32xf32, #tpu.memory_space<vmem>>, %arg6: memref<1x32xf32, #tpu.memory_space<vmem>>, %arg7: memref<32x32xbf16, #tpu.memory_space<vmem>>, %arg8: memref<1x32xf32, #tpu.memory_space<vmem>>, %arg9: memref<32x32xbf16, #tpu.memory_space<vmem>>, %arg10: memref<1x32xf32, #tpu.memory_space<vmem>>, %arg11: memref<1x32xf32, #tpu.memory_space<vmem>>, %arg12: memref<1x32xf32, #tpu.memory_space<vmem>>, %arg13: memref<1x16x32xf32, #tpu.memory_space<vmem>>) attributes {dimension_semantics = [#tpu.dimension_semantics<parallel>, #tpu.dimension_semantics<parallel>], iteration_bounds = array<i64: 2, 1>, scalar_prefetch = 0 : i64, scratch_operands = 0 : i64, tpu.core_type = #tpu.core_type<tc>, window_params = [{transform_indices = @transform_0, window_bounds = array<i64: 1, 16, 32>}, {pipeline_mode = #tpu.pipeline_mode<synchronous>, transform_indices = @transform_1, window_bounds = array<i64: 4, 32, 32>}, {pipeline_mode = #tpu.pipeline_mode<synchronous>, transform_indices = @transform_2, window_bounds = array<i64: 4, 1, 32>}, {pipeline_mode = #tpu.pipeline_mode<synchronous>, transform_indices = @transform_3, window_bounds = array<i64: 1, 32>}, {pipeline_mode = #tpu.pipeline_mode<synchronous>, transform_indices = @transform_4, window_bounds = array<i64: 1, 32>}, {pipeline_mode = #tpu.pipeline_mode<synchronous>, transform_indices = @transform_5, window_bounds = array<i64: 32, 32>}, {pipeline_mode = #tpu.pipeline_mode<synchronous>, transform_indices = @transform_6, window_bounds = array<i64: 1, 32>}, {pipeline_mode = #tpu.pipeline_mode<synchronous>, transform_indices = @transform_7, window_bounds = array<i64: 32, 32>}, {pipeline_mode = #tpu.pipeline_mode<synchronous>, transform_indices = @transform_8, window_bounds = array<i64: 1, 32>}, {pipeline_mode = #tpu.pipeline_mode<synchronous>, transform_indices = @transform_9, window_bounds = array<i64: 1, 32>}, {pipeline_mode = #tpu.pipeline_mode<synchronous>, transform_indices = @transform_10, window_bounds = array<i64: 1, 32>}, {transform_indices = @transform_11, window_bounds = array<i64: 1, 16, 32>}]} {
    %c0 = arith.constant 0 : index
    %c0_0 = arith.constant 0 : index
    %c0_1 = arith.constant 0 : index
    %0 = vector.load %arg2[%c0, %c0_0, %c0_1] : memref<1x16x32xf32, #tpu.memory_space<vmem>>, vector<1x16x32xf32>
    %1 = vector.shape_cast %0 : vector<1x16x32xf32> to vector<16x32xf32>
    %c16_i32 = arith.constant 16 : i32
    %2 = arith.muli %arg1, %c16_i32 : i32
    %3 = tpu.assume_multiple %2, 16 : i32
    %c0_2 = arith.constant 0 : index
    %4 = arith.index_cast %3 : i32 to index
    %c0_3 = arith.constant 0 : index
    %5 = vector.load %arg2[%c0_2, %4, %c0_3] : memref<1x16x32xf32, #tpu.memory_space<vmem>>, vector<1x16x32xf32>
    %6 = vector.shape_cast %5 : vector<1x16x32xf32> to vector<16x32xf32>
    %c0_4 = arith.constant 0 : index
    %c0_5 = arith.constant 0 : index
    %c0_6 = arith.constant 0 : index
    %7 = vector.load %arg3[%c0_4, %c0_5, %c0_6] : memref<4x32x32xbf16, #tpu.memory_space<vmem>>, vector<1x32x32xbf16>
    %8 = vector.shape_cast %7 : vector<1x32x32xbf16> to vector<32x32xbf16>
    %c1 = arith.constant 1 : index
    %c0_7 = arith.constant 0 : index
    %c0_8 = arith.constant 0 : index
    %9 = vector.load %arg3[%c1, %c0_7, %c0_8] : memref<4x32x32xbf16, #tpu.memory_space<vmem>>, vector<1x32x32xbf16>
    %10 = vector.shape_cast %9 : vector<1x32x32xbf16> to vector<32x32xbf16>
    %c2 = arith.constant 2 : index
    %c0_9 = arith.constant 0 : index
    %c0_10 = arith.constant 0 : index
    %11 = vector.load %arg3[%c2, %c0_9, %c0_10] : memref<4x32x32xbf16, #tpu.memory_space<vmem>>, vector<1x32x32xbf16>
    %12 = vector.shape_cast %11 : vector<1x32x32xbf16> to vector<32x32xbf16>
    %c3 = arith.constant 3 : index
    %c0_11 = arith.constant 0 : index
    %c0_12 = arith.constant 0 : index
    %13 = vector.load %arg3[%c3, %c0_11, %c0_12] : memref<4x32x32xbf16, #tpu.memory_space<vmem>>, vector<1x32x32xbf16>
    %14 = vector.shape_cast %13 : vector<1x32x32xbf16> to vector<32x32xbf16>
    %c0_13 = arith.constant 0 : index
    %c0_14 = arith.constant 0 : index
    %c0_15 = arith.constant 0 : index
    %15 = vector.load %arg4[%c0_13, %c0_14, %c0_15] : memref<4x1x32xf32, #tpu.memory_space<vmem>>, vector<1x1x32xf32>
    %16 = vector.shape_cast %15 : vector<1x1x32xf32> to vector<1x32xf32>
    %c1_16 = arith.constant 1 : index
    %c0_17 = arith.constant 0 : index
    %c0_18 = arith.constant 0 : index
    %17 = vector.load %arg4[%c1_16, %c0_17, %c0_18] : memref<4x1x32xf32, #tpu.memory_space<vmem>>, vector<1x1x32xf32>
    %18 = vector.shape_cast %17 : vector<1x1x32xf32> to vector<1x32xf32>
    %c2_19 = arith.constant 2 : index
    %c0_20 = arith.constant 0 : index
    %c0_21 = arith.constant 0 : index
    %19 = vector.load %arg4[%c2_19, %c0_20, %c0_21] : memref<4x1x32xf32, #tpu.memory_space<vmem>>, vector<1x1x32xf32>
    %20 = vector.shape_cast %19 : vector<1x1x32xf32> to vector<1x32xf32>
    %c3_22 = arith.constant 3 : index
    %c0_23 = arith.constant 0 : index
    %c0_24 = arith.constant 0 : index
    %21 = vector.load %arg4[%c3_22, %c0_23, %c0_24] : memref<4x1x32xf32, #tpu.memory_space<vmem>>, vector<1x1x32xf32>
    %22 = vector.shape_cast %21 : vector<1x1x32xf32> to vector<1x32xf32>
    %23 = arith.truncf %6 : vector<16x32xf32> to vector<16x32xbf16>
    %cst = arith.constant dense<0.000000e+00> : vector<16x32xf32>
    %24 = tpu.matmul %23, %8, %cst {dimension_numbers = #tpu.dot_dimension_numbers<[1], [0], [0], [1], [0, 0, 1, 1], [], []>} : vector<16x32xbf16>, vector<32x32xbf16>, vector<16x32xf32> -> vector<16x32xf32>
    %25 = vector.broadcast %16 : vector<1x32xf32> to vector<16x32xf32>
    %26 = arith.addf %24, %25 : vector<16x32xf32>
    %cst_25 = arith.constant 0.353553385 : f32
    %27 = vector.broadcast %cst_25 : f32 to vector<16x32xf32>
    %28 = arith.mulf %26, %27 : vector<16x32xf32>
    %29 = arith.truncf %1 : vector<16x32xf32> to vector<16x32xbf16>
    %cst_26 = arith.constant dense<0.000000e+00> : vector<16x32xf32>
    %30 = tpu.matmul %29, %10, %cst_26 {dimension_numbers = #tpu.dot_dimension_numbers<[1], [0], [0], [1], [0, 0, 1, 1], [], []>} : vector<16x32xbf16>, vector<32x32xbf16>, vector<16x32xf32> -> vector<16x32xf32>
    %31 = vector.broadcast %18 : vector<1x32xf32> to vector<16x32xf32>
    %32 = arith.addf %30, %31 : vector<16x32xf32>
    %33 = arith.truncf %1 : vector<16x32xf32> to vector<16x32xbf16>
    %cst_27 = arith.constant dense<0.000000e+00> : vector<16x32xf32>
    %34 = tpu.matmul %33, %12, %cst_27 {dimension_numbers = #tpu.dot_dimension_numbers<[1], [0], [0], [1], [0, 0, 1, 1], [], []>} : vector<16x32xbf16>, vector<32x32xbf16>, vector<16x32xf32> -> vector<16x32xf32>
    %35 = vector.broadcast %20 : vector<1x32xf32> to vector<16x32xf32>
    %36 = arith.addf %34, %35 : vector<16x32xf32>
    %37 = arith.truncf %28 : vector<16x32xf32> to vector<16x32xbf16>
    %38 = arith.truncf %32 : vector<16x32xf32> to vector<16x32xbf16>
    %39 = arith.truncf %36 : vector<16x32xf32> to vector<16x32xbf16>
    %40 = vector.extract_strided_slice %37 {offsets = [0, 0], sizes = [16, 8], strides = [1, 1]} : vector<16x32xbf16> to vector<16x8xbf16>
    %41 = vector.extract_strided_slice %38 {offsets = [0, 0], sizes = [16, 8], strides = [1, 1]} : vector<16x32xbf16> to vector<16x8xbf16>
    %42 = vector.extract_strided_slice %39 {offsets = [0, 0], sizes = [16, 8], strides = [1, 1]} : vector<16x32xbf16> to vector<16x8xbf16>
    %cst_28 = arith.constant dense<0.000000e+00> : vector<16x16xf32>
    %43 = tpu.matmul %40, %41, %cst_28 {dimension_numbers = #tpu.dot_dimension_numbers<[1], [1], [0], [0], [0, 0, 1, 0], [], []>} : vector<16x8xbf16>, vector<16x8xbf16>, vector<16x16xf32> -> vector<16x16xf32>
    %cst_29 = arith.constant dense<0xFF800000> : vector<16xf32>
    %44 = vector.multi_reduction <maximumf>, %43, %cst_29 [1] : vector<16x16xf32> to vector<16xf32>
    %45 = vector.shape_cast %44 : vector<16xf32> to vector<16x1xf32>
    %46 = vector.broadcast %45 : vector<16x1xf32> to vector<16x16xf32>
    %47 = arith.subf %43, %46 : vector<16x16xf32>
    %48 = math.exp %47 : vector<16x16xf32>
    %cst_30 = arith.constant dense<0.000000e+00> : vector<16xf32>
    %49 = vector.multi_reduction <add>, %48, %cst_30 [1] : vector<16x16xf32> to vector<16xf32>
    %50 = vector.shape_cast %49 : vector<16xf32> to vector<16x1xf32>
    %51 = tpu.reciprocal %50 {approx = true} : vector<16x1xf32> -> vector<16x1xf32>
    %52 = vector.broadcast %51 : vector<16x1xf32> to vector<16x16xf32>
    %53 = arith.mulf %48, %52 : vector<16x16xf32>
    %54 = arith.truncf %53 : vector<16x16xf32> to vector<16x16xbf16>
    %cst_31 = arith.constant dense<0.000000e+00> : vector<16x8xf32>
    %55 = tpu.matmul %54, %42, %cst_31 {dimension_numbers = #tpu.dot_dimension_numbers<[1], [0], [0], [1], [0, 0, 1, 1], [], []>} : vector<16x16xbf16>, vector<16x8xbf16>, vector<16x8xf32> -> vector<16x8xf32>
    %56 = vector.extract_strided_slice %14 {offsets = [0, 0], sizes = [8, 32], strides = [1, 1]} : vector<32x32xbf16> to vector<8x32xbf16>
    %57 = arith.truncf %55 : vector<16x8xf32> to vector<16x8xbf16>
    %cst_32 = arith.constant dense<0.000000e+00> : vector<16x32xf32>
    %58 = tpu.matmul %57, %56, %cst_32 {dimension_numbers = #tpu.dot_dimension_numbers<[1], [0], [0], [1], [0, 0, 1, 1], [], []>} : vector<16x8xbf16>, vector<8x32xbf16>, vector<16x32xf32> -> vector<16x32xf32>
    %59 = vector.extract_strided_slice %37 {offsets = [0, 8], sizes = [16, 8], strides = [1, 1]} : vector<16x32xbf16> to vector<16x8xbf16>
    %60 = vector.extract_strided_slice %38 {offsets = [0, 8], sizes = [16, 8], strides = [1, 1]} : vector<16x32xbf16> to vector<16x8xbf16>
    %61 = vector.extract_strided_slice %39 {offsets = [0, 8], sizes = [16, 8], strides = [1, 1]} : vector<16x32xbf16> to vector<16x8xbf16>
    %cst_33 = arith.constant dense<0.000000e+00> : vector<16x16xf32>
    %62 = tpu.matmul %59, %60, %cst_33 {dimension_numbers = #tpu.dot_dimension_numbers<[1], [1], [0], [0], [0, 0, 1, 0], [], []>} : vector<16x8xbf16>, vector<16x8xbf16>, vector<16x16xf32> -> vector<16x16xf32>
    %cst_34 = arith.constant dense<0xFF800000> : vector<16xf32>
    %63 = vector.multi_reduction <maximumf>, %62, %cst_34 [1] : vector<16x16xf32> to vector<16xf32>
    %64 = vector.shape_cast %63 : vector<16xf32> to vector<16x1xf32>
    %65 = vector.broadcast %64 : vector<16x1xf32> to vector<16x16xf32>
    %66 = arith.subf %62, %65 : vector<16x16xf32>
    %67 = math.exp %66 : vector<16x16xf32>
    %cst_35 = arith.constant dense<0.000000e+00> : vector<16xf32>
    %68 = vector.multi_reduction <add>, %67, %cst_35 [1] : vector<16x16xf32> to vector<16xf32>
    %69 = vector.shape_cast %68 : vector<16xf32> to vector<16x1xf32>
    %70 = tpu.reciprocal %69 {approx = true} : vector<16x1xf32> -> vector<16x1xf32>
    %71 = vector.broadcast %70 : vector<16x1xf32> to vector<16x16xf32>
    %72 = arith.mulf %67, %71 : vector<16x16xf32>
    %73 = arith.truncf %72 : vector<16x16xf32> to vector<16x16xbf16>
    %cst_36 = arith.constant dense<0.000000e+00> : vector<16x8xf32>
    %74 = tpu.matmul %73, %61, %cst_36 {dimension_numbers = #tpu.dot_dimension_numbers<[1], [0], [0], [1], [0, 0, 1, 1], [], []>} : vector<16x16xbf16>, vector<16x8xbf16>, vector<16x8xf32> -> vector<16x8xf32>
    %75 = vector.extract_strided_slice %14 {offsets = [8, 0], sizes = [8, 32], strides = [1, 1]} : vector<32x32xbf16> to vector<8x32xbf16>
    %76 = arith.truncf %74 : vector<16x8xf32> to vector<16x8xbf16>
    %cst_37 = arith.constant dense<0.000000e+00> : vector<16x32xf32>
    %77 = tpu.matmul %76, %75, %cst_37 {dimension_numbers = #tpu.dot_dimension_numbers<[1], [0], [0], [1], [0, 0, 1, 1], [], []>} : vector<16x8xbf16>, vector<8x32xbf16>, vector<16x32xf32> -> vector<16x32xf32>
    %78 = arith.addf %58, %77 : vector<16x32xf32>
    %79 = vector.extract_strided_slice %37 {offsets = [0, 16], sizes = [16, 8], strides = [1, 1]} : vector<16x32xbf16> to vector<16x8xbf16>
    %80 = vector.extract_strided_slice %38 {offsets = [0, 16], sizes = [16, 8], strides = [1, 1]} : vector<16x32xbf16> to vector<16x8xbf16>
    %81 = vector.extract_strided_slice %39 {offsets = [0, 16], sizes = [16, 8], strides = [1, 1]} : vector<16x32xbf16> to vector<16x8xbf16>
    %cst_38 = arith.constant dense<0.000000e+00> : vector<16x16xf32>
    %82 = tpu.matmul %79, %80, %cst_38 {dimension_numbers = #tpu.dot_dimension_numbers<[1], [1], [0], [0], [0, 0, 1, 0], [], []>} : vector<16x8xbf16>, vector<16x8xbf16>, vector<16x16xf32> -> vector<16x16xf32>
    %cst_39 = arith.constant dense<0xFF800000> : vector<16xf32>
    %83 = vector.multi_reduction <maximumf>, %82, %cst_39 [1] : vector<16x16xf32> to vector<16xf32>
    %84 = vector.shape_cast %83 : vector<16xf32> to vector<16x1xf32>
    %85 = vector.broadcast %84 : vector<16x1xf32> to vector<16x16xf32>
    %86 = arith.subf %82, %85 : vector<16x16xf32>
    %87 = math.exp %86 : vector<16x16xf32>
    %cst_40 = arith.constant dense<0.000000e+00> : vector<16xf32>
    %88 = vector.multi_reduction <add>, %87, %cst_40 [1] : vector<16x16xf32> to vector<16xf32>
    %89 = vector.shape_cast %88 : vector<16xf32> to vector<16x1xf32>
    %90 = tpu.reciprocal %89 {approx = true} : vector<16x1xf32> -> vector<16x1xf32>
    %91 = vector.broadcast %90 : vector<16x1xf32> to vector<16x16xf32>
    %92 = arith.mulf %87, %91 : vector<16x16xf32>
    %93 = arith.truncf %92 : vector<16x16xf32> to vector<16x16xbf16>
    %cst_41 = arith.constant dense<0.000000e+00> : vector<16x8xf32>
    %94 = tpu.matmul %93, %81, %cst_41 {dimension_numbers = #tpu.dot_dimension_numbers<[1], [0], [0], [1], [0, 0, 1, 1], [], []>} : vector<16x16xbf16>, vector<16x8xbf16>, vector<16x8xf32> -> vector<16x8xf32>
    %95 = vector.extract_strided_slice %14 {offsets = [16, 0], sizes = [8, 32], strides = [1, 1]} : vector<32x32xbf16> to vector<8x32xbf16>
    %96 = arith.truncf %94 : vector<16x8xf32> to vector<16x8xbf16>
    %cst_42 = arith.constant dense<0.000000e+00> : vector<16x32xf32>
    %97 = tpu.matmul %96, %95, %cst_42 {dimension_numbers = #tpu.dot_dimension_numbers<[1], [0], [0], [1], [0, 0, 1, 1], [], []>} : vector<16x8xbf16>, vector<8x32xbf16>, vector<16x32xf32> -> vector<16x32xf32>
    %98 = arith.addf %78, %97 : vector<16x32xf32>
    %99 = vector.extract_strided_slice %37 {offsets = [0, 24], sizes = [16, 8], strides = [1, 1]} : vector<16x32xbf16> to vector<16x8xbf16>
    %100 = vector.extract_strided_slice %38 {offsets = [0, 24], sizes = [16, 8], strides = [1, 1]} : vector<16x32xbf16> to vector<16x8xbf16>
    %101 = vector.extract_strided_slice %39 {offsets = [0, 24], sizes = [16, 8], strides = [1, 1]} : vector<16x32xbf16> to vector<16x8xbf16>
    %cst_43 = arith.constant dense<0.000000e+00> : vector<16x16xf32>
    %102 = tpu.matmul %99, %100, %cst_43 {dimension_numbers = #tpu.dot_dimension_numbers<[1], [1], [0], [0], [0, 0, 1, 0], [], []>} : vector<16x8xbf16>, vector<16x8xbf16>, vector<16x16xf32> -> vector<16x16xf32>
    %cst_44 = arith.constant dense<0xFF800000> : vector<16xf32>
    %103 = vector.multi_reduction <maximumf>, %102, %cst_44 [1] : vector<16x16xf32> to vector<16xf32>
    %104 = vector.shape_cast %103 : vector<16xf32> to vector<16x1xf32>
    %105 = vector.broadcast %104 : vector<16x1xf32> to vector<16x16xf32>
    %106 = arith.subf %102, %105 : vector<16x16xf32>
    %107 = math.exp %106 : vector<16x16xf32>
    %cst_45 = arith.constant dense<0.000000e+00> : vector<16xf32>
    %108 = vector.multi_reduction <add>, %107, %cst_45 [1] : vector<16x16xf32> to vector<16xf32>
    %109 = vector.shape_cast %108 : vector<16xf32> to vector<16x1xf32>
    %110 = tpu.reciprocal %109 {approx = true} : vector<16x1xf32> -> vector<16x1xf32>
    %111 = vector.broadcast %110 : vector<16x1xf32> to vector<16x16xf32>
    %112 = arith.mulf %107, %111 : vector<16x16xf32>
    %113 = arith.truncf %112 : vector<16x16xf32> to vector<16x16xbf16>
    %cst_46 = arith.constant dense<0.000000e+00> : vector<16x8xf32>
    %114 = tpu.matmul %113, %101, %cst_46 {dimension_numbers = #tpu.dot_dimension_numbers<[1], [0], [0], [1], [0, 0, 1, 1], [], []>} : vector<16x16xbf16>, vector<16x8xbf16>, vector<16x8xf32> -> vector<16x8xf32>
    %115 = vector.extract_strided_slice %14 {offsets = [24, 0], sizes = [8, 32], strides = [1, 1]} : vector<32x32xbf16> to vector<8x32xbf16>
    %116 = arith.truncf %114 : vector<16x8xf32> to vector<16x8xbf16>
    %cst_47 = arith.constant dense<0.000000e+00> : vector<16x32xf32>
    %117 = tpu.matmul %116, %115, %cst_47 {dimension_numbers = #tpu.dot_dimension_numbers<[1], [0], [0], [1], [0, 0, 1, 1], [], []>} : vector<16x8xbf16>, vector<8x32xbf16>, vector<16x32xf32> -> vector<16x32xf32>
    %118 = arith.addf %98, %117 : vector<16x32xf32>
    %119 = vector.broadcast %22 : vector<1x32xf32> to vector<16x32xf32>
    %120 = arith.addf %118, %119 : vector<16x32xf32>
    %121 = arith.addf %6, %120 : vector<16x32xf32>
    %c0_48 = arith.constant 0 : index
    %c0_49 = arith.constant 0 : index
    %122 = vector.load %arg5[%c0_48, %c0_49] : memref<1x32xf32, #tpu.memory_space<vmem>>, vector<1x32xf32>
    %c0_50 = arith.constant 0 : index
    %c0_51 = arith.constant 0 : index
    %123 = vector.load %arg6[%c0_50, %c0_51] : memref<1x32xf32, #tpu.memory_space<vmem>>, vector<1x32xf32>
    %cst_52 = arith.constant dense<0.000000e+00> : vector<16xf32>
    %124 = vector.multi_reduction <add>, %121, %cst_52 [1] : vector<16x32xf32> to vector<16xf32>
    %125 = vector.shape_cast %124 : vector<16xf32> to vector<16x1xf32>
    %cst_53 = arith.constant 3.200000e+01 : f32
    %126 = vector.broadcast %cst_53 : f32 to vector<16x1xf32>
    %127 = arith.divf %125, %126 : vector<16x1xf32>
    %128 = vector.broadcast %127 : vector<16x1xf32> to vector<16x32xf32>
    %129 = arith.subf %121, %128 : vector<16x32xf32>
    %130 = arith.mulf %129, %129 : vector<16x32xf32>
    %cst_54 = arith.constant dense<0.000000e+00> : vector<16xf32>
    %131 = vector.multi_reduction <add>, %130, %cst_54 [1] : vector<16x32xf32> to vector<16xf32>
    %132 = vector.shape_cast %131 : vector<16xf32> to vector<16x1xf32>
    %cst_55 = arith.constant 3.200000e+01 : f32
    %133 = vector.broadcast %cst_55 : f32 to vector<16x1xf32>
    %134 = arith.divf %132, %133 : vector<16x1xf32>
    %cst_56 = arith.constant 9.99999974E-6 : f32
    %135 = vector.broadcast %cst_56 : f32 to vector<16x1xf32>
    %136 = arith.addf %134, %135 : vector<16x1xf32>
    %137 = math.rsqrt %136 : vector<16x1xf32>
    %138 = vector.broadcast %137 : vector<16x1xf32> to vector<16x32xf32>
    %139 = arith.mulf %129, %138 : vector<16x32xf32>
    %140 = vector.broadcast %122 : vector<1x32xf32> to vector<16x32xf32>
    %141 = arith.mulf %139, %140 : vector<16x32xf32>
    %142 = vector.broadcast %123 : vector<1x32xf32> to vector<16x32xf32>
    %143 = arith.addf %141, %142 : vector<16x32xf32>
    %c0_57 = arith.constant 0 : index
    %c0_58 = arith.constant 0 : index
    %144 = vector.load %arg7[%c0_57, %c0_58] : memref<32x32xbf16, #tpu.memory_space<vmem>>, vector<32x32xbf16>
    %145 = arith.truncf %143 : vector<16x32xf32> to vector<16x32xbf16>
    %cst_59 = arith.constant dense<0.000000e+00> : vector<16x32xf32>
    %146 = tpu.matmul %145, %144, %cst_59 {dimension_numbers = #tpu.dot_dimension_numbers<[1], [0], [0], [1], [0, 0, 1, 1], [], []>} : vector<16x32xbf16>, vector<32x32xbf16>, vector<16x32xf32> -> vector<16x32xf32>
    %c0_60 = arith.constant 0 : index
    %c0_61 = arith.constant 0 : index
    %147 = vector.load %arg8[%c0_60, %c0_61] : memref<1x32xf32, #tpu.memory_space<vmem>>, vector<1x32xf32>
    %148 = vector.broadcast %147 : vector<1x32xf32> to vector<16x32xf32>
    %149 = arith.addf %146, %148 : vector<16x32xf32>
    %cst_62 = arith.constant 5.000000e-01 : f32
    %150 = vector.broadcast %cst_62 : f32 to vector<16x32xf32>
    %151 = arith.mulf %150, %149 : vector<16x32xf32>
    %cst_63 = arith.constant 4.471500e-02 : f32
    %152 = vector.broadcast %cst_63 : f32 to vector<16x32xf32>
    %153 = arith.mulf %152, %149 : vector<16x32xf32>
    %154 = arith.mulf %153, %149 : vector<16x32xf32>
    %155 = arith.mulf %154, %149 : vector<16x32xf32>
    %156 = arith.addf %149, %155 : vector<16x32xf32>
    %cst_64 = arith.constant 0.797884583 : f32
    %157 = vector.broadcast %cst_64 : f32 to vector<16x32xf32>
    %158 = arith.mulf %157, %156 : vector<16x32xf32>
    %159 = math.tanh %158 : vector<16x32xf32>
    %cst_65 = arith.constant 1.000000e+00 : f32
    %160 = vector.broadcast %cst_65 : f32 to vector<16x32xf32>
    %161 = arith.addf %160, %159 : vector<16x32xf32>
    %162 = arith.mulf %151, %161 : vector<16x32xf32>
    %c0_66 = arith.constant 0 : index
    %c0_67 = arith.constant 0 : index
    %163 = vector.load %arg9[%c0_66, %c0_67] : memref<32x32xbf16, #tpu.memory_space<vmem>>, vector<32x32xbf16>
    %164 = arith.truncf %162 : vector<16x32xf32> to vector<16x32xbf16>
    %cst_68 = arith.constant dense<0.000000e+00> : vector<16x32xf32>
    %165 = tpu.matmul %164, %163, %cst_68 {dimension_numbers = #tpu.dot_dimension_numbers<[1], [0], [0], [1], [0, 0, 1, 1], [], []>} : vector<16x32xbf16>, vector<32x32xbf16>, vector<16x32xf32> -> vector<16x32xf32>
    %c0_69 = arith.constant 0 : index
    %c0_70 = arith.constant 0 : index
    %166 = vector.load %arg10[%c0_69, %c0_70] : memref<1x32xf32, #tpu.memory_space<vmem>>, vector<1x32xf32>
    %167 = vector.broadcast %166 : vector<1x32xf32> to vector<16x32xf32>
    %168 = arith.addf %165, %167 : vector<16x32xf32>
    %169 = arith.addf %143, %168 : vector<16x32xf32>
    %c0_71 = arith.constant 0 : index
    %c0_72 = arith.constant 0 : index
    %170 = vector.load %arg11[%c0_71, %c0_72] : memref<1x32xf32, #tpu.memory_space<vmem>>, vector<1x32xf32>
    %c0_73 = arith.constant 0 : index
    %c0_74 = arith.constant 0 : index
    %171 = vector.load %arg12[%c0_73, %c0_74] : memref<1x32xf32, #tpu.memory_space<vmem>>, vector<1x32xf32>
    %cst_75 = arith.constant dense<0.000000e+00> : vector<16xf32>
    %172 = vector.multi_reduction <add>, %169, %cst_75 [1] : vector<16x32xf32> to vector<16xf32>
    %173 = vector.shape_cast %172 : vector<16xf32> to vector<16x1xf32>
    %cst_76 = arith.constant 3.200000e+01 : f32
    %174 = vector.broadcast %cst_76 : f32 to vector<16x1xf32>
    %175 = arith.divf %173, %174 : vector<16x1xf32>
    %176 = vector.broadcast %175 : vector<16x1xf32> to vector<16x32xf32>
    %177 = arith.subf %169, %176 : vector<16x32xf32>
    %178 = arith.mulf %177, %177 : vector<16x32xf32>
    %cst_77 = arith.constant dense<0.000000e+00> : vector<16xf32>
    %179 = vector.multi_reduction <add>, %178, %cst_77 [1] : vector<16x32xf32> to vector<16xf32>
    %180 = vector.shape_cast %179 : vector<16xf32> to vector<16x1xf32>
    %cst_78 = arith.constant 3.200000e+01 : f32
    %181 = vector.broadcast %cst_78 : f32 to vector<16x1xf32>
    %182 = arith.divf %180, %181 : vector<16x1xf32>
    %cst_79 = arith.constant 9.99999974E-6 : f32
    %183 = vector.broadcast %cst_79 : f32 to vector<16x1xf32>
    %184 = arith.addf %182, %183 : vector<16x1xf32>
    %185 = math.rsqrt %184 : vector<16x1xf32>
    %186 = vector.broadcast %185 : vector<16x1xf32> to vector<16x32xf32>
    %187 = arith.mulf %177, %186 : vector<16x32xf32>
    %188 = vector.broadcast %170 : vector<1x32xf32> to vector<16x32xf32>
    %189 = arith.mulf %187, %188 : vector<16x32xf32>
    %190 = vector.broadcast %171 : vector<1x32xf32> to vector<16x32xf32>
    %191 = arith.addf %189, %190 : vector<16x32xf32>
    %c0_80 = arith.constant 0 : index
    %c0_81 = arith.constant 0 : index
    %c0_82 = arith.constant 0 : index
    %192 = vector.load %arg13[%c0_80, %c0_81, %c0_82] : memref<1x16x32xf32, #tpu.memory_space<vmem>>, vector<1x16x32xf32>
    %193 = vector.shape_cast %192 : vector<1x16x32xf32> to vector<16x32xf32>
    %194 = vector.shape_cast %191 : vector<16x32xf32> to vector<1x16x32xf32>
    tpu.vector_store %arg13[%c0_80, %c0_81, %c0_82], %194 {strides = array<i32>} : memref<1x16x32xf32, #tpu.memory_space<vmem>>, vector<1x16x32xf32>,
    return
  }
  func.func @transform_0(%arg0: i32, %arg1: i32) -> (i32, i32, i32) {
    %c0_i32 = arith.constant 0 : i32
    %c0_i32_0 = arith.constant 0 : i32
    %c0_i32_1 = arith.constant 0 : i32
    return %arg0, %c0_i32, %c0_i32_0 : i32, i32, i32
  }
  func.func @transform_1(%arg0: i32, %arg1: i32) -> (i32, i32, i32) {
    %c0_i32 = arith.constant 0 : i32
    %c0_i32_0 = arith.constant 0 : i32
    %c0_i32_1 = arith.constant 0 : i32
    %c0_i32_2 = arith.constant 0 : i32
    return %c0_i32, %c0_i32_0, %c0_i32_1 : i32, i32, i32
  }
  func.func @transform_2(%arg0: i32, %arg1: i32) -> (i32, i32, i32) {
    %c0_i32 = arith.constant 0 : i32
    %c0_i32_0 = arith.constant 0 : i32
    %c0_i32_1 = arith.constant 0 : i32
    %c0_i32_2 = arith.constant 0 : i32
    return %c0_i32, %c0_i32_0, %c0_i32_1 : i32, i32, i32
  }
  func.func @transform_3(%arg0: i32, %arg1: i32) -> (i32, i32) {
    %c0_i32 = arith.constant 0 : i32
    %c0_i32_0 = arith.constant 0 : i32
    %c0_i32_1 = arith.constant 0 : i32
    return %c0_i32, %c0_i32_0 : i32, i32
  }
  func.func @transform_4(%arg0: i32, %arg1: i32) -> (i32, i32) {
    %c0_i32 = arith.constant 0 : i32
    %c0_i32_0 = arith.constant 0 : i32
    %c0_i32_1 = arith.constant 0 : i32
    return %c0_i32, %c0_i32_0 : i32, i32
  }
  func.func @transform_5(%arg0: i32, %arg1: i32) -> (i32, i32) {
    %c0_i32 = arith.constant 0 : i32
    %c0_i32_0 = arith.constant 0 : i32
    %c0_i32_1 = arith.constant 0 : i32
    return %c0_i32, %c0_i32_0 : i32, i32
  }
  func.func @transform_6(%arg0: i32, %arg1: i32) -> (i32, i32) {
    %c0_i32 = arith.constant 0 : i32
    %c0_i32_0 = arith.constant 0 : i32
    %c0_i32_1 = arith.constant 0 : i32
    return %c0_i32, %c0_i32_0 : i32, i32
  }
  func.func @transform_7(%arg0: i32, %arg1: i32) -> (i32, i32) {
    %c0_i32 = arith.constant 0 : i32
    %c0_i32_0 = arith.constant 0 : i32
    %c0_i32_1 = arith.constant 0 : i32
    return %c0_i32, %c0_i32_0 : i32, i32
  }
  func.func @transform_8(%arg0: i32, %arg1: i32) -> (i32, i32) {
    %c0_i32 = arith.constant 0 : i32
    %c0_i32_0 = arith.constant 0 : i32
    %c0_i32_1 = arith.constant 0 : i32
    return %c0_i32, %c0_i32_0 : i32, i32
  }
  func.func @transform_9(%arg0: i32, %arg1: i32) -> (i32, i32) {
    %c0_i32 = arith.constant 0 : i32
    %c0_i32_0 = arith.constant 0 : i32
    %c0_i32_1 = arith.constant 0 : i32
    return %c0_i32, %c0_i32_0 : i32, i32
  }
  func.func @transform_10(%arg0: i32, %arg1: i32) -> (i32, i32) {
    %c0_i32 = arith.constant 0 : i32
    %c0_i32_0 = arith.constant 0 : i32
    %c0_i32_1 = arith.constant 0 : i32
    return %c0_i32, %c0_i32_0 : i32, i32
  }
  func.func @transform_11(%arg0: i32, %arg1: i32) -> (i32, i32, i32) {
    %c0_i32 = arith.constant 0 : i32
    %c0_i32_0 = arith.constant 0 : i32
    return %arg0, %arg1, %c0_i32 : i32, i32, i32
  }
}

module attributes {stable_mosaic.version = 11 : i64} {
  func.func @_encoder_layer_kernel(%arg0: i32, %arg1: i32, %arg2: memref<1x8x32xf32, #tpu.memory_space<vmem>>, %arg3: memref<4x32x32xbf16, #tpu.memory_space<vmem>>, %arg4: memref<4x1x32xf32, #tpu.memory_space<vmem>>, %arg5: memref<1x32xf32, #tpu.memory_space<vmem>>, %arg6: memref<1x32xf32, #tpu.memory_space<vmem>>, %arg7: memref<32x32xbf16, #tpu.memory_space<vmem>>, %arg8: memref<1x32xf32, #tpu.memory_space<vmem>>, %arg9: memref<32x32xbf16, #tpu.memory_space<vmem>>, %arg10: memref<1x32xf32, #tpu.memory_space<vmem>>, %arg11: memref<1x32xf32, #tpu.memory_space<vmem>>, %arg12: memref<1x32xf32, #tpu.memory_space<vmem>>, %arg13: memref<1x8x32xf32, #tpu.memory_space<vmem>>) attributes {dimension_semantics = [#tpu.dimension_semantics<parallel>, #tpu.dimension_semantics<parallel>], iteration_bounds = array<i64: 2, 1>, scalar_prefetch = 0 : i64, scratch_operands = 0 : i64, tpu.core_type = #tpu.core_type<tc>, window_params = [{transform_indices = @transform_0, window_bounds = array<i64: 1, 8, 32>}, {pipeline_mode = #tpu.pipeline_mode<synchronous>, transform_indices = @transform_1, window_bounds = array<i64: 4, 32, 32>}, {pipeline_mode = #tpu.pipeline_mode<synchronous>, transform_indices = @transform_2, window_bounds = array<i64: 4, 1, 32>}, {pipeline_mode = #tpu.pipeline_mode<synchronous>, transform_indices = @transform_3, window_bounds = array<i64: 1, 32>}, {pipeline_mode = #tpu.pipeline_mode<synchronous>, transform_indices = @transform_4, window_bounds = array<i64: 1, 32>}, {pipeline_mode = #tpu.pipeline_mode<synchronous>, transform_indices = @transform_5, window_bounds = array<i64: 32, 32>}, {pipeline_mode = #tpu.pipeline_mode<synchronous>, transform_indices = @transform_6, window_bounds = array<i64: 1, 32>}, {pipeline_mode = #tpu.pipeline_mode<synchronous>, transform_indices = @transform_7, window_bounds = array<i64: 32, 32>}, {pipeline_mode = #tpu.pipeline_mode<synchronous>, transform_indices = @transform_8, window_bounds = array<i64: 1, 32>}, {pipeline_mode = #tpu.pipeline_mode<synchronous>, transform_indices = @transform_9, window_bounds = array<i64: 1, 32>}, {pipeline_mode = #tpu.pipeline_mode<synchronous>, transform_indices = @transform_10, window_bounds = array<i64: 1, 32>}, {transform_indices = @transform_11, window_bounds = array<i64: 1, 8, 32>}]} {
    %c0 = arith.constant 0 : index
    %c0_0 = arith.constant 0 : index
    %c0_1 = arith.constant 0 : index
    %0 = vector.load %arg2[%c0, %c0_0, %c0_1] : memref<1x8x32xf32, #tpu.memory_space<vmem>>, vector<1x8x32xf32>
    %1 = vector.shape_cast %0 : vector<1x8x32xf32> to vector<8x32xf32>
    %c8_i32 = arith.constant 8 : i32
    %2 = arith.muli %arg1, %c8_i32 : i32
    %3 = tpu.assume_multiple %2, 8 : i32
    %c0_2 = arith.constant 0 : index
    %4 = arith.index_cast %3 : i32 to index
    %c0_3 = arith.constant 0 : index
    %5 = vector.load %arg2[%c0_2, %4, %c0_3] : memref<1x8x32xf32, #tpu.memory_space<vmem>>, vector<1x8x32xf32>
    %6 = vector.shape_cast %5 : vector<1x8x32xf32> to vector<8x32xf32>
    %c0_4 = arith.constant 0 : index
    %c0_5 = arith.constant 0 : index
    %c0_6 = arith.constant 0 : index
    %7 = vector.load %arg3[%c0_4, %c0_5, %c0_6] : memref<4x32x32xbf16, #tpu.memory_space<vmem>>, vector<1x32x32xbf16>
    %8 = vector.shape_cast %7 : vector<1x32x32xbf16> to vector<32x32xbf16>
    %c1 = arith.constant 1 : index
    %c0_7 = arith.constant 0 : index
    %c0_8 = arith.constant 0 : index
    %9 = vector.load %arg3[%c1, %c0_7, %c0_8] : memref<4x32x32xbf16, #tpu.memory_space<vmem>>, vector<1x32x32xbf16>
    %10 = vector.shape_cast %9 : vector<1x32x32xbf16> to vector<32x32xbf16>
    %c2 = arith.constant 2 : index
    %c0_9 = arith.constant 0 : index
    %c0_10 = arith.constant 0 : index
    %11 = vector.load %arg3[%c2, %c0_9, %c0_10] : memref<4x32x32xbf16, #tpu.memory_space<vmem>>, vector<1x32x32xbf16>
    %12 = vector.shape_cast %11 : vector<1x32x32xbf16> to vector<32x32xbf16>
    %c3 = arith.constant 3 : index
    %c0_11 = arith.constant 0 : index
    %c0_12 = arith.constant 0 : index
    %13 = vector.load %arg3[%c3, %c0_11, %c0_12] : memref<4x32x32xbf16, #tpu.memory_space<vmem>>, vector<1x32x32xbf16>
    %14 = vector.shape_cast %13 : vector<1x32x32xbf16> to vector<32x32xbf16>
    %c0_13 = arith.constant 0 : index
    %c0_14 = arith.constant 0 : index
    %c0_15 = arith.constant 0 : index
    %15 = vector.load %arg4[%c0_13, %c0_14, %c0_15] : memref<4x1x32xf32, #tpu.memory_space<vmem>>, vector<1x1x32xf32>
    %16 = vector.shape_cast %15 : vector<1x1x32xf32> to vector<1x32xf32>
    %c1_16 = arith.constant 1 : index
    %c0_17 = arith.constant 0 : index
    %c0_18 = arith.constant 0 : index
    %17 = vector.load %arg4[%c1_16, %c0_17, %c0_18] : memref<4x1x32xf32, #tpu.memory_space<vmem>>, vector<1x1x32xf32>
    %18 = vector.shape_cast %17 : vector<1x1x32xf32> to vector<1x32xf32>
    %c2_19 = arith.constant 2 : index
    %c0_20 = arith.constant 0 : index
    %c0_21 = arith.constant 0 : index
    %19 = vector.load %arg4[%c2_19, %c0_20, %c0_21] : memref<4x1x32xf32, #tpu.memory_space<vmem>>, vector<1x1x32xf32>
    %20 = vector.shape_cast %19 : vector<1x1x32xf32> to vector<1x32xf32>
    %c3_22 = arith.constant 3 : index
    %c0_23 = arith.constant 0 : index
    %c0_24 = arith.constant 0 : index
    %21 = vector.load %arg4[%c3_22, %c0_23, %c0_24] : memref<4x1x32xf32, #tpu.memory_space<vmem>>, vector<1x1x32xf32>
    %22 = vector.shape_cast %21 : vector<1x1x32xf32> to vector<1x32xf32>
    %23 = arith.truncf %6 : vector<8x32xf32> to vector<8x32xbf16>
    %cst = arith.constant dense<0.000000e+00> : vector<8x32xf32>
    %24 = tpu.matmul %23, %8, %cst {dimension_numbers = #tpu.dot_dimension_numbers<[1], [0], [0], [1], [0, 0, 1, 1], [], []>} : vector<8x32xbf16>, vector<32x32xbf16>, vector<8x32xf32> -> vector<8x32xf32>
    %25 = vector.broadcast %16 : vector<1x32xf32> to vector<8x32xf32>
    %26 = arith.addf %24, %25 : vector<8x32xf32>
    %cst_25 = arith.constant 0.353553385 : f32
    %27 = vector.broadcast %cst_25 : f32 to vector<8x32xf32>
    %28 = arith.mulf %26, %27 : vector<8x32xf32>
    %29 = arith.truncf %1 : vector<8x32xf32> to vector<8x32xbf16>
    %cst_26 = arith.constant dense<0.000000e+00> : vector<8x32xf32>
    %30 = tpu.matmul %29, %10, %cst_26 {dimension_numbers = #tpu.dot_dimension_numbers<[1], [0], [0], [1], [0, 0, 1, 1], [], []>} : vector<8x32xbf16>, vector<32x32xbf16>, vector<8x32xf32> -> vector<8x32xf32>
    %31 = vector.broadcast %18 : vector<1x32xf32> to vector<8x32xf32>
    %32 = arith.addf %30, %31 : vector<8x32xf32>
    %33 = arith.truncf %1 : vector<8x32xf32> to vector<8x32xbf16>
    %cst_27 = arith.constant dense<0.000000e+00> : vector<8x32xf32>
    %34 = tpu.matmul %33, %12, %cst_27 {dimension_numbers = #tpu.dot_dimension_numbers<[1], [0], [0], [1], [0, 0, 1, 1], [], []>} : vector<8x32xbf16>, vector<32x32xbf16>, vector<8x32xf32> -> vector<8x32xf32>
    %35 = vector.broadcast %20 : vector<1x32xf32> to vector<8x32xf32>
    %36 = arith.addf %34, %35 : vector<8x32xf32>
    %37 = arith.truncf %28 : vector<8x32xf32> to vector<8x32xbf16>
    %38 = arith.truncf %32 : vector<8x32xf32> to vector<8x32xbf16>
    %39 = arith.truncf %36 : vector<8x32xf32> to vector<8x32xbf16>
    %40 = vector.extract_strided_slice %37 {offsets = [0, 0], sizes = [8, 8], strides = [1, 1]} : vector<8x32xbf16> to vector<8x8xbf16>
    %41 = vector.extract_strided_slice %38 {offsets = [0, 0], sizes = [8, 8], strides = [1, 1]} : vector<8x32xbf16> to vector<8x8xbf16>
    %42 = vector.extract_strided_slice %39 {offsets = [0, 0], sizes = [8, 8], strides = [1, 1]} : vector<8x32xbf16> to vector<8x8xbf16>
    %cst_28 = arith.constant dense<0.000000e+00> : vector<8x8xf32>
    %43 = tpu.matmul %40, %41, %cst_28 {dimension_numbers = #tpu.dot_dimension_numbers<[1], [1], [0], [0], [0, 0, 1, 0], [], []>} : vector<8x8xbf16>, vector<8x8xbf16>, vector<8x8xf32> -> vector<8x8xf32>
    %cst_29 = arith.constant dense<0xFF800000> : vector<8xf32>
    %44 = vector.multi_reduction <maximumf>, %43, %cst_29 [1] : vector<8x8xf32> to vector<8xf32>
    %45 = vector.shape_cast %44 : vector<8xf32> to vector<8x1xf32>
    %46 = vector.broadcast %45 : vector<8x1xf32> to vector<8x8xf32>
    %47 = arith.subf %43, %46 : vector<8x8xf32>
    %48 = math.exp %47 : vector<8x8xf32>
    %cst_30 = arith.constant dense<0.000000e+00> : vector<8xf32>
    %49 = vector.multi_reduction <add>, %48, %cst_30 [1] : vector<8x8xf32> to vector<8xf32>
    %50 = vector.shape_cast %49 : vector<8xf32> to vector<8x1xf32>
    %51 = tpu.reciprocal %50 {approx = true} : vector<8x1xf32> -> vector<8x1xf32>
    %52 = vector.broadcast %51 : vector<8x1xf32> to vector<8x8xf32>
    %53 = arith.mulf %48, %52 : vector<8x8xf32>
    %54 = arith.truncf %53 : vector<8x8xf32> to vector<8x8xbf16>
    %cst_31 = arith.constant dense<0.000000e+00> : vector<8x8xf32>
    %55 = tpu.matmul %54, %42, %cst_31 {dimension_numbers = #tpu.dot_dimension_numbers<[1], [0], [0], [1], [0, 0, 1, 1], [], []>} : vector<8x8xbf16>, vector<8x8xbf16>, vector<8x8xf32> -> vector<8x8xf32>
    %56 = vector.extract_strided_slice %14 {offsets = [0, 0], sizes = [8, 32], strides = [1, 1]} : vector<32x32xbf16> to vector<8x32xbf16>
    %57 = arith.truncf %55 : vector<8x8xf32> to vector<8x8xbf16>
    %cst_32 = arith.constant dense<0.000000e+00> : vector<8x32xf32>
    %58 = tpu.matmul %57, %56, %cst_32 {dimension_numbers = #tpu.dot_dimension_numbers<[1], [0], [0], [1], [0, 0, 1, 1], [], []>} : vector<8x8xbf16>, vector<8x32xbf16>, vector<8x32xf32> -> vector<8x32xf32>
    %59 = vector.extract_strided_slice %37 {offsets = [0, 8], sizes = [8, 8], strides = [1, 1]} : vector<8x32xbf16> to vector<8x8xbf16>
    %60 = vector.extract_strided_slice %38 {offsets = [0, 8], sizes = [8, 8], strides = [1, 1]} : vector<8x32xbf16> to vector<8x8xbf16>
    %61 = vector.extract_strided_slice %39 {offsets = [0, 8], sizes = [8, 8], strides = [1, 1]} : vector<8x32xbf16> to vector<8x8xbf16>
    %cst_33 = arith.constant dense<0.000000e+00> : vector<8x8xf32>
    %62 = tpu.matmul %59, %60, %cst_33 {dimension_numbers = #tpu.dot_dimension_numbers<[1], [1], [0], [0], [0, 0, 1, 0], [], []>} : vector<8x8xbf16>, vector<8x8xbf16>, vector<8x8xf32> -> vector<8x8xf32>
    %cst_34 = arith.constant dense<0xFF800000> : vector<8xf32>
    %63 = vector.multi_reduction <maximumf>, %62, %cst_34 [1] : vector<8x8xf32> to vector<8xf32>
    %64 = vector.shape_cast %63 : vector<8xf32> to vector<8x1xf32>
    %65 = vector.broadcast %64 : vector<8x1xf32> to vector<8x8xf32>
    %66 = arith.subf %62, %65 : vector<8x8xf32>
    %67 = math.exp %66 : vector<8x8xf32>
    %cst_35 = arith.constant dense<0.000000e+00> : vector<8xf32>
    %68 = vector.multi_reduction <add>, %67, %cst_35 [1] : vector<8x8xf32> to vector<8xf32>
    %69 = vector.shape_cast %68 : vector<8xf32> to vector<8x1xf32>
    %70 = tpu.reciprocal %69 {approx = true} : vector<8x1xf32> -> vector<8x1xf32>
    %71 = vector.broadcast %70 : vector<8x1xf32> to vector<8x8xf32>
    %72 = arith.mulf %67, %71 : vector<8x8xf32>
    %73 = arith.truncf %72 : vector<8x8xf32> to vector<8x8xbf16>
    %cst_36 = arith.constant dense<0.000000e+00> : vector<8x8xf32>
    %74 = tpu.matmul %73, %61, %cst_36 {dimension_numbers = #tpu.dot_dimension_numbers<[1], [0], [0], [1], [0, 0, 1, 1], [], []>} : vector<8x8xbf16>, vector<8x8xbf16>, vector<8x8xf32> -> vector<8x8xf32>
    %75 = vector.extract_strided_slice %14 {offsets = [8, 0], sizes = [8, 32], strides = [1, 1]} : vector<32x32xbf16> to vector<8x32xbf16>
    %76 = arith.truncf %74 : vector<8x8xf32> to vector<8x8xbf16>
    %cst_37 = arith.constant dense<0.000000e+00> : vector<8x32xf32>
    %77 = tpu.matmul %76, %75, %cst_37 {dimension_numbers = #tpu.dot_dimension_numbers<[1], [0], [0], [1], [0, 0, 1, 1], [], []>} : vector<8x8xbf16>, vector<8x32xbf16>, vector<8x32xf32> -> vector<8x32xf32>
    %78 = arith.addf %58, %77 : vector<8x32xf32>
    %79 = vector.extract_strided_slice %37 {offsets = [0, 16], sizes = [8, 8], strides = [1, 1]} : vector<8x32xbf16> to vector<8x8xbf16>
    %80 = vector.extract_strided_slice %38 {offsets = [0, 16], sizes = [8, 8], strides = [1, 1]} : vector<8x32xbf16> to vector<8x8xbf16>
    %81 = vector.extract_strided_slice %39 {offsets = [0, 16], sizes = [8, 8], strides = [1, 1]} : vector<8x32xbf16> to vector<8x8xbf16>
    %cst_38 = arith.constant dense<0.000000e+00> : vector<8x8xf32>
    %82 = tpu.matmul %79, %80, %cst_38 {dimension_numbers = #tpu.dot_dimension_numbers<[1], [1], [0], [0], [0, 0, 1, 0], [], []>} : vector<8x8xbf16>, vector<8x8xbf16>, vector<8x8xf32> -> vector<8x8xf32>
    %cst_39 = arith.constant dense<0xFF800000> : vector<8xf32>
    %83 = vector.multi_reduction <maximumf>, %82, %cst_39 [1] : vector<8x8xf32> to vector<8xf32>
    %84 = vector.shape_cast %83 : vector<8xf32> to vector<8x1xf32>
    %85 = vector.broadcast %84 : vector<8x1xf32> to vector<8x8xf32>
    %86 = arith.subf %82, %85 : vector<8x8xf32>
    %87 = math.exp %86 : vector<8x8xf32>
    %cst_40 = arith.constant dense<0.000000e+00> : vector<8xf32>
    %88 = vector.multi_reduction <add>, %87, %cst_40 [1] : vector<8x8xf32> to vector<8xf32>
    %89 = vector.shape_cast %88 : vector<8xf32> to vector<8x1xf32>
    %90 = tpu.reciprocal %89 {approx = true} : vector<8x1xf32> -> vector<8x1xf32>
    %91 = vector.broadcast %90 : vector<8x1xf32> to vector<8x8xf32>
    %92 = arith.mulf %87, %91 : vector<8x8xf32>
    %93 = arith.truncf %92 : vector<8x8xf32> to vector<8x8xbf16>
    %cst_41 = arith.constant dense<0.000000e+00> : vector<8x8xf32>
    %94 = tpu.matmul %93, %81, %cst_41 {dimension_numbers = #tpu.dot_dimension_numbers<[1], [0], [0], [1], [0, 0, 1, 1], [], []>} : vector<8x8xbf16>, vector<8x8xbf16>, vector<8x8xf32> -> vector<8x8xf32>
    %95 = vector.extract_strided_slice %14 {offsets = [16, 0], sizes = [8, 32], strides = [1, 1]} : vector<32x32xbf16> to vector<8x32xbf16>
    %96 = arith.truncf %94 : vector<8x8xf32> to vector<8x8xbf16>
    %cst_42 = arith.constant dense<0.000000e+00> : vector<8x32xf32>
    %97 = tpu.matmul %96, %95, %cst_42 {dimension_numbers = #tpu.dot_dimension_numbers<[1], [0], [0], [1], [0, 0, 1, 1], [], []>} : vector<8x8xbf16>, vector<8x32xbf16>, vector<8x32xf32> -> vector<8x32xf32>
    %98 = arith.addf %78, %97 : vector<8x32xf32>
    %99 = vector.extract_strided_slice %37 {offsets = [0, 24], sizes = [8, 8], strides = [1, 1]} : vector<8x32xbf16> to vector<8x8xbf16>
    %100 = vector.extract_strided_slice %38 {offsets = [0, 24], sizes = [8, 8], strides = [1, 1]} : vector<8x32xbf16> to vector<8x8xbf16>
    %101 = vector.extract_strided_slice %39 {offsets = [0, 24], sizes = [8, 8], strides = [1, 1]} : vector<8x32xbf16> to vector<8x8xbf16>
    %cst_43 = arith.constant dense<0.000000e+00> : vector<8x8xf32>
    %102 = tpu.matmul %99, %100, %cst_43 {dimension_numbers = #tpu.dot_dimension_numbers<[1], [1], [0], [0], [0, 0, 1, 0], [], []>} : vector<8x8xbf16>, vector<8x8xbf16>, vector<8x8xf32> -> vector<8x8xf32>
    %cst_44 = arith.constant dense<0xFF800000> : vector<8xf32>
    %103 = vector.multi_reduction <maximumf>, %102, %cst_44 [1] : vector<8x8xf32> to vector<8xf32>
    %104 = vector.shape_cast %103 : vector<8xf32> to vector<8x1xf32>
    %105 = vector.broadcast %104 : vector<8x1xf32> to vector<8x8xf32>
    %106 = arith.subf %102, %105 : vector<8x8xf32>
    %107 = math.exp %106 : vector<8x8xf32>
    %cst_45 = arith.constant dense<0.000000e+00> : vector<8xf32>
    %108 = vector.multi_reduction <add>, %107, %cst_45 [1] : vector<8x8xf32> to vector<8xf32>
    %109 = vector.shape_cast %108 : vector<8xf32> to vector<8x1xf32>
    %110 = tpu.reciprocal %109 {approx = true} : vector<8x1xf32> -> vector<8x1xf32>
    %111 = vector.broadcast %110 : vector<8x1xf32> to vector<8x8xf32>
    %112 = arith.mulf %107, %111 : vector<8x8xf32>
    %113 = arith.truncf %112 : vector<8x8xf32> to vector<8x8xbf16>
    %cst_46 = arith.constant dense<0.000000e+00> : vector<8x8xf32>
    %114 = tpu.matmul %113, %101, %cst_46 {dimension_numbers = #tpu.dot_dimension_numbers<[1], [0], [0], [1], [0, 0, 1, 1], [], []>} : vector<8x8xbf16>, vector<8x8xbf16>, vector<8x8xf32> -> vector<8x8xf32>
    %115 = vector.extract_strided_slice %14 {offsets = [24, 0], sizes = [8, 32], strides = [1, 1]} : vector<32x32xbf16> to vector<8x32xbf16>
    %116 = arith.truncf %114 : vector<8x8xf32> to vector<8x8xbf16>
    %cst_47 = arith.constant dense<0.000000e+00> : vector<8x32xf32>
    %117 = tpu.matmul %116, %115, %cst_47 {dimension_numbers = #tpu.dot_dimension_numbers<[1], [0], [0], [1], [0, 0, 1, 1], [], []>} : vector<8x8xbf16>, vector<8x32xbf16>, vector<8x32xf32> -> vector<8x32xf32>
    %118 = arith.addf %98, %117 : vector<8x32xf32>
    %119 = vector.broadcast %22 : vector<1x32xf32> to vector<8x32xf32>
    %120 = arith.addf %118, %119 : vector<8x32xf32>
    %121 = arith.addf %6, %120 : vector<8x32xf32>
    %c0_48 = arith.constant 0 : index
    %c0_49 = arith.constant 0 : index
    %122 = vector.load %arg5[%c0_48, %c0_49] : memref<1x32xf32, #tpu.memory_space<vmem>>, vector<1x32xf32>
    %c0_50 = arith.constant 0 : index
    %c0_51 = arith.constant 0 : index
    %123 = vector.load %arg6[%c0_50, %c0_51] : memref<1x32xf32, #tpu.memory_space<vmem>>, vector<1x32xf32>
    %cst_52 = arith.constant dense<0.000000e+00> : vector<8xf32>
    %124 = vector.multi_reduction <add>, %121, %cst_52 [1] : vector<8x32xf32> to vector<8xf32>
    %125 = vector.shape_cast %124 : vector<8xf32> to vector<8x1xf32>
    %cst_53 = arith.constant 3.200000e+01 : f32
    %126 = vector.broadcast %cst_53 : f32 to vector<8x1xf32>
    %127 = arith.divf %125, %126 : vector<8x1xf32>
    %128 = vector.broadcast %127 : vector<8x1xf32> to vector<8x32xf32>
    %129 = arith.subf %121, %128 : vector<8x32xf32>
    %130 = arith.mulf %129, %129 : vector<8x32xf32>
    %cst_54 = arith.constant dense<0.000000e+00> : vector<8xf32>
    %131 = vector.multi_reduction <add>, %130, %cst_54 [1] : vector<8x32xf32> to vector<8xf32>
    %132 = vector.shape_cast %131 : vector<8xf32> to vector<8x1xf32>
    %cst_55 = arith.constant 3.200000e+01 : f32
    %133 = vector.broadcast %cst_55 : f32 to vector<8x1xf32>
    %134 = arith.divf %132, %133 : vector<8x1xf32>
    %cst_56 = arith.constant 9.99999974E-6 : f32
    %135 = vector.broadcast %cst_56 : f32 to vector<8x1xf32>
    %136 = arith.addf %134, %135 : vector<8x1xf32>
    %137 = math.rsqrt %136 : vector<8x1xf32>
    %138 = vector.broadcast %137 : vector<8x1xf32> to vector<8x32xf32>
    %139 = arith.mulf %129, %138 : vector<8x32xf32>
    %140 = vector.broadcast %122 : vector<1x32xf32> to vector<8x32xf32>
    %141 = arith.mulf %139, %140 : vector<8x32xf32>
    %142 = vector.broadcast %123 : vector<1x32xf32> to vector<8x32xf32>
    %143 = arith.addf %141, %142 : vector<8x32xf32>
    %c0_57 = arith.constant 0 : index
    %c0_58 = arith.constant 0 : index
    %144 = vector.load %arg7[%c0_57, %c0_58] : memref<32x32xbf16, #tpu.memory_space<vmem>>, vector<32x32xbf16>
    %145 = arith.truncf %143 : vector<8x32xf32> to vector<8x32xbf16>
    %cst_59 = arith.constant dense<0.000000e+00> : vector<8x32xf32>
    %146 = tpu.matmul %145, %144, %cst_59 {dimension_numbers = #tpu.dot_dimension_numbers<[1], [0], [0], [1], [0, 0, 1, 1], [], []>} : vector<8x32xbf16>, vector<32x32xbf16>, vector<8x32xf32> -> vector<8x32xf32>
    %c0_60 = arith.constant 0 : index
    %c0_61 = arith.constant 0 : index
    %147 = vector.load %arg8[%c0_60, %c0_61] : memref<1x32xf32, #tpu.memory_space<vmem>>, vector<1x32xf32>
    %148 = vector.broadcast %147 : vector<1x32xf32> to vector<8x32xf32>
    %149 = arith.addf %146, %148 : vector<8x32xf32>
    %cst_62 = arith.constant 5.000000e-01 : f32
    %150 = vector.broadcast %cst_62 : f32 to vector<8x32xf32>
    %151 = arith.mulf %150, %149 : vector<8x32xf32>
    %cst_63 = arith.constant 4.471500e-02 : f32
    %152 = vector.broadcast %cst_63 : f32 to vector<8x32xf32>
    %153 = arith.mulf %152, %149 : vector<8x32xf32>
    %154 = arith.mulf %153, %149 : vector<8x32xf32>
    %155 = arith.mulf %154, %149 : vector<8x32xf32>
    %156 = arith.addf %149, %155 : vector<8x32xf32>
    %cst_64 = arith.constant 0.797884583 : f32
    %157 = vector.broadcast %cst_64 : f32 to vector<8x32xf32>
    %158 = arith.mulf %157, %156 : vector<8x32xf32>
    %159 = math.tanh %158 : vector<8x32xf32>
    %cst_65 = arith.constant 1.000000e+00 : f32
    %160 = vector.broadcast %cst_65 : f32 to vector<8x32xf32>
    %161 = arith.addf %160, %159 : vector<8x32xf32>
    %162 = arith.mulf %151, %161 : vector<8x32xf32>
    %c0_66 = arith.constant 0 : index
    %c0_67 = arith.constant 0 : index
    %163 = vector.load %arg9[%c0_66, %c0_67] : memref<32x32xbf16, #tpu.memory_space<vmem>>, vector<32x32xbf16>
    %164 = arith.truncf %162 : vector<8x32xf32> to vector<8x32xbf16>
    %cst_68 = arith.constant dense<0.000000e+00> : vector<8x32xf32>
    %165 = tpu.matmul %164, %163, %cst_68 {dimension_numbers = #tpu.dot_dimension_numbers<[1], [0], [0], [1], [0, 0, 1, 1], [], []>} : vector<8x32xbf16>, vector<32x32xbf16>, vector<8x32xf32> -> vector<8x32xf32>
    %c0_69 = arith.constant 0 : index
    %c0_70 = arith.constant 0 : index
    %166 = vector.load %arg10[%c0_69, %c0_70] : memref<1x32xf32, #tpu.memory_space<vmem>>, vector<1x32xf32>
    %167 = vector.broadcast %166 : vector<1x32xf32> to vector<8x32xf32>
    %168 = arith.addf %165, %167 : vector<8x32xf32>
    %169 = arith.addf %143, %168 : vector<8x32xf32>
    %c0_71 = arith.constant 0 : index
    %c0_72 = arith.constant 0 : index
    %170 = vector.load %arg11[%c0_71, %c0_72] : memref<1x32xf32, #tpu.memory_space<vmem>>, vector<1x32xf32>
    %c0_73 = arith.constant 0 : index
    %c0_74 = arith.constant 0 : index
    %171 = vector.load %arg12[%c0_73, %c0_74] : memref<1x32xf32, #tpu.memory_space<vmem>>, vector<1x32xf32>
    %cst_75 = arith.constant dense<0.000000e+00> : vector<8xf32>
    %172 = vector.multi_reduction <add>, %169, %cst_75 [1] : vector<8x32xf32> to vector<8xf32>
    %173 = vector.shape_cast %172 : vector<8xf32> to vector<8x1xf32>
    %cst_76 = arith.constant 3.200000e+01 : f32
    %174 = vector.broadcast %cst_76 : f32 to vector<8x1xf32>
    %175 = arith.divf %173, %174 : vector<8x1xf32>
    %176 = vector.broadcast %175 : vector<8x1xf32> to vector<8x32xf32>
    %177 = arith.subf %169, %176 : vector<8x32xf32>
    %178 = arith.mulf %177, %177 : vector<8x32xf32>
    %cst_77 = arith.constant dense<0.000000e+00> : vector<8xf32>
    %179 = vector.multi_reduction <add>, %178, %cst_77 [1] : vector<8x32xf32> to vector<8xf32>
    %180 = vector.shape_cast %179 : vector<8xf32> to vector<8x1xf32>
    %cst_78 = arith.constant 3.200000e+01 : f32
    %181 = vector.broadcast %cst_78 : f32 to vector<8x1xf32>
    %182 = arith.divf %180, %181 : vector<8x1xf32>
    %cst_79 = arith.constant 9.99999974E-6 : f32
    %183 = vector.broadcast %cst_79 : f32 to vector<8x1xf32>
    %184 = arith.addf %182, %183 : vector<8x1xf32>
    %185 = math.rsqrt %184 : vector<8x1xf32>
    %186 = vector.broadcast %185 : vector<8x1xf32> to vector<8x32xf32>
    %187 = arith.mulf %177, %186 : vector<8x32xf32>
    %188 = vector.broadcast %170 : vector<1x32xf32> to vector<8x32xf32>
    %189 = arith.mulf %187, %188 : vector<8x32xf32>
    %190 = vector.broadcast %171 : vector<1x32xf32> to vector<8x32xf32>
    %191 = arith.addf %189, %190 : vector<8x32xf32>
    %c0_80 = arith.constant 0 : index
    %c0_81 = arith.constant 0 : index
    %c0_82 = arith.constant 0 : index
    %192 = vector.load %arg13[%c0_80, %c0_81, %c0_82] : memref<1x8x32xf32, #tpu.memory_space<vmem>>, vector<1x8x32xf32>
    %193 = vector.shape_cast %192 : vector<1x8x32xf32> to vector<8x32xf32>
    %194 = vector.shape_cast %191 : vector<8x32xf32> to vector<1x8x32xf32>
    tpu.vector_store %arg13[%c0_80, %c0_81, %c0_82], %194 {strides = array<i32>} : memref<1x8x32xf32, #tpu.memory_space<vmem>>, vector<1x8x32xf32>,
    return
  }
  func.func @transform_0(%arg0: i32, %arg1: i32) -> (i32, i32, i32) {
    %c0_i32 = arith.constant 0 : i32
    %c0_i32_0 = arith.constant 0 : i32
    %c0_i32_1 = arith.constant 0 : i32
    return %arg0, %c0_i32, %c0_i32_0 : i32, i32, i32
  }
  func.func @transform_1(%arg0: i32, %arg1: i32) -> (i32, i32, i32) {
    %c0_i32 = arith.constant 0 : i32
    %c0_i32_0 = arith.constant 0 : i32
    %c0_i32_1 = arith.constant 0 : i32
    %c0_i32_2 = arith.constant 0 : i32
    return %c0_i32, %c0_i32_0, %c0_i32_1 : i32, i32, i32
  }
  func.func @transform_2(%arg0: i32, %arg1: i32) -> (i32, i32, i32) {
    %c0_i32 = arith.constant 0 : i32
    %c0_i32_0 = arith.constant 0 : i32
    %c0_i32_1 = arith.constant 0 : i32
    %c0_i32_2 = arith.constant 0 : i32
    return %c0_i32, %c0_i32_0, %c0_i32_1 : i32, i32, i32
  }
  func.func @transform_3(%arg0: i32, %arg1: i32) -> (i32, i32) {
    %c0_i32 = arith.constant 0 : i32
    %c0_i32_0 = arith.constant 0 : i32
    %c0_i32_1 = arith.constant 0 : i32
    return %c0_i32, %c0_i32_0 : i32, i32
  }
  func.func @transform_4(%arg0: i32, %arg1: i32) -> (i32, i32) {
    %c0_i32 = arith.constant 0 : i32
    %c0_i32_0 = arith.constant 0 : i32
    %c0_i32_1 = arith.constant 0 : i32
    return %c0_i32, %c0_i32_0 : i32, i32
  }
  func.func @transform_5(%arg0: i32, %arg1: i32) -> (i32, i32) {
    %c0_i32 = arith.constant 0 : i32
    %c0_i32_0 = arith.constant 0 : i32
    %c0_i32_1 = arith.constant 0 : i32
    return %c0_i32, %c0_i32_0 : i32, i32
  }
  func.func @transform_6(%arg0: i32, %arg1: i32) -> (i32, i32) {
    %c0_i32 = arith.constant 0 : i32
    %c0_i32_0 = arith.constant 0 : i32
    %c0_i32_1 = arith.constant 0 : i32
    return %c0_i32, %c0_i32_0 : i32, i32
  }
  func.func @transform_7(%arg0: i32, %arg1: i32) -> (i32, i32) {
    %c0_i32 = arith.constant 0 : i32
    %c0_i32_0 = arith.constant 0 : i32
    %c0_i32_1 = arith.constant 0 : i32
    return %c0_i32, %c0_i32_0 : i32, i32
  }
  func.func @transform_8(%arg0: i32, %arg1: i32) -> (i32, i32) {
    %c0_i32 = arith.constant 0 : i32
    %c0_i32_0 = arith.constant 0 : i32
    %c0_i32_1 = arith.constant 0 : i32
    return %c0_i32, %c0_i32_0 : i32, i32
  }
  func.func @transform_9(%arg0: i32, %arg1: i32) -> (i32, i32) {
    %c0_i32 = arith.constant 0 : i32
    %c0_i32_0 = arith.constant 0 : i32
    %c0_i32_1 = arith.constant 0 : i32
    return %c0_i32, %c0_i32_0 : i32, i32
  }
  func.func @transform_10(%arg0: i32, %arg1: i32) -> (i32, i32) {
    %c0_i32 = arith.constant 0 : i32
    %c0_i32_0 = arith.constant 0 : i32
    %c0_i32_1 = arith.constant 0 : i32
    return %c0_i32, %c0_i32_0 : i32, i32
  }
  func.func @transform_11(%arg0: i32, %arg1: i32) -> (i32, i32, i32) {
    %c0_i32 = arith.constant 0 : i32
    %c0_i32_0 = arith.constant 0 : i32
    return %arg0, %arg1, %c0_i32 : i32, i32, i32
  }
}

module attributes {stable_mosaic.version = 11 : i64} {
  func.func @_ln_kernel(%arg0: i32, %arg1: memref<16x32xf32, #tpu.memory_space<vmem>>, %arg2: memref<1x32xf32, #tpu.memory_space<vmem>>, %arg3: memref<1x32xf32, #tpu.memory_space<vmem>>, %arg4: memref<16x32xf32, #tpu.memory_space<vmem>>) attributes {dimension_semantics = [#tpu.dimension_semantics<parallel>], iteration_bounds = array<i64: 1>, scalar_prefetch = 0 : i64, scratch_operands = 0 : i64, tpu.core_type = #tpu.core_type<tc>, window_params = [{transform_indices = @transform_0, window_bounds = array<i64: 16, 32>}, {pipeline_mode = #tpu.pipeline_mode<synchronous>, transform_indices = @transform_1, window_bounds = array<i64: 1, 32>}, {pipeline_mode = #tpu.pipeline_mode<synchronous>, transform_indices = @transform_2, window_bounds = array<i64: 1, 32>}, {transform_indices = @transform_3, window_bounds = array<i64: 16, 32>}]} {
    %c0 = arith.constant 0 : index
    %c0_0 = arith.constant 0 : index
    %0 = vector.load %arg1[%c0, %c0_0] : memref<16x32xf32, #tpu.memory_space<vmem>>, vector<16x32xf32>
    %c0_1 = arith.constant 0 : index
    %c0_2 = arith.constant 0 : index
    %1 = vector.load %arg2[%c0_1, %c0_2] : memref<1x32xf32, #tpu.memory_space<vmem>>, vector<1x32xf32>
    %c0_3 = arith.constant 0 : index
    %c0_4 = arith.constant 0 : index
    %2 = vector.load %arg3[%c0_3, %c0_4] : memref<1x32xf32, #tpu.memory_space<vmem>>, vector<1x32xf32>
    %cst = arith.constant dense<0.000000e+00> : vector<16xf32>
    %3 = vector.multi_reduction <add>, %0, %cst [1] : vector<16x32xf32> to vector<16xf32>
    %4 = vector.shape_cast %3 : vector<16xf32> to vector<16x1xf32>
    %cst_5 = arith.constant 3.200000e+01 : f32
    %5 = vector.broadcast %cst_5 : f32 to vector<16x1xf32>
    %6 = arith.divf %4, %5 : vector<16x1xf32>
    %7 = vector.broadcast %6 : vector<16x1xf32> to vector<16x32xf32>
    %8 = arith.subf %0, %7 : vector<16x32xf32>
    %9 = arith.mulf %8, %8 : vector<16x32xf32>
    %cst_6 = arith.constant dense<0.000000e+00> : vector<16xf32>
    %10 = vector.multi_reduction <add>, %9, %cst_6 [1] : vector<16x32xf32> to vector<16xf32>
    %11 = vector.shape_cast %10 : vector<16xf32> to vector<16x1xf32>
    %cst_7 = arith.constant 3.200000e+01 : f32
    %12 = vector.broadcast %cst_7 : f32 to vector<16x1xf32>
    %13 = arith.divf %11, %12 : vector<16x1xf32>
    %cst_8 = arith.constant 9.99999974E-6 : f32
    %14 = vector.broadcast %cst_8 : f32 to vector<16x1xf32>
    %15 = arith.addf %13, %14 : vector<16x1xf32>
    %16 = math.rsqrt %15 : vector<16x1xf32>
    %17 = vector.broadcast %16 : vector<16x1xf32> to vector<16x32xf32>
    %18 = arith.mulf %8, %17 : vector<16x32xf32>
    %19 = vector.broadcast %1 : vector<1x32xf32> to vector<16x32xf32>
    %20 = arith.mulf %18, %19 : vector<16x32xf32>
    %21 = vector.broadcast %2 : vector<1x32xf32> to vector<16x32xf32>
    %22 = arith.addf %20, %21 : vector<16x32xf32>
    %c0_9 = arith.constant 0 : index
    %c0_10 = arith.constant 0 : index
    %23 = vector.load %arg4[%c0_9, %c0_10] : memref<16x32xf32, #tpu.memory_space<vmem>>, vector<16x32xf32>
    tpu.vector_store %arg4[%c0_9, %c0_10], %22 {strides = array<i32>} : memref<16x32xf32, #tpu.memory_space<vmem>>, vector<16x32xf32>,
    return
  }
  func.func @transform_0(%arg0: i32) -> (i32, i32) {
    %c0_i32 = arith.constant 0 : i32
    %c0_i32_0 = arith.constant 0 : i32
    return %arg0, %c0_i32 : i32, i32
  }
  func.func @transform_1(%arg0: i32) -> (i32, i32) {
    %c0_i32 = arith.constant 0 : i32
    %c0_i32_0 = arith.constant 0 : i32
    %c0_i32_1 = arith.constant 0 : i32
    return %c0_i32, %c0_i32_0 : i32, i32
  }
  func.func @transform_2(%arg0: i32) -> (i32, i32) {
    %c0_i32 = arith.constant 0 : i32
    %c0_i32_0 = arith.constant 0 : i32
    %c0_i32_1 = arith.constant 0 : i32
    return %c0_i32, %c0_i32_0 : i32, i32
  }
  func.func @transform_3(%arg0: i32) -> (i32, i32) {
    %c0_i32 = arith.constant 0 : i32
    %c0_i32_0 = arith.constant 0 : i32
    return %arg0, %c0_i32 : i32, i32
  }
}

module attributes {stable_mosaic.version = 11 : i64} {
  func.func @_ln_proj_kernel(%arg0: i32, %arg1: memref<32x32xf32, #tpu.memory_space<vmem>>, %arg2: memref<1x32xf32, #tpu.memory_space<vmem>>, %arg3: memref<1x32xf32, #tpu.memory_space<vmem>>, %arg4: memref<32x4xbf16, #tpu.memory_space<vmem>>, %arg5: memref<1x4xf32, #tpu.memory_space<vmem>>, %arg6: memref<32x4xf32, #tpu.memory_space<vmem>>) attributes {dimension_semantics = [#tpu.dimension_semantics<parallel>], iteration_bounds = array<i64: 1>, scalar_prefetch = 0 : i64, scratch_operands = 0 : i64, tpu.core_type = #tpu.core_type<tc>, window_params = [{transform_indices = @transform_0, window_bounds = array<i64: 32, 32>}, {pipeline_mode = #tpu.pipeline_mode<synchronous>, transform_indices = @transform_1, window_bounds = array<i64: 1, 32>}, {pipeline_mode = #tpu.pipeline_mode<synchronous>, transform_indices = @transform_2, window_bounds = array<i64: 1, 32>}, {pipeline_mode = #tpu.pipeline_mode<synchronous>, transform_indices = @transform_3, window_bounds = array<i64: 32, 4>}, {pipeline_mode = #tpu.pipeline_mode<synchronous>, transform_indices = @transform_4, window_bounds = array<i64: 1, 4>}, {transform_indices = @transform_5, window_bounds = array<i64: 32, 4>}]} {
    %c0 = arith.constant 0 : index
    %c0_0 = arith.constant 0 : index
    %0 = vector.load %arg1[%c0, %c0_0] : memref<32x32xf32, #tpu.memory_space<vmem>>, vector<32x32xf32>
    %c0_1 = arith.constant 0 : index
    %c0_2 = arith.constant 0 : index
    %1 = vector.load %arg2[%c0_1, %c0_2] : memref<1x32xf32, #tpu.memory_space<vmem>>, vector<1x32xf32>
    %c0_3 = arith.constant 0 : index
    %c0_4 = arith.constant 0 : index
    %2 = vector.load %arg3[%c0_3, %c0_4] : memref<1x32xf32, #tpu.memory_space<vmem>>, vector<1x32xf32>
    %cst = arith.constant dense<0.000000e+00> : vector<32xf32>
    %3 = vector.multi_reduction <add>, %0, %cst [1] : vector<32x32xf32> to vector<32xf32>
    %4 = vector.shape_cast %3 : vector<32xf32> to vector<32x1xf32>
    %cst_5 = arith.constant 3.200000e+01 : f32
    %5 = vector.broadcast %cst_5 : f32 to vector<32x1xf32>
    %6 = arith.divf %4, %5 : vector<32x1xf32>
    %7 = vector.broadcast %6 : vector<32x1xf32> to vector<32x32xf32>
    %8 = arith.subf %0, %7 : vector<32x32xf32>
    %9 = arith.mulf %8, %8 : vector<32x32xf32>
    %cst_6 = arith.constant dense<0.000000e+00> : vector<32xf32>
    %10 = vector.multi_reduction <add>, %9, %cst_6 [1] : vector<32x32xf32> to vector<32xf32>
    %11 = vector.shape_cast %10 : vector<32xf32> to vector<32x1xf32>
    %cst_7 = arith.constant 3.200000e+01 : f32
    %12 = vector.broadcast %cst_7 : f32 to vector<32x1xf32>
    %13 = arith.divf %11, %12 : vector<32x1xf32>
    %cst_8 = arith.constant 9.99999974E-6 : f32
    %14 = vector.broadcast %cst_8 : f32 to vector<32x1xf32>
    %15 = arith.addf %13, %14 : vector<32x1xf32>
    %16 = math.rsqrt %15 : vector<32x1xf32>
    %17 = vector.broadcast %16 : vector<32x1xf32> to vector<32x32xf32>
    %18 = arith.mulf %8, %17 : vector<32x32xf32>
    %19 = vector.broadcast %1 : vector<1x32xf32> to vector<32x32xf32>
    %20 = arith.mulf %18, %19 : vector<32x32xf32>
    %21 = vector.broadcast %2 : vector<1x32xf32> to vector<32x32xf32>
    %22 = arith.addf %20, %21 : vector<32x32xf32>
    %c0_9 = arith.constant 0 : index
    %c0_10 = arith.constant 0 : index
    %23 = vector.load %arg4[%c0_9, %c0_10] : memref<32x4xbf16, #tpu.memory_space<vmem>>, vector<32x4xbf16>
    %24 = arith.truncf %22 : vector<32x32xf32> to vector<32x32xbf16>
    %cst_11 = arith.constant dense<0.000000e+00> : vector<32x4xf32>
    %25 = tpu.matmul %24, %23, %cst_11 {dimension_numbers = #tpu.dot_dimension_numbers<[1], [0], [0], [1], [0, 0, 1, 1], [], []>} : vector<32x32xbf16>, vector<32x4xbf16>, vector<32x4xf32> -> vector<32x4xf32>
    %c0_12 = arith.constant 0 : index
    %c0_13 = arith.constant 0 : index
    %26 = vector.load %arg5[%c0_12, %c0_13] : memref<1x4xf32, #tpu.memory_space<vmem>>, vector<1x4xf32>
    %27 = vector.broadcast %26 : vector<1x4xf32> to vector<32x4xf32>
    %28 = arith.addf %25, %27 : vector<32x4xf32>
    %c0_14 = arith.constant 0 : index
    %c0_15 = arith.constant 0 : index
    %29 = vector.load %arg6[%c0_14, %c0_15] : memref<32x4xf32, #tpu.memory_space<vmem>>, vector<32x4xf32>
    tpu.vector_store %arg6[%c0_14, %c0_15], %28 {strides = array<i32>} : memref<32x4xf32, #tpu.memory_space<vmem>>, vector<32x4xf32>,
    return
  }
  func.func @transform_0(%arg0: i32) -> (i32, i32) {
    %c0_i32 = arith.constant 0 : i32
    %c0_i32_0 = arith.constant 0 : i32
    return %arg0, %c0_i32 : i32, i32
  }
  func.func @transform_1(%arg0: i32) -> (i32, i32) {
    %c0_i32 = arith.constant 0 : i32
    %c0_i32_0 = arith.constant 0 : i32
    %c0_i32_1 = arith.constant 0 : i32
    return %c0_i32, %c0_i32_0 : i32, i32
  }
  func.func @transform_2(%arg0: i32) -> (i32, i32) {
    %c0_i32 = arith.constant 0 : i32
    %c0_i32_0 = arith.constant 0 : i32
    %c0_i32_1 = arith.constant 0 : i32
    return %c0_i32, %c0_i32_0 : i32, i32
  }
  func.func @transform_3(%arg0: i32) -> (i32, i32) {
    %c0_i32 = arith.constant 0 : i32
    %c0_i32_0 = arith.constant 0 : i32
    %c0_i32_1 = arith.constant 0 : i32
    return %c0_i32, %c0_i32_0 : i32, i32
  }
  func.func @transform_4(%arg0: i32) -> (i32, i32) {
    %c0_i32 = arith.constant 0 : i32
    %c0_i32_0 = arith.constant 0 : i32
    %c0_i32_1 = arith.constant 0 : i32
    return %c0_i32, %c0_i32_0 : i32, i32
  }
  func.func @transform_5(%arg0: i32) -> (i32, i32) {
    %c0_i32 = arith.constant 0 : i32
    %c0_i32_0 = arith.constant 0 : i32
    return %arg0, %c0_i32 : i32, i32
  }
}

module attributes {stable_mosaic.version = 11 : i64} {
  func.func @_decoder_layer_kernel(%arg0: i32, %arg1: memref<1x16x32xf32, #tpu.memory_space<vmem>>, %arg2: memref<1x16x32xf32, #tpu.memory_space<vmem>>, %arg3: memref<4x32x32xbf16, #tpu.memory_space<vmem>>, %arg4: memref<4x1x32xf32, #tpu.memory_space<vmem>>, %arg5: memref<4x32x32xbf16, #tpu.memory_space<vmem>>, %arg6: memref<4x1x32xf32, #tpu.memory_space<vmem>>, %arg7: memref<1x32xf32, #tpu.memory_space<vmem>>, %arg8: memref<1x32xf32, #tpu.memory_space<vmem>>, %arg9: memref<1x32xf32, #tpu.memory_space<vmem>>, %arg10: memref<1x32xf32, #tpu.memory_space<vmem>>, %arg11: memref<32x32xbf16, #tpu.memory_space<vmem>>, %arg12: memref<1x32xf32, #tpu.memory_space<vmem>>, %arg13: memref<32x32xbf16, #tpu.memory_space<vmem>>, %arg14: memref<1x32xf32, #tpu.memory_space<vmem>>, %arg15: memref<1x32xf32, #tpu.memory_space<vmem>>, %arg16: memref<1x32xf32, #tpu.memory_space<vmem>>, %arg17: memref<1x16x32xf32, #tpu.memory_space<vmem>>, %arg18: memref<64x8xf32, #tpu.memory_space<vmem>>) attributes {dimension_semantics = [#tpu.dimension_semantics<parallel>], iteration_bounds = array<i64: 2>, scalar_prefetch = 0 : i64, scratch_operands = 1 : i64, tpu.core_type = #tpu.core_type<tc>, window_params = [{transform_indices = @transform_0, window_bounds = array<i64: 1, 16, 32>}, {transform_indices = @transform_1, window_bounds = array<i64: 1, 16, 32>}, {pipeline_mode = #tpu.pipeline_mode<synchronous>, transform_indices = @transform_2, window_bounds = array<i64: 4, 32, 32>}, {pipeline_mode = #tpu.pipeline_mode<synchronous>, transform_indices = @transform_3, window_bounds = array<i64: 4, 1, 32>}, {pipeline_mode = #tpu.pipeline_mode<synchronous>, transform_indices = @transform_4, window_bounds = array<i64: 4, 32, 32>}, {pipeline_mode = #tpu.pipeline_mode<synchronous>, transform_indices = @transform_5, window_bounds = array<i64: 4, 1, 32>}, {pipeline_mode = #tpu.pipeline_mode<synchronous>, transform_indices = @transform_6, window_bounds = array<i64: 1, 32>}, {pipeline_mode = #tpu.pipeline_mode<synchronous>, transform_indices = @transform_7, window_bounds = array<i64: 1, 32>}, {pipeline_mode = #tpu.pipeline_mode<synchronous>, transform_indices = @transform_8, window_bounds = array<i64: 1, 32>}, {pipeline_mode = #tpu.pipeline_mode<synchronous>, transform_indices = @transform_9, window_bounds = array<i64: 1, 32>}, {pipeline_mode = #tpu.pipeline_mode<synchronous>, transform_indices = @transform_10, window_bounds = array<i64: 32, 32>}, {pipeline_mode = #tpu.pipeline_mode<synchronous>, transform_indices = @transform_11, window_bounds = array<i64: 1, 32>}, {pipeline_mode = #tpu.pipeline_mode<synchronous>, transform_indices = @transform_12, window_bounds = array<i64: 32, 32>}, {pipeline_mode = #tpu.pipeline_mode<synchronous>, transform_indices = @transform_13, window_bounds = array<i64: 1, 32>}, {pipeline_mode = #tpu.pipeline_mode<synchronous>, transform_indices = @transform_14, window_bounds = array<i64: 1, 32>}, {pipeline_mode = #tpu.pipeline_mode<synchronous>, transform_indices = @transform_15, window_bounds = array<i64: 1, 32>}, {transform_indices = @transform_16, window_bounds = array<i64: 1, 16, 32>}]} {
    %c0 = arith.constant 0 : index
    %c0_0 = arith.constant 0 : index
    %c0_1 = arith.constant 0 : index
    %0 = vector.load %arg1[%c0, %c0_0, %c0_1] : memref<1x16x32xf32, #tpu.memory_space<vmem>>, vector<1x16x32xf32>
    %1 = vector.shape_cast %0 : vector<1x16x32xf32> to vector<16x32xf32>
    %c0_2 = arith.constant 0 : index
    %c0_3 = arith.constant 0 : index
    %c0_4 = arith.constant 0 : index
    %2 = vector.load %arg2[%c0_2, %c0_3, %c0_4] : memref<1x16x32xf32, #tpu.memory_space<vmem>>, vector<1x16x32xf32>
    %3 = vector.shape_cast %2 : vector<1x16x32xf32> to vector<16x32xf32>
    %c0_5 = arith.constant 0 : index
    %c0_6 = arith.constant 0 : index
    %c0_7 = arith.constant 0 : index
    %4 = vector.load %arg3[%c0_5, %c0_6, %c0_7] : memref<4x32x32xbf16, #tpu.memory_space<vmem>>, vector<1x32x32xbf16>
    %5 = vector.shape_cast %4 : vector<1x32x32xbf16> to vector<32x32xbf16>
    %c1 = arith.constant 1 : index
    %c0_8 = arith.constant 0 : index
    %c0_9 = arith.constant 0 : index
    %6 = vector.load %arg3[%c1, %c0_8, %c0_9] : memref<4x32x32xbf16, #tpu.memory_space<vmem>>, vector<1x32x32xbf16>
    %7 = vector.shape_cast %6 : vector<1x32x32xbf16> to vector<32x32xbf16>
    %c2 = arith.constant 2 : index
    %c0_10 = arith.constant 0 : index
    %c0_11 = arith.constant 0 : index
    %8 = vector.load %arg3[%c2, %c0_10, %c0_11] : memref<4x32x32xbf16, #tpu.memory_space<vmem>>, vector<1x32x32xbf16>
    %9 = vector.shape_cast %8 : vector<1x32x32xbf16> to vector<32x32xbf16>
    %c3 = arith.constant 3 : index
    %c0_12 = arith.constant 0 : index
    %c0_13 = arith.constant 0 : index
    %10 = vector.load %arg3[%c3, %c0_12, %c0_13] : memref<4x32x32xbf16, #tpu.memory_space<vmem>>, vector<1x32x32xbf16>
    %11 = vector.shape_cast %10 : vector<1x32x32xbf16> to vector<32x32xbf16>
    %c0_14 = arith.constant 0 : index
    %c0_15 = arith.constant 0 : index
    %c0_16 = arith.constant 0 : index
    %12 = vector.load %arg4[%c0_14, %c0_15, %c0_16] : memref<4x1x32xf32, #tpu.memory_space<vmem>>, vector<1x1x32xf32>
    %13 = vector.shape_cast %12 : vector<1x1x32xf32> to vector<1x32xf32>
    %c1_17 = arith.constant 1 : index
    %c0_18 = arith.constant 0 : index
    %c0_19 = arith.constant 0 : index
    %14 = vector.load %arg4[%c1_17, %c0_18, %c0_19] : memref<4x1x32xf32, #tpu.memory_space<vmem>>, vector<1x1x32xf32>
    %15 = vector.shape_cast %14 : vector<1x1x32xf32> to vector<1x32xf32>
    %c2_20 = arith.constant 2 : index
    %c0_21 = arith.constant 0 : index
    %c0_22 = arith.constant 0 : index
    %16 = vector.load %arg4[%c2_20, %c0_21, %c0_22] : memref<4x1x32xf32, #tpu.memory_space<vmem>>, vector<1x1x32xf32>
    %17 = vector.shape_cast %16 : vector<1x1x32xf32> to vector<1x32xf32>
    %c3_23 = arith.constant 3 : index
    %c0_24 = arith.constant 0 : index
    %c0_25 = arith.constant 0 : index
    %18 = vector.load %arg4[%c3_23, %c0_24, %c0_25] : memref<4x1x32xf32, #tpu.memory_space<vmem>>, vector<1x1x32xf32>
    %19 = vector.shape_cast %18 : vector<1x1x32xf32> to vector<1x32xf32>
    %20 = arith.truncf %1 : vector<16x32xf32> to vector<16x32xbf16>
    %cst = arith.constant dense<0.000000e+00> : vector<16x32xf32>
    %21 = tpu.matmul %20, %5, %cst {dimension_numbers = #tpu.dot_dimension_numbers<[1], [0], [0], [1], [0, 0, 1, 1], [], []>} : vector<16x32xbf16>, vector<32x32xbf16>, vector<16x32xf32> -> vector<16x32xf32>
    %22 = vector.broadcast %13 : vector<1x32xf32> to vector<16x32xf32>
    %23 = arith.addf %21, %22 : vector<16x32xf32>
    %cst_26 = arith.constant 0.353553385 : f32
    %24 = vector.broadcast %cst_26 : f32 to vector<16x32xf32>
    %25 = arith.mulf %23, %24 : vector<16x32xf32>
    %26 = arith.truncf %1 : vector<16x32xf32> to vector<16x32xbf16>
    %cst_27 = arith.constant dense<0.000000e+00> : vector<16x32xf32>
    %27 = tpu.matmul %26, %7, %cst_27 {dimension_numbers = #tpu.dot_dimension_numbers<[1], [0], [0], [1], [0, 0, 1, 1], [], []>} : vector<16x32xbf16>, vector<32x32xbf16>, vector<16x32xf32> -> vector<16x32xf32>
    %28 = vector.broadcast %15 : vector<1x32xf32> to vector<16x32xf32>
    %29 = arith.addf %27, %28 : vector<16x32xf32>
    %30 = arith.truncf %1 : vector<16x32xf32> to vector<16x32xbf16>
    %cst_28 = arith.constant dense<0.000000e+00> : vector<16x32xf32>
    %31 = tpu.matmul %30, %9, %cst_28 {dimension_numbers = #tpu.dot_dimension_numbers<[1], [0], [0], [1], [0, 0, 1, 1], [], []>} : vector<16x32xbf16>, vector<32x32xbf16>, vector<16x32xf32> -> vector<16x32xf32>
    %32 = vector.broadcast %17 : vector<1x32xf32> to vector<16x32xf32>
    %33 = arith.addf %31, %32 : vector<16x32xf32>
    %34 = arith.truncf %25 : vector<16x32xf32> to vector<16x32xbf16>
    %35 = arith.truncf %29 : vector<16x32xf32> to vector<16x32xbf16>
    %36 = arith.truncf %33 : vector<16x32xf32> to vector<16x32xbf16>
    %37 = tpu.iota {dimensions = array<i32: 0>} : vector<16x16xi32>
    %38 = tpu.iota {dimensions = array<i32: 1>} : vector<16x16xi32>
    %39 = arith.cmpi sgt, %38, %37 : vector<16x16xi32>
    %40 = vector.extract_strided_slice %34 {offsets = [0, 0], sizes = [16, 8], strides = [1, 1]} : vector<16x32xbf16> to vector<16x8xbf16>
    %41 = vector.extract_strided_slice %35 {offsets = [0, 0], sizes = [16, 8], strides = [1, 1]} : vector<16x32xbf16> to vector<16x8xbf16>
    %42 = vector.extract_strided_slice %36 {offsets = [0, 0], sizes = [16, 8], strides = [1, 1]} : vector<16x32xbf16> to vector<16x8xbf16>
    %cst_29 = arith.constant dense<0.000000e+00> : vector<16x16xf32>
    %43 = tpu.matmul %40, %41, %cst_29 {dimension_numbers = #tpu.dot_dimension_numbers<[1], [1], [0], [0], [0, 0, 1, 0], [], []>} : vector<16x8xbf16>, vector<16x8xbf16>, vector<16x16xf32> -> vector<16x16xf32>
    %cst_30 = arith.constant 0xFF800000 : f32
    %44 = vector.broadcast %cst_30 : f32 to vector<16x16xf32>
    %45 = arith.select %39, %44, %43 : vector<16x16xi1>, vector<16x16xf32>
    %cst_31 = arith.constant dense<0xFF800000> : vector<16xf32>
    %46 = vector.multi_reduction <maximumf>, %45, %cst_31 [1] : vector<16x16xf32> to vector<16xf32>
    %47 = vector.shape_cast %46 : vector<16xf32> to vector<16x1xf32>
    %48 = vector.broadcast %47 : vector<16x1xf32> to vector<16x16xf32>
    %49 = arith.subf %45, %48 : vector<16x16xf32>
    %50 = math.exp %49 : vector<16x16xf32>
    %cst_32 = arith.constant dense<0.000000e+00> : vector<16xf32>
    %51 = vector.multi_reduction <add>, %50, %cst_32 [1] : vector<16x16xf32> to vector<16xf32>
    %52 = vector.shape_cast %51 : vector<16xf32> to vector<16x1xf32>
    %53 = tpu.reciprocal %52 {approx = true} : vector<16x1xf32> -> vector<16x1xf32>
    %54 = vector.broadcast %53 : vector<16x1xf32> to vector<16x16xf32>
    %55 = arith.mulf %50, %54 : vector<16x16xf32>
    %56 = arith.truncf %55 : vector<16x16xf32> to vector<16x16xbf16>
    %cst_33 = arith.constant dense<0.000000e+00> : vector<16x8xf32>
    %57 = tpu.matmul %56, %42, %cst_33 {dimension_numbers = #tpu.dot_dimension_numbers<[1], [0], [0], [1], [0, 0, 1, 1], [], []>} : vector<16x16xbf16>, vector<16x8xbf16>, vector<16x8xf32> -> vector<16x8xf32>
    %c0_34 = arith.constant 0 : index
    %c0_35 = arith.constant 0 : index
    %58 = vector.load %arg18[%c0_34, %c0_35] : memref<64x8xf32, #tpu.memory_space<vmem>>, vector<16x8xf32>
    tpu.vector_store %arg18[%c0_34, %c0_35], %57 {strides = array<i32>} : memref<64x8xf32, #tpu.memory_space<vmem>>, vector<16x8xf32>,
    %59 = vector.extract_strided_slice %34 {offsets = [0, 8], sizes = [16, 8], strides = [1, 1]} : vector<16x32xbf16> to vector<16x8xbf16>
    %60 = vector.extract_strided_slice %35 {offsets = [0, 8], sizes = [16, 8], strides = [1, 1]} : vector<16x32xbf16> to vector<16x8xbf16>
    %61 = vector.extract_strided_slice %36 {offsets = [0, 8], sizes = [16, 8], strides = [1, 1]} : vector<16x32xbf16> to vector<16x8xbf16>
    %cst_36 = arith.constant dense<0.000000e+00> : vector<16x16xf32>
    %62 = tpu.matmul %59, %60, %cst_36 {dimension_numbers = #tpu.dot_dimension_numbers<[1], [1], [0], [0], [0, 0, 1, 0], [], []>} : vector<16x8xbf16>, vector<16x8xbf16>, vector<16x16xf32> -> vector<16x16xf32>
    %cst_37 = arith.constant 0xFF800000 : f32
    %63 = vector.broadcast %cst_37 : f32 to vector<16x16xf32>
    %64 = arith.select %39, %63, %62 : vector<16x16xi1>, vector<16x16xf32>
    %cst_38 = arith.constant dense<0xFF800000> : vector<16xf32>
    %65 = vector.multi_reduction <maximumf>, %64, %cst_38 [1] : vector<16x16xf32> to vector<16xf32>
    %66 = vector.shape_cast %65 : vector<16xf32> to vector<16x1xf32>
    %67 = vector.broadcast %66 : vector<16x1xf32> to vector<16x16xf32>
    %68 = arith.subf %64, %67 : vector<16x16xf32>
    %69 = math.exp %68 : vector<16x16xf32>
    %cst_39 = arith.constant dense<0.000000e+00> : vector<16xf32>
    %70 = vector.multi_reduction <add>, %69, %cst_39 [1] : vector<16x16xf32> to vector<16xf32>
    %71 = vector.shape_cast %70 : vector<16xf32> to vector<16x1xf32>
    %72 = tpu.reciprocal %71 {approx = true} : vector<16x1xf32> -> vector<16x1xf32>
    %73 = vector.broadcast %72 : vector<16x1xf32> to vector<16x16xf32>
    %74 = arith.mulf %69, %73 : vector<16x16xf32>
    %75 = arith.truncf %74 : vector<16x16xf32> to vector<16x16xbf16>
    %cst_40 = arith.constant dense<0.000000e+00> : vector<16x8xf32>
    %76 = tpu.matmul %75, %61, %cst_40 {dimension_numbers = #tpu.dot_dimension_numbers<[1], [0], [0], [1], [0, 0, 1, 1], [], []>} : vector<16x16xbf16>, vector<16x8xbf16>, vector<16x8xf32> -> vector<16x8xf32>
    %c16 = arith.constant 16 : index
    %c0_41 = arith.constant 0 : index
    %77 = vector.load %arg18[%c16, %c0_41] : memref<64x8xf32, #tpu.memory_space<vmem>>, vector<16x8xf32>
    tpu.vector_store %arg18[%c16, %c0_41], %76 {strides = array<i32>} : memref<64x8xf32, #tpu.memory_space<vmem>>, vector<16x8xf32>,
    %78 = vector.extract_strided_slice %34 {offsets = [0, 16], sizes = [16, 8], strides = [1, 1]} : vector<16x32xbf16> to vector<16x8xbf16>
    %79 = vector.extract_strided_slice %35 {offsets = [0, 16], sizes = [16, 8], strides = [1, 1]} : vector<16x32xbf16> to vector<16x8xbf16>
    %80 = vector.extract_strided_slice %36 {offsets = [0, 16], sizes = [16, 8], strides = [1, 1]} : vector<16x32xbf16> to vector<16x8xbf16>
    %cst_42 = arith.constant dense<0.000000e+00> : vector<16x16xf32>
    %81 = tpu.matmul %78, %79, %cst_42 {dimension_numbers = #tpu.dot_dimension_numbers<[1], [1], [0], [0], [0, 0, 1, 0], [], []>} : vector<16x8xbf16>, vector<16x8xbf16>, vector<16x16xf32> -> vector<16x16xf32>
    %cst_43 = arith.constant 0xFF800000 : f32
    %82 = vector.broadcast %cst_43 : f32 to vector<16x16xf32>
    %83 = arith.select %39, %82, %81 : vector<16x16xi1>, vector<16x16xf32>
    %cst_44 = arith.constant dense<0xFF800000> : vector<16xf32>
    %84 = vector.multi_reduction <maximumf>, %83, %cst_44 [1] : vector<16x16xf32> to vector<16xf32>
    %85 = vector.shape_cast %84 : vector<16xf32> to vector<16x1xf32>
    %86 = vector.broadcast %85 : vector<16x1xf32> to vector<16x16xf32>
    %87 = arith.subf %83, %86 : vector<16x16xf32>
    %88 = math.exp %87 : vector<16x16xf32>
    %cst_45 = arith.constant dense<0.000000e+00> : vector<16xf32>
    %89 = vector.multi_reduction <add>, %88, %cst_45 [1] : vector<16x16xf32> to vector<16xf32>
    %90 = vector.shape_cast %89 : vector<16xf32> to vector<16x1xf32>
    %91 = tpu.reciprocal %90 {approx = true} : vector<16x1xf32> -> vector<16x1xf32>
    %92 = vector.broadcast %91 : vector<16x1xf32> to vector<16x16xf32>
    %93 = arith.mulf %88, %92 : vector<16x16xf32>
    %94 = arith.truncf %93 : vector<16x16xf32> to vector<16x16xbf16>
    %cst_46 = arith.constant dense<0.000000e+00> : vector<16x8xf32>
    %95 = tpu.matmul %94, %80, %cst_46 {dimension_numbers = #tpu.dot_dimension_numbers<[1], [0], [0], [1], [0, 0, 1, 1], [], []>} : vector<16x16xbf16>, vector<16x8xbf16>, vector<16x8xf32> -> vector<16x8xf32>
    %c32 = arith.constant 32 : index
    %c0_47 = arith.constant 0 : index
    %96 = vector.load %arg18[%c32, %c0_47] : memref<64x8xf32, #tpu.memory_space<vmem>>, vector<16x8xf32>
    tpu.vector_store %arg18[%c32, %c0_47], %95 {strides = array<i32>} : memref<64x8xf32, #tpu.memory_space<vmem>>, vector<16x8xf32>,
    %97 = vector.extract_strided_slice %34 {offsets = [0, 24], sizes = [16, 8], strides = [1, 1]} : vector<16x32xbf16> to vector<16x8xbf16>
    %98 = vector.extract_strided_slice %35 {offsets = [0, 24], sizes = [16, 8], strides = [1, 1]} : vector<16x32xbf16> to vector<16x8xbf16>
    %99 = vector.extract_strided_slice %36 {offsets = [0, 24], sizes = [16, 8], strides = [1, 1]} : vector<16x32xbf16> to vector<16x8xbf16>
    %cst_48 = arith.constant dense<0.000000e+00> : vector<16x16xf32>
    %100 = tpu.matmul %97, %98, %cst_48 {dimension_numbers = #tpu.dot_dimension_numbers<[1], [1], [0], [0], [0, 0, 1, 0], [], []>} : vector<16x8xbf16>, vector<16x8xbf16>, vector<16x16xf32> -> vector<16x16xf32>
    %cst_49 = arith.constant 0xFF800000 : f32
    %101 = vector.broadcast %cst_49 : f32 to vector<16x16xf32>
    %102 = arith.select %39, %101, %100 : vector<16x16xi1>, vector<16x16xf32>
    %cst_50 = arith.constant dense<0xFF800000> : vector<16xf32>
    %103 = vector.multi_reduction <maximumf>, %102, %cst_50 [1] : vector<16x16xf32> to vector<16xf32>
    %104 = vector.shape_cast %103 : vector<16xf32> to vector<16x1xf32>
    %105 = vector.broadcast %104 : vector<16x1xf32> to vector<16x16xf32>
    %106 = arith.subf %102, %105 : vector<16x16xf32>
    %107 = math.exp %106 : vector<16x16xf32>
    %cst_51 = arith.constant dense<0.000000e+00> : vector<16xf32>
    %108 = vector.multi_reduction <add>, %107, %cst_51 [1] : vector<16x16xf32> to vector<16xf32>
    %109 = vector.shape_cast %108 : vector<16xf32> to vector<16x1xf32>
    %110 = tpu.reciprocal %109 {approx = true} : vector<16x1xf32> -> vector<16x1xf32>
    %111 = vector.broadcast %110 : vector<16x1xf32> to vector<16x16xf32>
    %112 = arith.mulf %107, %111 : vector<16x16xf32>
    %113 = arith.truncf %112 : vector<16x16xf32> to vector<16x16xbf16>
    %cst_52 = arith.constant dense<0.000000e+00> : vector<16x8xf32>
    %114 = tpu.matmul %113, %99, %cst_52 {dimension_numbers = #tpu.dot_dimension_numbers<[1], [0], [0], [1], [0, 0, 1, 1], [], []>} : vector<16x16xbf16>, vector<16x8xbf16>, vector<16x8xf32> -> vector<16x8xf32>
    %c48 = arith.constant 48 : index
    %c0_53 = arith.constant 0 : index
    %115 = vector.load %arg18[%c48, %c0_53] : memref<64x8xf32, #tpu.memory_space<vmem>>, vector<16x8xf32>
    tpu.vector_store %arg18[%c48, %c0_53], %114 {strides = array<i32>} : memref<64x8xf32, #tpu.memory_space<vmem>>, vector<16x8xf32>,
    %c0_54 = arith.constant 0 : index
    %c0_55 = arith.constant 0 : index
    %116 = tpu.strided_load %arg18[%c0_54, %c0_55] {strides = array<i32: 4, 1>} : memref<64x8xf32, #tpu.memory_space<vmem>>, vector<16x8xf32>
    %117 = vector.extract_strided_slice %11 {offsets = [0, 0], sizes = [8, 32], strides = [1, 1]} : vector<32x32xbf16> to vector<8x32xbf16>
    %118 = arith.truncf %116 : vector<16x8xf32> to vector<16x8xbf16>
    %cst_56 = arith.constant dense<0.000000e+00> : vector<16x32xf32>
    %119 = tpu.matmul %118, %117, %cst_56 {dimension_numbers = #tpu.dot_dimension_numbers<[1], [0], [0], [1], [0, 0, 1, 1], [], []>} : vector<16x8xbf16>, vector<8x32xbf16>, vector<16x32xf32> -> vector<16x32xf32>
    %c1_57 = arith.constant 1 : index
    %c0_58 = arith.constant 0 : index
    %120 = tpu.strided_load %arg18[%c1_57, %c0_58] {strides = array<i32: 4, 1>} : memref<64x8xf32, #tpu.memory_space<vmem>>, vector<16x8xf32>
    %121 = vector.extract_strided_slice %11 {offsets = [8, 0], sizes = [8, 32], strides = [1, 1]} : vector<32x32xbf16> to vector<8x32xbf16>
    %122 = arith.truncf %120 : vector<16x8xf32> to vector<16x8xbf16>
    %cst_59 = arith.constant dense<0.000000e+00> : vector<16x32xf32>
    %123 = tpu.matmul %122, %121, %cst_59 {dimension_numbers = #tpu.dot_dimension_numbers<[1], [0], [0], [1], [0, 0, 1, 1], [], []>} : vector<16x8xbf16>, vector<8x32xbf16>, vector<16x32xf32> -> vector<16x32xf32>
    %124 = arith.addf %119, %123 : vector<16x32xf32>
    %c2_60 = arith.constant 2 : index
    %c0_61 = arith.constant 0 : index
    %125 = tpu.strided_load %arg18[%c2_60, %c0_61] {strides = array<i32: 4, 1>} : memref<64x8xf32, #tpu.memory_space<vmem>>, vector<16x8xf32>
    %126 = vector.extract_strided_slice %11 {offsets = [16, 0], sizes = [8, 32], strides = [1, 1]} : vector<32x32xbf16> to vector<8x32xbf16>
    %127 = arith.truncf %125 : vector<16x8xf32> to vector<16x8xbf16>
    %cst_62 = arith.constant dense<0.000000e+00> : vector<16x32xf32>
    %128 = tpu.matmul %127, %126, %cst_62 {dimension_numbers = #tpu.dot_dimension_numbers<[1], [0], [0], [1], [0, 0, 1, 1], [], []>} : vector<16x8xbf16>, vector<8x32xbf16>, vector<16x32xf32> -> vector<16x32xf32>
    %129 = arith.addf %124, %128 : vector<16x32xf32>
    %c3_63 = arith.constant 3 : index
    %c0_64 = arith.constant 0 : index
    %130 = tpu.strided_load %arg18[%c3_63, %c0_64] {strides = array<i32: 4, 1>} : memref<64x8xf32, #tpu.memory_space<vmem>>, vector<16x8xf32>
    %131 = vector.extract_strided_slice %11 {offsets = [24, 0], sizes = [8, 32], strides = [1, 1]} : vector<32x32xbf16> to vector<8x32xbf16>
    %132 = arith.truncf %130 : vector<16x8xf32> to vector<16x8xbf16>
    %cst_65 = arith.constant dense<0.000000e+00> : vector<16x32xf32>
    %133 = tpu.matmul %132, %131, %cst_65 {dimension_numbers = #tpu.dot_dimension_numbers<[1], [0], [0], [1], [0, 0, 1, 1], [], []>} : vector<16x8xbf16>, vector<8x32xbf16>, vector<16x32xf32> -> vector<16x32xf32>
    %134 = arith.addf %129, %133 : vector<16x32xf32>
    %135 = vector.broadcast %19 : vector<1x32xf32> to vector<16x32xf32>
    %136 = arith.addf %134, %135 : vector<16x32xf32>
    %137 = arith.addf %1, %136 : vector<16x32xf32>
    %c0_66 = arith.constant 0 : index
    %c0_67 = arith.constant 0 : index
    %138 = vector.load %arg7[%c0_66, %c0_67] : memref<1x32xf32, #tpu.memory_space<vmem>>, vector<1x32xf32>
    %c0_68 = arith.constant 0 : index
    %c0_69 = arith.constant 0 : index
    %139 = vector.load %arg8[%c0_68, %c0_69] : memref<1x32xf32, #tpu.memory_space<vmem>>, vector<1x32xf32>
    %cst_70 = arith.constant dense<0.000000e+00> : vector<16xf32>
    %140 = vector.multi_reduction <add>, %137, %cst_70 [1] : vector<16x32xf32> to vector<16xf32>
    %141 = vector.shape_cast %140 : vector<16xf32> to vector<16x1xf32>
    %cst_71 = arith.constant 3.200000e+01 : f32
    %142 = vector.broadcast %cst_71 : f32 to vector<16x1xf32>
    %143 = arith.divf %141, %142 : vector<16x1xf32>
    %144 = vector.broadcast %143 : vector<16x1xf32> to vector<16x32xf32>
    %145 = arith.subf %137, %144 : vector<16x32xf32>
    %146 = arith.mulf %145, %145 : vector<16x32xf32>
    %cst_72 = arith.constant dense<0.000000e+00> : vector<16xf32>
    %147 = vector.multi_reduction <add>, %146, %cst_72 [1] : vector<16x32xf32> to vector<16xf32>
    %148 = vector.shape_cast %147 : vector<16xf32> to vector<16x1xf32>
    %cst_73 = arith.constant 3.200000e+01 : f32
    %149 = vector.broadcast %cst_73 : f32 to vector<16x1xf32>
    %150 = arith.divf %148, %149 : vector<16x1xf32>
    %cst_74 = arith.constant 9.99999974E-6 : f32
    %151 = vector.broadcast %cst_74 : f32 to vector<16x1xf32>
    %152 = arith.addf %150, %151 : vector<16x1xf32>
    %153 = math.rsqrt %152 : vector<16x1xf32>
    %154 = vector.broadcast %153 : vector<16x1xf32> to vector<16x32xf32>
    %155 = arith.mulf %145, %154 : vector<16x32xf32>
    %156 = vector.broadcast %138 : vector<1x32xf32> to vector<16x32xf32>
    %157 = arith.mulf %155, %156 : vector<16x32xf32>
    %158 = vector.broadcast %139 : vector<1x32xf32> to vector<16x32xf32>
    %159 = arith.addf %157, %158 : vector<16x32xf32>
    %c0_75 = arith.constant 0 : index
    %c0_76 = arith.constant 0 : index
    %c0_77 = arith.constant 0 : index
    %160 = vector.load %arg5[%c0_75, %c0_76, %c0_77] : memref<4x32x32xbf16, #tpu.memory_space<vmem>>, vector<1x32x32xbf16>
    %161 = vector.shape_cast %160 : vector<1x32x32xbf16> to vector<32x32xbf16>
    %c1_78 = arith.constant 1 : index
    %c0_79 = arith.constant 0 : index
    %c0_80 = arith.constant 0 : index
    %162 = vector.load %arg5[%c1_78, %c0_79, %c0_80] : memref<4x32x32xbf16, #tpu.memory_space<vmem>>, vector<1x32x32xbf16>
    %163 = vector.shape_cast %162 : vector<1x32x32xbf16> to vector<32x32xbf16>
    %c2_81 = arith.constant 2 : index
    %c0_82 = arith.constant 0 : index
    %c0_83 = arith.constant 0 : index
    %164 = vector.load %arg5[%c2_81, %c0_82, %c0_83] : memref<4x32x32xbf16, #tpu.memory_space<vmem>>, vector<1x32x32xbf16>
    %165 = vector.shape_cast %164 : vector<1x32x32xbf16> to vector<32x32xbf16>
    %c3_84 = arith.constant 3 : index
    %c0_85 = arith.constant 0 : index
    %c0_86 = arith.constant 0 : index
    %166 = vector.load %arg5[%c3_84, %c0_85, %c0_86] : memref<4x32x32xbf16, #tpu.memory_space<vmem>>, vector<1x32x32xbf16>
    %167 = vector.shape_cast %166 : vector<1x32x32xbf16> to vector<32x32xbf16>
    %c0_87 = arith.constant 0 : index
    %c0_88 = arith.constant 0 : index
    %c0_89 = arith.constant 0 : index
    %168 = vector.load %arg6[%c0_87, %c0_88, %c0_89] : memref<4x1x32xf32, #tpu.memory_space<vmem>>, vector<1x1x32xf32>
    %169 = vector.shape_cast %168 : vector<1x1x32xf32> to vector<1x32xf32>
    %c1_90 = arith.constant 1 : index
    %c0_91 = arith.constant 0 : index
    %c0_92 = arith.constant 0 : index
    %170 = vector.load %arg6[%c1_90, %c0_91, %c0_92] : memref<4x1x32xf32, #tpu.memory_space<vmem>>, vector<1x1x32xf32>
    %171 = vector.shape_cast %170 : vector<1x1x32xf32> to vector<1x32xf32>
    %c2_93 = arith.constant 2 : index
    %c0_94 = arith.constant 0 : index
    %c0_95 = arith.constant 0 : index
    %172 = vector.load %arg6[%c2_93, %c0_94, %c0_95] : memref<4x1x32xf32, #tpu.memory_space<vmem>>, vector<1x1x32xf32>
    %173 = vector.shape_cast %172 : vector<1x1x32xf32> to vector<1x32xf32>
    %c3_96 = arith.constant 3 : index
    %c0_97 = arith.constant 0 : index
    %c0_98 = arith.constant 0 : index
    %174 = vector.load %arg6[%c3_96, %c0_97, %c0_98] : memref<4x1x32xf32, #tpu.memory_space<vmem>>, vector<1x1x32xf32>
    %175 = vector.shape_cast %174 : vector<1x1x32xf32> to vector<1x32xf32>
    %176 = arith.truncf %159 : vector<16x32xf32> to vector<16x32xbf16>
    %cst_99 = arith.constant dense<0.000000e+00> : vector<16x32xf32>
    %177 = tpu.matmul %176, %161, %cst_99 {dimension_numbers = #tpu.dot_dimension_numbers<[1], [0], [0], [1], [0, 0, 1, 1], [], []>} : vector<16x32xbf16>, vector<32x32xbf16>, vector<16x32xf32> -> vector<16x32xf32>
    %178 = vector.broadcast %169 : vector<1x32xf32> to vector<16x32xf32>
    %179 = arith.addf %177, %178 : vector<16x32xf32>
    %cst_100 = arith.constant 0.353553385 : f32
    %180 = vector.broadcast %cst_100 : f32 to vector<16x32xf32>
    %181 = arith.mulf %179, %180 : vector<16x32xf32>
    %182 = arith.truncf %3 : vector<16x32xf32> to vector<16x32xbf16>
    %cst_101 = arith.constant dense<0.000000e+00> : vector<16x32xf32>
    %183 = tpu.matmul %182, %163, %cst_101 {dimension_numbers = #tpu.dot_dimension_numbers<[1], [0], [0], [1], [0, 0, 1, 1], [], []>} : vector<16x32xbf16>, vector<32x32xbf16>, vector<16x32xf32> -> vector<16x32xf32>
    %184 = vector.broadcast %171 : vector<1x32xf32> to vector<16x32xf32>
    %185 = arith.addf %183, %184 : vector<16x32xf32>
    %186 = arith.truncf %3 : vector<16x32xf32> to vector<16x32xbf16>
    %cst_102 = arith.constant dense<0.000000e+00> : vector<16x32xf32>
    %187 = tpu.matmul %186, %165, %cst_102 {dimension_numbers = #tpu.dot_dimension_numbers<[1], [0], [0], [1], [0, 0, 1, 1], [], []>} : vector<16x32xbf16>, vector<32x32xbf16>, vector<16x32xf32> -> vector<16x32xf32>
    %188 = vector.broadcast %173 : vector<1x32xf32> to vector<16x32xf32>
    %189 = arith.addf %187, %188 : vector<16x32xf32>
    %190 = arith.truncf %181 : vector<16x32xf32> to vector<16x32xbf16>
    %191 = arith.truncf %185 : vector<16x32xf32> to vector<16x32xbf16>
    %192 = arith.truncf %189 : vector<16x32xf32> to vector<16x32xbf16>
    %193 = vector.extract_strided_slice %190 {offsets = [0, 0], sizes = [16, 8], strides = [1, 1]} : vector<16x32xbf16> to vector<16x8xbf16>
    %194 = vector.extract_strided_slice %191 {offsets = [0, 0], sizes = [16, 8], strides = [1, 1]} : vector<16x32xbf16> to vector<16x8xbf16>
    %195 = vector.extract_strided_slice %192 {offsets = [0, 0], sizes = [16, 8], strides = [1, 1]} : vector<16x32xbf16> to vector<16x8xbf16>
    %cst_103 = arith.constant dense<0.000000e+00> : vector<16x16xf32>
    %196 = tpu.matmul %193, %194, %cst_103 {dimension_numbers = #tpu.dot_dimension_numbers<[1], [1], [0], [0], [0, 0, 1, 0], [], []>} : vector<16x8xbf16>, vector<16x8xbf16>, vector<16x16xf32> -> vector<16x16xf32>
    %cst_104 = arith.constant dense<0xFF800000> : vector<16xf32>
    %197 = vector.multi_reduction <maximumf>, %196, %cst_104 [1] : vector<16x16xf32> to vector<16xf32>
    %198 = vector.shape_cast %197 : vector<16xf32> to vector<16x1xf32>
    %199 = vector.broadcast %198 : vector<16x1xf32> to vector<16x16xf32>
    %200 = arith.subf %196, %199 : vector<16x16xf32>
    %201 = math.exp %200 : vector<16x16xf32>
    %cst_105 = arith.constant dense<0.000000e+00> : vector<16xf32>
    %202 = vector.multi_reduction <add>, %201, %cst_105 [1] : vector<16x16xf32> to vector<16xf32>
    %203 = vector.shape_cast %202 : vector<16xf32> to vector<16x1xf32>
    %204 = tpu.reciprocal %203 {approx = true} : vector<16x1xf32> -> vector<16x1xf32>
    %205 = vector.broadcast %204 : vector<16x1xf32> to vector<16x16xf32>
    %206 = arith.mulf %201, %205 : vector<16x16xf32>
    %207 = arith.truncf %206 : vector<16x16xf32> to vector<16x16xbf16>
    %cst_106 = arith.constant dense<0.000000e+00> : vector<16x8xf32>
    %208 = tpu.matmul %207, %195, %cst_106 {dimension_numbers = #tpu.dot_dimension_numbers<[1], [0], [0], [1], [0, 0, 1, 1], [], []>} : vector<16x16xbf16>, vector<16x8xbf16>, vector<16x8xf32> -> vector<16x8xf32>
    %209 = vector.extract_strided_slice %167 {offsets = [0, 0], sizes = [8, 32], strides = [1, 1]} : vector<32x32xbf16> to vector<8x32xbf16>
    %210 = arith.truncf %208 : vector<16x8xf32> to vector<16x8xbf16>
    %cst_107 = arith.constant dense<0.000000e+00> : vector<16x32xf32>
    %211 = tpu.matmul %210, %209, %cst_107 {dimension_numbers = #tpu.dot_dimension_numbers<[1], [0], [0], [1], [0, 0, 1, 1], [], []>} : vector<16x8xbf16>, vector<8x32xbf16>, vector<16x32xf32> -> vector<16x32xf32>
    %212 = vector.extract_strided_slice %190 {offsets = [0, 8], sizes = [16, 8], strides = [1, 1]} : vector<16x32xbf16> to vector<16x8xbf16>
    %213 = vector.extract_strided_slice %191 {offsets = [0, 8], sizes = [16, 8], strides = [1, 1]} : vector<16x32xbf16> to vector<16x8xbf16>
    %214 = vector.extract_strided_slice %192 {offsets = [0, 8], sizes = [16, 8], strides = [1, 1]} : vector<16x32xbf16> to vector<16x8xbf16>
    %cst_108 = arith.constant dense<0.000000e+00> : vector<16x16xf32>
    %215 = tpu.matmul %212, %213, %cst_108 {dimension_numbers = #tpu.dot_dimension_numbers<[1], [1], [0], [0], [0, 0, 1, 0], [], []>} : vector<16x8xbf16>, vector<16x8xbf16>, vector<16x16xf32> -> vector<16x16xf32>
    %cst_109 = arith.constant dense<0xFF800000> : vector<16xf32>
    %216 = vector.multi_reduction <maximumf>, %215, %cst_109 [1] : vector<16x16xf32> to vector<16xf32>
    %217 = vector.shape_cast %216 : vector<16xf32> to vector<16x1xf32>
    %218 = vector.broadcast %217 : vector<16x1xf32> to vector<16x16xf32>
    %219 = arith.subf %215, %218 : vector<16x16xf32>
    %220 = math.exp %219 : vector<16x16xf32>
    %cst_110 = arith.constant dense<0.000000e+00> : vector<16xf32>
    %221 = vector.multi_reduction <add>, %220, %cst_110 [1] : vector<16x16xf32> to vector<16xf32>
    %222 = vector.shape_cast %221 : vector<16xf32> to vector<16x1xf32>
    %223 = tpu.reciprocal %222 {approx = true} : vector<16x1xf32> -> vector<16x1xf32>
    %224 = vector.broadcast %223 : vector<16x1xf32> to vector<16x16xf32>
    %225 = arith.mulf %220, %224 : vector<16x16xf32>
    %226 = arith.truncf %225 : vector<16x16xf32> to vector<16x16xbf16>
    %cst_111 = arith.constant dense<0.000000e+00> : vector<16x8xf32>
    %227 = tpu.matmul %226, %214, %cst_111 {dimension_numbers = #tpu.dot_dimension_numbers<[1], [0], [0], [1], [0, 0, 1, 1], [], []>} : vector<16x16xbf16>, vector<16x8xbf16>, vector<16x8xf32> -> vector<16x8xf32>
    %228 = vector.extract_strided_slice %167 {offsets = [8, 0], sizes = [8, 32], strides = [1, 1]} : vector<32x32xbf16> to vector<8x32xbf16>
    %229 = arith.truncf %227 : vector<16x8xf32> to vector<16x8xbf16>
    %cst_112 = arith.constant dense<0.000000e+00> : vector<16x32xf32>
    %230 = tpu.matmul %229, %228, %cst_112 {dimension_numbers = #tpu.dot_dimension_numbers<[1], [0], [0], [1], [0, 0, 1, 1], [], []>} : vector<16x8xbf16>, vector<8x32xbf16>, vector<16x32xf32> -> vector<16x32xf32>
    %231 = arith.addf %211, %230 : vector<16x32xf32>
    %232 = vector.extract_strided_slice %190 {offsets = [0, 16], sizes = [16, 8], strides = [1, 1]} : vector<16x32xbf16> to vector<16x8xbf16>
    %233 = vector.extract_strided_slice %191 {offsets = [0, 16], sizes = [16, 8], strides = [1, 1]} : vector<16x32xbf16> to vector<16x8xbf16>
    %234 = vector.extract_strided_slice %192 {offsets = [0, 16], sizes = [16, 8], strides = [1, 1]} : vector<16x32xbf16> to vector<16x8xbf16>
    %cst_113 = arith.constant dense<0.000000e+00> : vector<16x16xf32>
    %235 = tpu.matmul %232, %233, %cst_113 {dimension_numbers = #tpu.dot_dimension_numbers<[1], [1], [0], [0], [0, 0, 1, 0], [], []>} : vector<16x8xbf16>, vector<16x8xbf16>, vector<16x16xf32> -> vector<16x16xf32>
    %cst_114 = arith.constant dense<0xFF800000> : vector<16xf32>
    %236 = vector.multi_reduction <maximumf>, %235, %cst_114 [1] : vector<16x16xf32> to vector<16xf32>
    %237 = vector.shape_cast %236 : vector<16xf32> to vector<16x1xf32>
    %238 = vector.broadcast %237 : vector<16x1xf32> to vector<16x16xf32>
    %239 = arith.subf %235, %238 : vector<16x16xf32>
    %240 = math.exp %239 : vector<16x16xf32>
    %cst_115 = arith.constant dense<0.000000e+00> : vector<16xf32>
    %241 = vector.multi_reduction <add>, %240, %cst_115 [1] : vector<16x16xf32> to vector<16xf32>
    %242 = vector.shape_cast %241 : vector<16xf32> to vector<16x1xf32>
    %243 = tpu.reciprocal %242 {approx = true} : vector<16x1xf32> -> vector<16x1xf32>
    %244 = vector.broadcast %243 : vector<16x1xf32> to vector<16x16xf32>
    %245 = arith.mulf %240, %244 : vector<16x16xf32>
    %246 = arith.truncf %245 : vector<16x16xf32> to vector<16x16xbf16>
    %cst_116 = arith.constant dense<0.000000e+00> : vector<16x8xf32>
    %247 = tpu.matmul %246, %234, %cst_116 {dimension_numbers = #tpu.dot_dimension_numbers<[1], [0], [0], [1], [0, 0, 1, 1], [], []>} : vector<16x16xbf16>, vector<16x8xbf16>, vector<16x8xf32> -> vector<16x8xf32>
    %248 = vector.extract_strided_slice %167 {offsets = [16, 0], sizes = [8, 32], strides = [1, 1]} : vector<32x32xbf16> to vector<8x32xbf16>
    %249 = arith.truncf %247 : vector<16x8xf32> to vector<16x8xbf16>
    %cst_117 = arith.constant dense<0.000000e+00> : vector<16x32xf32>
    %250 = tpu.matmul %249, %248, %cst_117 {dimension_numbers = #tpu.dot_dimension_numbers<[1], [0], [0], [1], [0, 0, 1, 1], [], []>} : vector<16x8xbf16>, vector<8x32xbf16>, vector<16x32xf32> -> vector<16x32xf32>
    %251 = arith.addf %231, %250 : vector<16x32xf32>
    %252 = vector.extract_strided_slice %190 {offsets = [0, 24], sizes = [16, 8], strides = [1, 1]} : vector<16x32xbf16> to vector<16x8xbf16>
    %253 = vector.extract_strided_slice %191 {offsets = [0, 24], sizes = [16, 8], strides = [1, 1]} : vector<16x32xbf16> to vector<16x8xbf16>
    %254 = vector.extract_strided_slice %192 {offsets = [0, 24], sizes = [16, 8], strides = [1, 1]} : vector<16x32xbf16> to vector<16x8xbf16>
    %cst_118 = arith.constant dense<0.000000e+00> : vector<16x16xf32>
    %255 = tpu.matmul %252, %253, %cst_118 {dimension_numbers = #tpu.dot_dimension_numbers<[1], [1], [0], [0], [0, 0, 1, 0], [], []>} : vector<16x8xbf16>, vector<16x8xbf16>, vector<16x16xf32> -> vector<16x16xf32>
    %cst_119 = arith.constant dense<0xFF800000> : vector<16xf32>
    %256 = vector.multi_reduction <maximumf>, %255, %cst_119 [1] : vector<16x16xf32> to vector<16xf32>
    %257 = vector.shape_cast %256 : vector<16xf32> to vector<16x1xf32>
    %258 = vector.broadcast %257 : vector<16x1xf32> to vector<16x16xf32>
    %259 = arith.subf %255, %258 : vector<16x16xf32>
    %260 = math.exp %259 : vector<16x16xf32>
    %cst_120 = arith.constant dense<0.000000e+00> : vector<16xf32>
    %261 = vector.multi_reduction <add>, %260, %cst_120 [1] : vector<16x16xf32> to vector<16xf32>
    %262 = vector.shape_cast %261 : vector<16xf32> to vector<16x1xf32>
    %263 = tpu.reciprocal %262 {approx = true} : vector<16x1xf32> -> vector<16x1xf32>
    %264 = vector.broadcast %263 : vector<16x1xf32> to vector<16x16xf32>
    %265 = arith.mulf %260, %264 : vector<16x16xf32>
    %266 = arith.truncf %265 : vector<16x16xf32> to vector<16x16xbf16>
    %cst_121 = arith.constant dense<0.000000e+00> : vector<16x8xf32>
    %267 = tpu.matmul %266, %254, %cst_121 {dimension_numbers = #tpu.dot_dimension_numbers<[1], [0], [0], [1], [0, 0, 1, 1], [], []>} : vector<16x16xbf16>, vector<16x8xbf16>, vector<16x8xf32> -> vector<16x8xf32>
    %268 = vector.extract_strided_slice %167 {offsets = [24, 0], sizes = [8, 32], strides = [1, 1]} : vector<32x32xbf16> to vector<8x32xbf16>
    %269 = arith.truncf %267 : vector<16x8xf32> to vector<16x8xbf16>
    %cst_122 = arith.constant dense<0.000000e+00> : vector<16x32xf32>
    %270 = tpu.matmul %269, %268, %cst_122 {dimension_numbers = #tpu.dot_dimension_numbers<[1], [0], [0], [1], [0, 0, 1, 1], [], []>} : vector<16x8xbf16>, vector<8x32xbf16>, vector<16x32xf32> -> vector<16x32xf32>
    %271 = arith.addf %251, %270 : vector<16x32xf32>
    %272 = vector.broadcast %175 : vector<1x32xf32> to vector<16x32xf32>
    %273 = arith.addf %271, %272 : vector<16x32xf32>
    %274 = arith.addf %159, %273 : vector<16x32xf32>
    %c0_123 = arith.constant 0 : index
    %c0_124 = arith.constant 0 : index
    %275 = vector.load %arg9[%c0_123, %c0_124] : memref<1x32xf32, #tpu.memory_space<vmem>>, vector<1x32xf32>
    %c0_125 = arith.constant 0 : index
    %c0_126 = arith.constant 0 : index
    %276 = vector.load %arg10[%c0_125, %c0_126] : memref<1x32xf32, #tpu.memory_space<vmem>>, vector<1x32xf32>
    %cst_127 = arith.constant dense<0.000000e+00> : vector<16xf32>
    %277 = vector.multi_reduction <add>, %274, %cst_127 [1] : vector<16x32xf32> to vector<16xf32>
    %278 = vector.shape_cast %277 : vector<16xf32> to vector<16x1xf32>
    %cst_128 = arith.constant 3.200000e+01 : f32
    %279 = vector.broadcast %cst_128 : f32 to vector<16x1xf32>
    %280 = arith.divf %278, %279 : vector<16x1xf32>
    %281 = vector.broadcast %280 : vector<16x1xf32> to vector<16x32xf32>
    %282 = arith.subf %274, %281 : vector<16x32xf32>
    %283 = arith.mulf %282, %282 : vector<16x32xf32>
    %cst_129 = arith.constant dense<0.000000e+00> : vector<16xf32>
    %284 = vector.multi_reduction <add>, %283, %cst_129 [1] : vector<16x32xf32> to vector<16xf32>
    %285 = vector.shape_cast %284 : vector<16xf32> to vector<16x1xf32>
    %cst_130 = arith.constant 3.200000e+01 : f32
    %286 = vector.broadcast %cst_130 : f32 to vector<16x1xf32>
    %287 = arith.divf %285, %286 : vector<16x1xf32>
    %cst_131 = arith.constant 9.99999974E-6 : f32
    %288 = vector.broadcast %cst_131 : f32 to vector<16x1xf32>
    %289 = arith.addf %287, %288 : vector<16x1xf32>
    %290 = math.rsqrt %289 : vector<16x1xf32>
    %291 = vector.broadcast %290 : vector<16x1xf32> to vector<16x32xf32>
    %292 = arith.mulf %282, %291 : vector<16x32xf32>
    %293 = vector.broadcast %275 : vector<1x32xf32> to vector<16x32xf32>
    %294 = arith.mulf %292, %293 : vector<16x32xf32>
    %295 = vector.broadcast %276 : vector<1x32xf32> to vector<16x32xf32>
    %296 = arith.addf %294, %295 : vector<16x32xf32>
    %c0_132 = arith.constant 0 : index
    %c0_133 = arith.constant 0 : index
    %297 = vector.load %arg11[%c0_132, %c0_133] : memref<32x32xbf16, #tpu.memory_space<vmem>>, vector<32x32xbf16>
    %298 = arith.truncf %296 : vector<16x32xf32> to vector<16x32xbf16>
    %cst_134 = arith.constant dense<0.000000e+00> : vector<16x32xf32>
    %299 = tpu.matmul %298, %297, %cst_134 {dimension_numbers = #tpu.dot_dimension_numbers<[1], [0], [0], [1], [0, 0, 1, 1], [], []>} : vector<16x32xbf16>, vector<32x32xbf16>, vector<16x32xf32> -> vector<16x32xf32>
    %c0_135 = arith.constant 0 : index
    %c0_136 = arith.constant 0 : index
    %300 = vector.load %arg12[%c0_135, %c0_136] : memref<1x32xf32, #tpu.memory_space<vmem>>, vector<1x32xf32>
    %301 = vector.broadcast %300 : vector<1x32xf32> to vector<16x32xf32>
    %302 = arith.addf %299, %301 : vector<16x32xf32>
    %cst_137 = arith.constant 5.000000e-01 : f32
    %303 = vector.broadcast %cst_137 : f32 to vector<16x32xf32>
    %304 = arith.mulf %303, %302 : vector<16x32xf32>
    %cst_138 = arith.constant 4.471500e-02 : f32
    %305 = vector.broadcast %cst_138 : f32 to vector<16x32xf32>
    %306 = arith.mulf %305, %302 : vector<16x32xf32>
    %307 = arith.mulf %306, %302 : vector<16x32xf32>
    %308 = arith.mulf %307, %302 : vector<16x32xf32>
    %309 = arith.addf %302, %308 : vector<16x32xf32>
    %cst_139 = arith.constant 0.797884583 : f32
    %310 = vector.broadcast %cst_139 : f32 to vector<16x32xf32>
    %311 = arith.mulf %310, %309 : vector<16x32xf32>
    %312 = math.tanh %311 : vector<16x32xf32>
    %cst_140 = arith.constant 1.000000e+00 : f32
    %313 = vector.broadcast %cst_140 : f32 to vector<16x32xf32>
    %314 = arith.addf %313, %312 : vector<16x32xf32>
    %315 = arith.mulf %304, %314 : vector<16x32xf32>
    %c0_141 = arith.constant 0 : index
    %c0_142 = arith.constant 0 : index
    %316 = vector.load %arg13[%c0_141, %c0_142] : memref<32x32xbf16, #tpu.memory_space<vmem>>, vector<32x32xbf16>
    %317 = arith.truncf %315 : vector<16x32xf32> to vector<16x32xbf16>
    %cst_143 = arith.constant dense<0.000000e+00> : vector<16x32xf32>
    %318 = tpu.matmul %317, %316, %cst_143 {dimension_numbers = #tpu.dot_dimension_numbers<[1], [0], [0], [1], [0, 0, 1, 1], [], []>} : vector<16x32xbf16>, vector<32x32xbf16>, vector<16x32xf32> -> vector<16x32xf32>
    %c0_144 = arith.constant 0 : index
    %c0_145 = arith.constant 0 : index
    %319 = vector.load %arg14[%c0_144, %c0_145] : memref<1x32xf32, #tpu.memory_space<vmem>>, vector<1x32xf32>
    %320 = vector.broadcast %319 : vector<1x32xf32> to vector<16x32xf32>
    %321 = arith.addf %318, %320 : vector<16x32xf32>
    %322 = arith.addf %296, %321 : vector<16x32xf32>
    %c0_146 = arith.constant 0 : index
    %c0_147 = arith.constant 0 : index
    %323 = vector.load %arg15[%c0_146, %c0_147] : memref<1x32xf32, #tpu.memory_space<vmem>>, vector<1x32xf32>
    %c0_148 = arith.constant 0 : index
    %c0_149 = arith.constant 0 : index
    %324 = vector.load %arg16[%c0_148, %c0_149] : memref<1x32xf32, #tpu.memory_space<vmem>>, vector<1x32xf32>
    %cst_150 = arith.constant dense<0.000000e+00> : vector<16xf32>
    %325 = vector.multi_reduction <add>, %322, %cst_150 [1] : vector<16x32xf32> to vector<16xf32>
    %326 = vector.shape_cast %325 : vector<16xf32> to vector<16x1xf32>
    %cst_151 = arith.constant 3.200000e+01 : f32
    %327 = vector.broadcast %cst_151 : f32 to vector<16x1xf32>
    %328 = arith.divf %326, %327 : vector<16x1xf32>
    %329 = vector.broadcast %328 : vector<16x1xf32> to vector<16x32xf32>
    %330 = arith.subf %322, %329 : vector<16x32xf32>
    %331 = arith.mulf %330, %330 : vector<16x32xf32>
    %cst_152 = arith.constant dense<0.000000e+00> : vector<16xf32>
    %332 = vector.multi_reduction <add>, %331, %cst_152 [1] : vector<16x32xf32> to vector<16xf32>
    %333 = vector.shape_cast %332 : vector<16xf32> to vector<16x1xf32>
    %cst_153 = arith.constant 3.200000e+01 : f32
    %334 = vector.broadcast %cst_153 : f32 to vector<16x1xf32>
    %335 = arith.divf %333, %334 : vector<16x1xf32>
    %cst_154 = arith.constant 9.99999974E-6 : f32
    %336 = vector.broadcast %cst_154 : f32 to vector<16x1xf32>
    %337 = arith.addf %335, %336 : vector<16x1xf32>
    %338 = math.rsqrt %337 : vector<16x1xf32>
    %339 = vector.broadcast %338 : vector<16x1xf32> to vector<16x32xf32>
    %340 = arith.mulf %330, %339 : vector<16x32xf32>
    %341 = vector.broadcast %323 : vector<1x32xf32> to vector<16x32xf32>
    %342 = arith.mulf %340, %341 : vector<16x32xf32>
    %343 = vector.broadcast %324 : vector<1x32xf32> to vector<16x32xf32>
    %344 = arith.addf %342, %343 : vector<16x32xf32>
    %c0_155 = arith.constant 0 : index
    %c0_156 = arith.constant 0 : index
    %c0_157 = arith.constant 0 : index
    %345 = vector.load %arg17[%c0_155, %c0_156, %c0_157] : memref<1x16x32xf32, #tpu.memory_space<vmem>>, vector<1x16x32xf32>
    %346 = vector.shape_cast %345 : vector<1x16x32xf32> to vector<16x32xf32>
    %347 = vector.shape_cast %344 : vector<16x32xf32> to vector<1x16x32xf32>
    tpu.vector_store %arg17[%c0_155, %c0_156, %c0_157], %347 {strides = array<i32>} : memref<1x16x32xf32, #tpu.memory_space<vmem>>, vector<1x16x32xf32>,
    return
  }
  func.func @transform_0(%arg0: i32) -> (i32, i32, i32) {
    %c0_i32 = arith.constant 0 : i32
    %c0_i32_0 = arith.constant 0 : i32
    %c0_i32_1 = arith.constant 0 : i32
    return %arg0, %c0_i32, %c0_i32_0 : i32, i32, i32
  }
  func.func @transform_1(%arg0: i32) -> (i32, i32, i32) {
    %c0_i32 = arith.constant 0 : i32
    %c0_i32_0 = arith.constant 0 : i32
    %c0_i32_1 = arith.constant 0 : i32
    return %arg0, %c0_i32, %c0_i32_0 : i32, i32, i32
  }
  func.func @transform_2(%arg0: i32) -> (i32, i32, i32) {
    %c0_i32 = arith.constant 0 : i32
    %c0_i32_0 = arith.constant 0 : i32
    %c0_i32_1 = arith.constant 0 : i32
    %c0_i32_2 = arith.constant 0 : i32
    return %c0_i32, %c0_i32_0, %c0_i32_1 : i32, i32, i32
  }
  func.func @transform_3(%arg0: i32) -> (i32, i32, i32) {
    %c0_i32 = arith.constant 0 : i32
    %c0_i32_0 = arith.constant 0 : i32
    %c0_i32_1 = arith.constant 0 : i32
    %c0_i32_2 = arith.constant 0 : i32
    return %c0_i32, %c0_i32_0, %c0_i32_1 : i32, i32, i32
  }
  func.func @transform_4(%arg0: i32) -> (i32, i32, i32) {
    %c0_i32 = arith.constant 0 : i32
    %c0_i32_0 = arith.constant 0 : i32
    %c0_i32_1 = arith.constant 0 : i32
    %c0_i32_2 = arith.constant 0 : i32
    return %c0_i32, %c0_i32_0, %c0_i32_1 : i32, i32, i32
  }
  func.func @transform_5(%arg0: i32) -> (i32, i32, i32) {
    %c0_i32 = arith.constant 0 : i32
    %c0_i32_0 = arith.constant 0 : i32
    %c0_i32_1 = arith.constant 0 : i32
    %c0_i32_2 = arith.constant 0 : i32
    return %c0_i32, %c0_i32_0, %c0_i32_1 : i32, i32, i32
  }
  func.func @transform_6(%arg0: i32) -> (i32, i32) {
    %c0_i32 = arith.constant 0 : i32
    %c0_i32_0 = arith.constant 0 : i32
    %c0_i32_1 = arith.constant 0 : i32
    return %c0_i32, %c0_i32_0 : i32, i32
  }
  func.func @transform_7(%arg0: i32) -> (i32, i32) {
    %c0_i32 = arith.constant 0 : i32
    %c0_i32_0 = arith.constant 0 : i32
    %c0_i32_1 = arith.constant 0 : i32
    return %c0_i32, %c0_i32_0 : i32, i32
  }
  func.func @transform_8(%arg0: i32) -> (i32, i32) {
    %c0_i32 = arith.constant 0 : i32
    %c0_i32_0 = arith.constant 0 : i32
    %c0_i32_1 = arith.constant 0 : i32
    return %c0_i32, %c0_i32_0 : i32, i32
  }
  func.func @transform_9(%arg0: i32) -> (i32, i32) {
    %c0_i32 = arith.constant 0 : i32
    %c0_i32_0 = arith.constant 0 : i32
    %c0_i32_1 = arith.constant 0 : i32
    return %c0_i32, %c0_i32_0 : i32, i32
  }
  func.func @transform_10(%arg0: i32) -> (i32, i32) {
    %c0_i32 = arith.constant 0 : i32
    %c0_i32_0 = arith.constant 0 : i32
    %c0_i32_1 = arith.constant 0 : i32
    return %c0_i32, %c0_i32_0 : i32, i32
  }
  func.func @transform_11(%arg0: i32) -> (i32, i32) {
    %c0_i32 = arith.constant 0 : i32
    %c0_i32_0 = arith.constant 0 : i32
    %c0_i32_1 = arith.constant 0 : i32
    return %c0_i32, %c0_i32_0 : i32, i32
  }
  func.func @transform_12(%arg0: i32) -> (i32, i32) {
    %c0_i32 = arith.constant 0 : i32
    %c0_i32_0 = arith.constant 0 : i32
    %c0_i32_1 = arith.constant 0 : i32
    return %c0_i32, %c0_i32_0 : i32, i32
  }
  func.func @transform_13(%arg0: i32) -> (i32, i32) {
    %c0_i32 = arith.constant 0 : i32
    %c0_i32_0 = arith.constant 0 : i32
    %c0_i32_1 = arith.constant 0 : i32
    return %c0_i32, %c0_i32_0 : i32, i32
  }
  func.func @transform_14(%arg0: i32) -> (i32, i32) {
    %c0_i32 = arith.constant 0 : i32
    %c0_i32_0 = arith.constant 0 : i32
    %c0_i32_1 = arith.constant 0 : i32
    return %c0_i32, %c0_i32_0 : i32, i32
  }
  func.func @transform_15(%arg0: i32) -> (i32, i32) {
    %c0_i32 = arith.constant 0 : i32
    %c0_i32_0 = arith.constant 0 : i32
    %c0_i32_1 = arith.constant 0 : i32
    return %c0_i32, %c0_i32_0 : i32, i32
  }
  func.func @transform_16(%arg0: i32) -> (i32, i32, i32) {
    %c0_i32 = arith.constant 0 : i32
    %c0_i32_0 = arith.constant 0 : i32
    %c0_i32_1 = arith.constant 0 : i32
    return %arg0, %c0_i32, %c0_i32_0 : i32, i32, i32
  }
}

</mosaic_0001>

<bundles_post_ra>
// kernel: informer_stack_forward.12
= control target key start
LH: loop header
LB: loop body
LE: loop exit
PB: predicated region body
PF: predicated region fallthrough
CT: control target
= control target key end

     0   :  { %v26_v0 = vlaneseq  ;;  %v608_v1 = vmov 0.0   ;;  %vm609_vm0 = vmmov 0   ;;  %vm59_vm2 = vcmask 261120   ;;  %s754_s1 = inlined_call_operand.vmem [shape: bf16[3,32,32], index: 1, kind: input, shape index: {}]   ;;  %s755_s0 = inlined_call_operand.vmem [shape: f32[2,16,32], index: 0, kind: input, shape index: {}]   ;;  %s756_s2 = inlined_call_operand.vmem [shape: f32[1,32], index: 2, kind: input, shape index: {}]   ;;  %s757_s3 = inlined_call_operand.vmem [shape: f32[1,32], index: 3, kind: input, shape index: {}]   ;;  %s758_s4 = inlined_call_operand.vmem [shape: f32[1,32], index: 4, kind: input, shape index: {}]   ;;  %s759_s5 = inlined_call_operand.vmem [shape: f32[2,16,32], index: 5, kind: output, shape index: {}]  }
   0x1   :  { %542 = vmatprep.subr.bf16.mxu0 %v608_v1  ;;  %550 = vmatprep.subr.bf16.mxu1 %v608_v1  ;;  %v592_v2 = vld [vmem:[%s754_s1 + $0x18] sm:$0xff]   ;;  %v593_v3 = vld [vmem:[%s754_s1 + $0x8] sm:$0xff]   ;;  %v594_v5 = vld [vmem:[%s754_s1 + $0x10] sm:$0xff]  }
   0x2   :  { %546 = vmatprep.mubr.msk.bf16.mxu0 %vm609_vm0, %v608_v1  ;;  %554 = vmatprep.mubr.msk.bf16.mxu1 %vm609_vm0, %v608_v1  ;;  %v652_v4 = vshrl.u32 %v26_v0, 7  ;;  %v595_v6 = vld [vmem:[%s754_s1] sm:$0xff]   ;;  %v23_v8 = vld [vmem:[%s755_s0 + $0x8] sm:$0xff]  ;;  %v511_v21 = vld [vmem:[%s755_s0 + $0x10] sm:$0xff] }
   0x3   :  { %543 = vmatpush3.bf16.msra.mxu0 %v592_v2  ;;  %551 = vmatpush3.bf16.msra.mxu1 %v593_v3  ;;  %v22_v7 = vld [vmem:[%s755_s0] sm:$0xff]  ;;  %v25_v10 = vrot.slane %v23_v8, 7  ;;  %v32_v12 = vrot.slane %v23_v8, 1  ;;  %v596_v14 = vld [vmem:[%s754_s1 + $0x28] sm:$0xff]   ;;  %v512_v22 = vld [vmem:[%s755_s0 + $0x18] sm:$0xff]  ;;  %v244_v24 = vrot.slane %v511_v21, 7 }
   0x4   :  { %544 = vmatprep.subr.bf16.mxu0 %v608_v1  ;;  %552 = vmatprep.subr.bf16.mxu1 %v608_v1  ;;  %vm28_vm1 = vcmp.lt.s32.totalorder %v652_v4, 1  ;;  %v24_v9 = vrot.slane %v22_v7, 7  ;;  %v31_v11 = vrot.slane %v22_v7, 1  ;;  %v46_v13 = vpack.c.bf16 %v23_v8, %v22_v7  ;;  %v597_v18 = vld [vmem:[%s754_s1 + $0x20] sm:$0xff]  }
   0x5   :  { %vm33_vm3 = vcmp.lt.s32.totalorder %v652_v4, 7  ;;  %v245_v25 = vrot.slane %v512_v22, 7  ;;  %v253_v26 = vpack.c.bf16 %v512_v22, %v511_v21  ;;  %v248_v27 = vrot.slane %v511_v21, 1  ;;  %v510_v47 = vld [vmem:[%s756_s2] ss:$0 sm:$0xff] }
   0x6   :  { %v29_v15 = vsel %vm28_vm1, %v24_v9, %v25_v10  ;;  %v30_v16 = vsel %vm28_vm1, %v25_v10, %v24_v9  ;;  %v34_v19 = vsel %vm33_vm3, %v31_v11, %v32_v12  ;;  %v35_v20 = vsel %vm33_vm3, %v32_v12, %v31_v11 }
   0x7   :  { %545 = vmatpush3.bf16.msra.mxu0 %v594_v5  ;;  %553 = vmatpush3.bf16.msra.mxu1 %v595_v6  ;;  %v40_v17 = vpack.c.bf16 %v29_v15, %v30_v16  ;;  %v165_v23 = vpack.c.bf16 %v35_v20, %v34_v19  ;;  %v249_v28 = vrot.slane %v512_v22, 1  ;;  %v246_v29 = vsel %vm28_vm1, %v244_v24, %v245_v25 }
   0x8   :  { %558 = vmatprep.subr.bf16.mxu0 %v608_v1  ;;  %566 = vmatprep.subr.bf16.mxu1 %v608_v1  ;;  %v247_v30 = vsel %vm28_vm1, %v245_v25, %v244_v24 }
   0x9   :  { %v250_v31 = vsel %vm33_vm3, %v248_v27, %v249_v28  ;;  %v251_v32 = vsel %vm33_vm3, %v249_v28, %v248_v27  ;;  %v252_v33 = vpack.c.bf16 %v246_v29, %v247_v30 }
   0xa   :  { %547 = vmatmul.mubr.msk.bf16.vlgmr.msra.gmra.mxu0 %vm59_vm2, %v46_v13  ;;  %555 = vmatmul.mubr.msk.bf16.vlgmr.msra.gmra.mxu1 %vm59_vm2, %v40_v17  ;;  %v342_v34 = vpack.c.bf16 %v251_v32, %v250_v31 }
   0xb   :  { %559 = vmatpush3.bf16.msra.mxu0 %v596_v14  ;;  %567 = vmatpush3.bf16.msra.mxu1 %v592_v2 }
   0xc   :  { %560 = vmatprep.subr.bf16.mxu0 %v608_v1  ;;  %568 = vmatprep.subr.bf16.mxu1 %v608_v1 }
   0xd   :  { %562 = vmatprep.mubr.msk.bf16.mxu0 %vm609_vm0, %v608_v1  ;;  %570 = vmatprep.mubr.msk.bf16.mxu1 %vm609_vm0, %v608_v1 }
   0xf   :  { %561 = vmatpush3.bf16.msra.mxu0 %v597_v18  ;;  %569 = vmatpush3.bf16.msra.mxu1 %v594_v5 }
  0x10   :  { %574 = vmatprep.subr.bf16.mxu0 %v608_v1  ;;  %582 = vmatprep.subr.bf16.mxu1 %v608_v1 }
  0x12   :  { %563 = vmatmul.mubr.msk.bf16.vlgmr.msra.gmra.mxu0 %vm59_vm2, %v165_v23  ;;  %571 = vmatmul.mubr.msk.bf16.vlgmr.msra.gmra.mxu1 %vm59_vm2, %v253_v26 }
  0x13   :  { %575 = vmatpush3.bf16.msra.mxu0 %v593_v3  ;;  %583 = vmatpush3.bf16.msra.mxu1 %v596_v14 }
  0x14   :  { %576 = vmatprep.subr.bf16.mxu0 %v608_v1  ;;  %584 = vmatprep.subr.bf16.mxu1 %v608_v1 }
  0x15   :  { %578 = vmatprep.mubr.msk.bf16.mxu0 %vm609_vm0, %v608_v1  ;;  %586 = vmatprep.mubr.msk.bf16.mxu1 %vm609_vm0, %v608_v1 }
  0x17   :  { %577 = vmatpush3.bf16.msra.mxu0 %v595_v6  ;;  %585 = vmatpush3.bf16.msra.mxu1 %v597_v18 }
  0x1a   :  { %579 = vmatmul.mubr.msk.bf16.vlgmr.msra.gmra.mxu0 %vm59_vm2, %v252_v33  ;;  %587 = vmatmul.mubr.msk.bf16.vlgmr.msra.gmra.mxu1 %vm59_vm2, %v342_v34 }
  0xca   :  { %v97_v35 = vpop.f32.mrf.mxu0  ;;  %v153_v36 = vpop.f32.mrf.mxu1 }
  0xcb   :  { %v154_v42 = vadd.f32 %v153_v36, %v97_v35 }
  0xcc   :  { %v548_v37 = vpop.f32.mrf.mxu0  ;;  %v556_v38 = vpop.f32.mrf.mxu1 }
  0xce   :  { %v100_v39 = vpop.f32.mrf.mxu0  ;;  %v156_v40 = vpop.f32.mrf.mxu1 }
  0xcf   :  { %v157_v49 = vadd.f32 %v156_v40, %v100_v39 }
  0xd0   :  { %v549_v41 = vpop.f32.mrf.mxu0  ;;  %v557_v43 = vpop.f32.mrf.mxu1 }
  0xd2   :  { %v215_v44 = vpop.f32.mrf.mxu0  ;;  %v291_v46 = vpop.f32.mrf.mxu1 }
  0xd3   :  { %v222_v45 = vadd.f32 %v215_v44, %v154_v42 }
  0xd4   :  { %v564_v48 = vpop.f32.mrf.mxu0  ;;  %v572_v50 = vpop.f32.mrf.mxu1 }
  0xd5   :  { %v230_v52 = vadd.f32 %v510_v47, %v222_v45 }
  0xd6   :  { %v218_v51 = vpop.f32.mrf.mxu0  ;;  %v294_v54 = vpop.f32.mrf.mxu1 }
  0xd7   :  { %v223_v53 = vadd.f32 %v218_v51, %v157_v49  ;;  %v232_v59 = vsel %vm59_vm2, %v230_v52, 0.0 }
  0xd8   :  { %v565_v55 = vpop.f32.mrf.mxu0  ;;  %v573_v57 = vpop.f32.mrf.mxu1 }
  0xd9   :  { %v231_v56 = vadd.f32 %v510_v47, %v223_v53 }
  0xda   :  { %v335_v58 = vpop.f32.mrf.mxu0  ;;  %v380_v62 = vpop.f32.mrf.mxu1 }
  0xdb   :  { %v233_v60 = vsel %vm59_vm2, %v231_v56, 0.0  ;;  %v336_v61 = vadd.f32 %v335_v58, %v291_v46  ;;  %v432_v58 = vld [vmem:[%s757_s3] sm:$0x1] }
  0xdc   :  { %v234_v63 = vadd.f32 %v233_v60, %v232_v59  ;;  %v580_v0 = vpop.f32.mrf.mxu0  ;;  %v588_v2 = vpop.f32.mrf.mxu1  ;;  %v436_v59 = vsub.s32 0, %v652_v4 }
  0xdd   :  { %v387_v1 = vadd.f32 %v380_v62, %v336_v61 }
  0xde   :  { %v235_v3 = vrot.slane %v234_v63, 4  ;;  %v338_v5 = vpop.f32.mrf.mxu0  ;;  %v383_v7 = vpop.f32.mrf.mxu1 }
  0xdf   :  { %v339_v6 = vadd.f32 %v338_v5, %v294_v54  ;;  %v389_v9 = vadd.f32 %v510_v47, %v387_v1 }
  0xe0   :  { %v581_v8 = vpop.f32.mrf.mxu0  ;;  %v589_v11 = vpop.f32.mrf.mxu1  ;;  %v236_v12 = vadd.f32 %v235_v3, %v234_v63  ;;  %v516_v63 = vld [vmem:[%s758_s4] ss:$0 sm:$0xff] }
  0xe1   :  { %v388_v10 = vadd.f32 %v383_v7, %v339_v6  ;;  %v391_v14 = vsel %vm59_vm2, %v389_v9, 0.0 }
  0xe2   :  { %v237_v16 = vrot.slane %v236_v12, 2 }
  0xe3   :  { %v390_v13 = vadd.f32 %v510_v47, %v388_v10 }
  0xe4   :  { %v238_v19 = vadd.f32 %v237_v16, %v236_v12 }
  0xe5   :  { %v392_v15 = vsel %vm59_vm2, %v390_v13, 0.0 }
  0xe6   :  { %v393_v17 = vadd.f32 %v392_v15, %v391_v14  ;;  %v239_v22 = vrot.slane %v238_v19, 1 }
  0xe8   :  { %v394_v18 = vrot.slane %v393_v17, 4  ;;  %v240_v25 = vadd.f32 %v239_v22, %v238_v19 }
  0xea   :  { %v395_v20 = vadd.f32 %v394_v18, %v393_v17 }
  0xec   :  { %v396_v21 = vrot.slane %v395_v20, 2 }
  0xee   :  { %v397_v23 = vadd.f32 %v396_v21, %v395_v20 }
  0xf0   :  { %v398_v24 = vrot.slane %v397_v23, 1 }
  0xf2   :  { %v399_v26 = vadd.f32 %v398_v24, %v397_v23 }
  0xf4   :  { %v400_v27 = vadd.f32 %v399_v26, %v240_v25 }
  0xf6   :  { %v401_v28 = vmul.f32 0.03125, %v400_v27 }
  0xf8   :  { %v402_v29 = vsub.f32 %v230_v52, %v401_v28  ;;  %v403_v30 = vsub.f32 %v231_v56, %v401_v28  ;;  %v415_v31 = vsub.f32 %v389_v9, %v401_v28  ;;  %v416_v32 = vsub.f32 %v390_v13, %v401_v28 }
  0xfa   :  { %v404_v33 = vmul.f32 %v402_v29, %v402_v29  ;;  %v405_v34 = vmul.f32 %v403_v30, %v403_v30  ;;  %v417_v35 = vmul.f32 %v415_v31, %v415_v31  ;;  %v418_v36 = vmul.f32 %v416_v32, %v416_v32 }
  0xfc   :  { %v406_v37 = vsel %vm59_vm2, %v404_v33, 0.0  ;;  %v407_v38 = vsel %vm59_vm2, %v405_v34, 0.0  ;;  %v419_v39 = vsel %vm59_vm2, %v417_v35, 0.0  ;;  %v420_v40 = vsel %vm59_vm2, %v418_v36, 0.0 }
  0xfd   :  { %v408_v41 = vadd.f32 %v407_v38, %v406_v37  ;;  %v421_v42 = vadd.f32 %v420_v40, %v419_v39 }
  0xff   :  { %v409_v43 = vrot.slane %v408_v41, 4  ;;  %v422_v44 = vrot.slane %v421_v42, 4 }
 0x101   :  { %v410_v45 = vadd.f32 %v409_v43, %v408_v41  ;;  %v423_v46 = vadd.f32 %v422_v44, %v421_v42 }
 0x103   :  { %v411_v47 = vrot.slane %v410_v45, 2  ;;  %v424_v48 = vrot.slane %v423_v46, 2 }
 0x105   :  { %v412_v49 = vadd.f32 %v411_v47, %v410_v45  ;;  %v425_v50 = vadd.f32 %v424_v48, %v423_v46 }
 0x107   :  { %v413_v51 = vrot.slane %v412_v49, 1  ;;  %v426_v52 = vrot.slane %v425_v50, 1 }
 0x109   :  { %v414_v53 = vadd.f32 %v413_v51, %v412_v49  ;;  %v427_v54 = vadd.f32 %v426_v52, %v425_v50 }
 0x10b   :  { %v428_v55 = vadd.f32 %v427_v54, %v414_v53 }
 0x10d   :  { %v429_v56 = vmul.f32 0.03125, %v428_v55 }
 0x10f   :  { %v430_v57 = vadd.f32 1e-05, %v429_v56 }
 0x111   :  { %598 = vrsqrt.f32 %v430_v57 }
 0x11e   :  { %v599_v60 = vpop.eup %598 }
 0x11f   :  { %v433_v61 = vmul.f32 %v599_v60, %v432_v58 }
 0x121   :  { %v437_v62 = vrot.slane %v433_v61, %v436_v59 }
 0x123   :  { %v438_v0 = vmul.f32 %v437_v62, %v402_v29  ;;  %v439_v1 = vmul.f32 %v437_v62, %v403_v30  ;;  %v463_v2 = vmul.f32 %v437_v62, %v415_v31  ;;  %v464_v3 = vmul.f32 %v437_v62, %v416_v32 }
 0x125   :  { %v447_v5 = vadd.f32 %v516_v63, %v438_v0  ;;  %v448_v6 = vadd.f32 %v516_v63, %v439_v1  ;;  %v472_v7 = vadd.f32 %v516_v63, %v463_v2  ;;  %v473_v8 = vadd.f32 %v516_v63, %v464_v3 }
 0x127   :  { %v451_v9 = vmin.f32 %v447_v5, 0.0  ;;  %v452_v10 = vmin.f32 %v448_v6, 0.0  ;;  %v476_v11 = vmin.f32 %v472_v7, 0.0  ;;  %v477_v12 = vmin.f32 %v473_v8, 0.0 }
 0x128   :  { %vm449_vm4 = vcmp.gt.f32.partialorder %v447_v5, 0.0  ;;  %vm450_vm5 = vcmp.gt.f32.partialorder %v448_v6, 0.0  ;;  %vm474_vm6 = vcmp.gt.f32.partialorder %v472_v7, 0.0  ;;  %vm475_vm7 = vcmp.gt.f32.partialorder %v473_v8, 0.0 }
 0x129   :  { %v453_v4 = vmul.f32 1.442695, %v451_v9  ;;  %v455_v13 = vmul.f32 1.442695, %v452_v10  ;;  %v478_v14 = vmul.f32 1.442695, %v476_v11 }
 0x12a   :  { %v480_v15 = vmul.f32 1.442695, %v477_v12 }
 0x12b   :  { %600 = vpow2.f32 %v453_v4 }
 0x12c   :  { %602 = vpow2.f32 %v455_v13 }
 0x12d   :  { %604 = vpow2.f32 %v478_v14 }
 0x12e   :  { %606 = vpow2.f32 %v480_v15 }
 0x138   :  { %v601_v16 = vpop.eup %600 }
 0x139   :  { %v603_v17 = vpop.eup %602  ;;  %v517_v18 = vadd.f32 -1.0, %v601_v16 }
 0x13a   :  { %v605_v19 = vpop.eup %604  ;;  %v518_v20 = vadd.f32 -1.0, %v603_v17 }
 0x13b   :  { %v607_v21 = vpop.eup %606  ;;  %v459_v22 = vsel %vm449_vm4, %v447_v5, %v517_v18  ;;  %v520_v23 = vadd.f32 -1.0, %v605_v19 }
 0x13c   :  { %v460_v24 = vsel %vm450_vm5, %v448_v6, %v518_v20  ;;  %461 = vst.msk [vmem:[%s759_s5] sm:$0xff] %vm59_vm2, %v459_v22  ;;  %v521_v25 = vadd.f32 -1.0, %v607_v21 }
 0x13d   :  { %462 = vst.msk [vmem:[%s759_s5 + $0x8] sm:$0xff] %vm59_vm2, %v460_v24  ;;  %v484_v26 = vsel %vm474_vm6, %v472_v7, %v520_v23 }
 0x13e   :  { %v485_v27 = vsel %vm475_vm7, %v473_v8, %v521_v25  ;;  %522 = vst.msk [vmem:[%s759_s5 + $0x10] sm:$0xff] %vm59_vm2, %v484_v26 }
 0x13f   :  { %523 = vst.msk [vmem:[%s759_s5 + $0x18] sm:$0xff] %vm59_vm2, %v485_v27 }

// kernel: informer_stack_forward.10
= control target key start
LH: loop header
LB: loop body
LE: loop exit
PB: predicated region body
PF: predicated region fallthrough
CT: control target
= control target key end

     0   :  { %s560_s15 = smov 0   ;;  %s606_s0 = inlined_call_operand.vmem [shape: f32[2,16,4], index: 0, kind: input, shape index: {}]   ;;  %s607_s1 = inlined_call_operand.vmem [shape: bf16[3,4,32], index: 1, kind: input, shape index: {}]   ;;  %s608_s2 = inlined_call_operand.vmem [shape: f32[1,32], index: 2, kind: input, shape index: {}]   ;;  %s609_s3 = inlined_call_operand.vmem [shape: f32[2,16,32], index: 3, kind: input, shape index: {}]   ;;  %s610_s4 = inlined_call_operand.vmem [shape: f32[2,16,32], index: 4, kind: output, shape index: {}]  }
   0x1 LB: > { %s469_s16 = sadd.s32 4294967295, %s531_s15   ;;  %p473_p0 = scmp.ge.s32.totalorder %s531_s15, 1  ;;  %s531_s15 = sphi %s560_s15, %s14_s15  }
   0x2   : > { %p172_p1 = scmp.lt.s32.totalorder %s531_s15, 3 }
   0x4   : > { %p173_p2 = pnand %p473_p0, %p172_p1 }
   0x5   : > { %p203_p3 = scmp.lt.s32.totalorder (!%p173_p2), %s469_s16, 1 }
   0x6   : > { %176 = sbr.rel (%p173_p2) target bundleno = 230 (0xe6), region = 36 }
   0xb   : > { %v480_v0 = vld [vmem:[%s607_s1 + $0x2] sm:$0x3]  ;;  %vm243_vm0 = vcmask 1041408   ;;  %v224_v1 = vlaneseq  ;;  %v533_v2 = vmov 0.0   ;;  %vm534_vm1 = vmmov 0   ;;  %s612_s16 = smov (!%p203_p3, %s469_s16), 1 }
   0xc   : > { %497 = vmatprep.subr.bf16.mxu0 %v533_v2  ;;  %v245_v3 = vsel %vm243_vm0, %v480_v0, 0  ;;  %499 = vmatprep.mubr.msk.bf16.mxu0 %vm534_vm1, %v533_v2  ;;  %v234_v4 = vld [vmem:[%s607_s1] sm:$0x3]  ;;  %s577_s21 = sshll.u32 %s612_s16, 4  ;;  %v483_v7 = vld [vmem:[%s607_s1 + $0x4] sm:$0x3] }
   0xd   : > { %498 = vmatpush3.bf16.msra.mxu0 %v245_v3  ;;  %503 = vmatprep.subr.bf16.mxu1 %v533_v2  ;;  %v292_v5 = vsel %vm243_vm0, %v234_v4, 0  ;;  %v225_v6 = vshrl.u32 %v224_v1, 7  ;;  %s207_s24 = scalar_lea.vmem %s606_s0, %s577_s21  ;;  %vm239_vm2 = vcmask 31744   ;;  %v342_v15 = vsel %vm243_vm0, %v483_v7, 0  ;;  %s212_s29 = scalar_lea.vmem %s609_s3, %s577_s21  ;;  %v485_v30 = vld [vmem:[%s608_s2] ss:$0 sm:$0xff] }
   0xe   : > { %509 = vmatprep.subr.bf16.mxu0 %v533_v2  ;;  %504 = vmatpush3.bf16.msra.mxu1 %v292_v5  ;;  %v219_v8 = vld [vmem:[%s207_s24] sm:$0xff]  ;;  %v220_v9 = vld [vmem:[%s207_s24 + $0x8] sm:$0xff]  ;;  %s217_s8 = scalar_lea.vmem %s610_s4, %s577_s21  ;;  %vm399_vm5 = vcmask 261120  }
   0xf   : > { %505 = vmatprep.mubr.msk.bf16.mxu1 %vm534_vm1, %v533_v2  ;;  %vm226_vm3 = vcmp.lt.s32.totalorder %v225_v6, 1  ;;  %v222_v10 = vrot.slane %v219_v8, 7  ;;  %v223_v11 = vrot.slane %v220_v9, 7  ;;  %v229_v12 = vrot.slane %v219_v8, 1  ;;  %v395_v34 = vld [vmem:[%s212_s29] sm:$0xff]  ;;  %v396_v41 = vld [vmem:[%s212_s29 + $0x8] sm:$0xff] }
  0x10   : > { %v230_v13 = vrot.slane %v220_v9, 1  ;;  %v238_v14 = vpack.c.bf16 %v220_v9, %v219_v8  ;;  %vm231_vm4 = vcmp.lt.s32.totalorder %v225_v6, 7 }
  0x11   : > { %v227_v16 = vsel %vm226_vm3, %v222_v10, %v223_v11  ;;  %v228_v17 = vsel %vm226_vm3, %v223_v11, %v222_v10 }
  0x12   : > { %500 = vmatmul.mubr.msk.bf16.vlgmr.msra.gmra.mxu0 %vm239_vm2, %v238_v14  ;;  %v235_v18 = vpack.c.bf16 %v227_v16, %v228_v17  ;;  %v232_v19 = vsel %vm231_vm4, %v229_v12, %v230_v13  ;;  %v233_v20 = vsel %vm231_vm4, %v230_v13, %v229_v12 }
  0x13   : > { %510 = vmatpush3.bf16.msra.mxu0 %v342_v15  ;;  %511 = vmatprep.mubr.msk.bf16.mxu0 %vm534_vm1, %v533_v2  ;;  %v337_v21 = vpack.c.bf16 %v233_v20, %v232_v19 }
  0x14   : > { %506 = vmatmul.mubr.msk.bf16.vlgmr.msra.gmra.mxu1 %vm239_vm2, %v235_v18 }
  0x1a   : > { %512 = vmatmul.mubr.msk.bf16.vlgmr.msra.gmra.mxu0 %vm239_vm2, %v337_v21 }
  0xd2   : > { %v281_v22 = vpop.f32.mrf.mxu0 }
  0xd4   : > { %v501_v23 = vpop.f32.mrf.mxu0  ;;  %v328_v24 = vpop.f32.mrf.mxu1 }
  0xd5   : > { %v329_v29 = vadd.f32 %v328_v24, %v281_v22 }
  0xd6   : > { %v284_v25 = vpop.f32.mrf.mxu0  ;;  %v507_v26 = vpop.f32.mrf.mxu1 }
  0xd8   : > { %v502_v27 = vpop.f32.mrf.mxu0  ;;  %v331_v28 = vpop.f32.mrf.mxu1 }
  0xd9   : > { %v332_v36 = vadd.f32 %v331_v28, %v284_v25 }
  0xda   : > { %v378_v31 = vpop.f32.mrf.mxu0  ;;  %v508_v32 = vpop.f32.mrf.mxu1 }
  0xdb   : > { %v385_v33 = vadd.f32 %v378_v31, %v329_v29 }
  0xdc   : > { %v513_v35 = vpop.f32.mrf.mxu0 }
  0xdd   : > { %v393_v37 = vadd.f32 %v485_v30, %v385_v33 }
  0xde   : > { %v381_v38 = vpop.f32.mrf.mxu0 }
  0xdf   : > { %v397_v39 = vadd.f32 %v395_v34, %v393_v37  ;;  %v386_v40 = vadd.f32 %v381_v38, %v332_v36 }
  0xe0   : > { %v514_v42 = vpop.f32.mrf.mxu0 }
  0xe1   : > { %400 = vst.msk [vmem:[%s217_s8] sm:$0xff] %vm399_vm5, %v397_v39  ;;  %v394_v43 = vadd.f32 %v485_v30, %v386_v40 }
  0xe3   : > { %v398_v44 = vadd.f32 %v396_v41, %v394_v43 }
  0xe5   : > { %401 = vst.msk [vmem:[%s217_s8 + $0x8] sm:$0xff] %vm399_vm5, %v398_v44 }
  0xe6 PF: > { %s14_s15 = sadd.s32 1, %s531_s15  }
  0xe7   : > { %p11_p4 = scmp.ge.s32.totalorder %s14_s15, 4  }
  0xe9   :  { %13 = sbr.rel (!%p11_p4) target bundleno = 1 (0x1), region = 71 }

// kernel: informer_stack_forward.11
= control target key start
LH: loop header
LB: loop body
LE: loop exit
PB: predicated region body
PF: predicated region fallthrough
CT: control target
= control target key end

     0   :  { %s2041_s17 = smov 0   ;;  %s2043_s18 = smov 0   ;;  %s2307_s0 = inlined_call_operand.vmem [shape: f32[2,16,32], index: 0, kind: input, shape index: {}]   ;;  %s2308_s1 = inlined_call_operand.vmem [shape: bf16[4,32,32], index: 1, kind: input, shape index: {}]   ;;  %s2309_s2 = inlined_call_operand.vmem [shape: f32[4,1,32], index: 2, kind: input, shape index: {}]   ;;  %s2310_s3 = inlined_call_operand.vmem [shape: f32[1,32], index: 3, kind: input, shape index: {}]   ;;  %s2311_s4 = inlined_call_operand.vmem [shape: f32[1,32], index: 4, kind: input, shape index: {}]   ;;  %s2312_s5 = inlined_call_operand.vmem [shape: bf16[32,32], index: 5, kind: input, shape index: {}]   ;;  %s2313_s6 = inlined_call_operand.vmem [shape: f32[1,32], index: 6, kind: input, shape index: {}]   ;;  %s2314_s7 = inlined_call_operand.vmem [shape: bf16[32,32], index: 7, kind: input, shape index: {}]   ;;  %s2315_s8 = inlined_call_operand.vmem [shape: f32[1,32], index: 8, kind: input, shape index: {}]   ;;  %s2316_s9 = inlined_call_operand.vmem [shape: f32[1,32], index: 9, kind: input, shape index: {}]   ;;  %s2317_s10 = inlined_call_operand.vmem [shape: f32[1,32], index: 10, kind: input, shape index: {}]   ;;  %s2318_s11 = inlined_call_operand.vmem [shape: f32[2,16,32], index: 11, kind: output, shape index: {}]  }
   0x1   :  { %s2045_s19 = smov 0  }
   0x2 LB: > { %s33_s20 = sadd.s32 1, %s1970_s18  ;;  %p1657_p0 = scmp.ge.s32.totalorder %s1974_s19, 1  ;;  %s1974_s19 = sphi %s2045_s19, %s21_s19   ;;  %s1970_s18 = sphi %s2043_s18, %s2320_s18   ;;  %s1966_s17 = sphi %s2041_s17, %s2319_s17  }
   0x3   : > { %p35_p1 = scmp.ge.s32.totalorder %s33_s20, 2  ;;  %p351_p2 = scmp.lt.s32.totalorder %s1974_s19, 3 }
   0x5   : > { %s2322_s20 = smov (%p35_p1, %s33_s20), 0  ;;  %p352_p3 = pnand %p1657_p0, %p351_p2 }
   0x6   : > { %p395_p4 = scmp.lt.s32.totalorder (!%p352_p3), %s1966_s17, 1  ;;  %s1978_s22 = smov (!%p352_p3), 120  }
   0x7   : > { %355 = sbr.rel (%p352_p3) target bundleno = 3544 (0xdd8), region = 64  ;;  %s1979_s27 = smov (!%p352_p3), 112  }
   0x8   : > { %s1980_s16 = smov (!%p352_p3), 104  }
   0xc   : > { %v1898_v0 = vld [vmem:[%s2308_s1 + $0x18] sm:$0xff]   ;;  %v1976_v1 = vmov 0.0   ;;  %v1899_v2 = vld [vmem:[%s2308_s1 + $0x8] sm:$0xff]   ;;  %v1900_v3 = vld [vmem:[%s2308_s1 + $0x10] sm:$0xff]   ;;  %vm1977_vm0 = vmmov 0   ;;  %s2324_s17 = smov (!%p395_p4, %s1966_s17), 1 }
   0xd   : > { %1765 = vmatprep.subr.bf16.mxu1 %v1976_v1  ;;  %1757 = vmatprep.subr.bf16.mxu0 %v1976_v1  ;;  %v1901_v4 = vld [vmem:[%s2308_s1] sm:$0xff]   ;;  %s1716_s29 = sshll.u32 %s2324_s17, 4  ;;  %vm462_vm1 = vcmask 261120   ;;  %vm634_vm2 = vcmask 64512   ;;  %v1902_v27 = vld [vmem:[%s2308_s1 + $0x28] sm:$0xff]   ;;  %vm682_vm3 = vcmask 130048  }
   0xe   : > { %1766 = vmatpush3.bf16.msra.mxu1 %v1898_v0  ;;  %1769 = vmatprep.mubr.msk.bf16.mxu1 %vm1977_vm0, %v1976_v1  ;;  %s399_s13 = scalar_lea.vmem %s2307_s0, %s1716_s29  ;;  %v1677_v8 = vld [vmem:[%s2309_s2] ss:$0 sm:$0xff]  ;;  %v1681_v12 = vld [vmem:[%s2309_s2 + $0x1] ss:$0 sm:$0xff]  ;;  %v1685_v50 = vld [vmem:[%s2309_s2 + $0x2] ss:$0 sm:$0xff]  ;;  %s408_s21 = scalar_lea.vmem %s2318_s11, %s1716_s29 }
   0xf   : > { %1758 = vmatpush3.bf16.msra.mxu0 %v1899_v2  ;;  %1767 = vmatprep.subr.bf16.mxu1 %v1976_v1  ;;  %v2088_v5 = vld [vmem:[%s399_s13] sm:$0xff]  ;;  %v2090_v6 = vld [vmem:[%s399_s13 + $0x8] sm:$0xff]  ;;  %vm879_vm4 = vcmask 1043456  }
  0x10   : > { %1759 = vmatprep.subr.bf16.mxu0 %v1976_v1  ;;  %1761 = vmatprep.mubr.msk.bf16.mxu0 %vm1977_vm0, %v1976_v1  ;;  %v509_v7 = vpack.c.bf16 %v2090_v6, %v2088_v5  ;;  %v1903_v28 = vld [vmem:[%s2308_s1 + $0x20] sm:$0xff]  }
  0x12   : > { %1768 = vmatpush3.bf16.msra.mxu1 %v1900_v3 }
  0x13   : > { %1760 = vmatpush3.bf16.msra.mxu0 %v1901_v4  ;;  %1781 = vmatprep.subr.bf16.mxu1 %v1976_v1 }
  0x14   : > { %1773 = vmatprep.subr.bf16.mxu0 %v1976_v1 }
  0x15   : > { %1770 = vmatmul.mubr.msk.bf16.vlgmr.msra.gmra.mxu1 %vm462_vm1, %v509_v7 }
  0x16   : > { %1762 = vmatmul.mubr.msk.bf16.vlgmr.msra.gmra.mxu0 %vm462_vm1, %v509_v7  ;;  %1783 = vmatprep.mubr.msk.bf16.mxu1 %vm1977_vm0, %v1976_v1 }
  0x17   : > { %1777 = vmatprep.mubr.msk.bf16.mxu0 %vm1977_vm0, %v1976_v1  ;;  %1774 = vmatpush3.bf16.msra.mxu0 %v1902_v27 }
  0x18   : > { %1775 = vmatprep.subr.bf16.mxu0 %v1976_v1 }
  0x1b   : > { %1776 = vmatpush3.bf16.msra.mxu0 %v1903_v28 }
  0x1c   : > { %1787 = vmatprep.subr.bf16.mxu0 %v1976_v1 }
  0x1e   : > { %1778 = vmatmul.mubr.msk.bf16.vlgmr.msra.gmra.mxu0 %vm462_vm1, %v509_v7 }
  0x1f   : > { %1789 = vmatprep.mubr.msk.bf16.mxu0 %vm1977_vm0, %v1976_v1 }
  0xd5   : > { %v565_v9 = vpop.f32.mrf.mxu1 }
  0xd6   : > { %v500_v10 = vpop.f32.mrf.mxu0  ;;  %v566_v17 = vadd.f32 %v1681_v12, %v565_v9 }
  0xd7   : > { %v501_v11 = vadd.f32 %v1677_v8, %v500_v10  ;;  %v1771_v13 = vpop.f32.mrf.mxu1 }
  0xd8   : > { %v1763_v14 = vpop.f32.mrf.mxu0 }
  0xd9   : > { %v568_v15 = vpop.f32.mrf.mxu1  ;;  %v507_v18 = vmul.f32 0.35355338, %v501_v11 }
  0xda   : > { %v503_v16 = vpop.f32.mrf.mxu0  ;;  %v569_v19 = vadd.f32 %v1681_v12, %v568_v15 }
  0xdb   : > { %v504_v20 = vadd.f32 %v1677_v8, %v503_v16  ;;  %v1772_v21 = vpop.f32.mrf.mxu1 }
  0xdc   : > { %v1764_v22 = vpop.f32.mrf.mxu0  ;;  %v2107_v23 = vpack.c.bf16 %v569_v19, %v566_v17 }
  0xdd   : > { %v508_v24 = vmul.f32 0.35355338, %v504_v20 }
  0xde   : > { %755 = vrot.lane.b32.xlu0 %v2107_v23, %s1978_s22  ;;  %v639_v26 = vsel %vm634_vm2, %v2107_v23, 0  ;;  %v624_v51 = vpop.f32.mrf.mxu0 }
  0xdf   : > { %v2109_v25 = vpack.c.bf16 %v508_v24, %v507_v18  ;;  %1782 = vmatpush3.bf16.xpose.msra.mxu1 %v639_v26  ;;  %v625_v53 = vadd.f32 %v1685_v50, %v624_v51  ;;  %v1670_v24 = vld [vmem:[%s2308_s1 + $0x30] sm:$0xf] }
  0xe0   : > { %1793 = vmatprep.subr.bf16.mxu1 %v1976_v1  ;;  %v1779_v52 = vpop.f32.mrf.mxu0 }
  0xe2   : > { %752 = vrot.lane.b32.xlu0 %v2109_v25, %s1978_s22  ;;  %v627_v54 = vpop.f32.mrf.mxu0 }
  0xe3   : > { %v628_v55 = vadd.f32 %v1685_v50, %v627_v54 }
  0xe4   : > { %v1780_v56 = vpop.f32.mrf.mxu0 }
  0xe5   : > { %v2147_v58 = vpack.c.bf16 %v628_v55, %v625_v53 }
  0xe6   : > { %1784 = vmatmul.mubr.msk.bf16.vlgmr.msra.gmra.mxu1 %vm634_vm2, %v2109_v25 }
  0xe7   : > { %1795 = vmatprep.mubr.msk.bf16.mxu1 %vm1977_vm0, %v1976_v1  ;;  %1788 = vmatpush3.bf16.msra.mxu0 %v2147_v58 }
  0xe8   : > { %1799 = vmatprep.subr.bf16.mxu0 %v1976_v1 }
 0x150   : > { %v756_v29 = vpop.permute.xlu0 %755 }
 0x151   : > { %v761_v30 = vsel %vm634_vm2, %v756_v29, 0  ;;  %v928_v29 = vsel %vm879_vm4, %v1670_v24, 0 }
 0x152   : > { %1794 = vmatpush3.bf16.xpose.msra.mxu1 %v761_v30  ;;  %v1671_v30 = vld [vmem:[%s2308_s1 + $0x34] sm:$0xf] }
 0x153   : > { %1805 = vmatprep.subr.bf16.mxu1 %v1976_v1 }
 0x154   : > { %v753_v31 = vpop.permute.xlu0 %752 }
 0x159   : > { %1796 = vmatmul.mubr.msk.bf16.vlgmr.msra.gmra.mxu1 %vm634_vm2, %v753_v31  ;;  %v881_v31 = vsel %vm879_vm4, %v1671_v30, 0 }
 0x15a   : > { %1807 = vmatprep.mubr.msk.bf16.mxu1 %vm1977_vm0, %v1976_v1  ;;  %1806 = vmatpush3.bf16.msra.mxu1 %v881_v31 }
 0x15b   : > { %1817 = vmatprep.subr.bf16.mxu1 %v1976_v1 }
 0x1a6   : > { %v675_v32 = vpop.f32.mrf.mxu1 }
 0x1a7   : > { %v683_v33 = vsel %vm682_vm3, %v675_v32, -inf }
 0x1a8   : > { %684 = vmax.xlane.f32.xlu1 %v683_v33  ;;  %v1785_v34 = vpop.f32.mrf.mxu1 }
 0x1aa   : > { %v678_v35 = vpop.f32.mrf.mxu1 }
 0x1ab   : > { %v686_v36 = vsel %vm682_vm3, %v678_v35, -inf }
 0x1ac   : > { %687 = vmax.xlane.f32.xlu1 %v686_v36  ;;  %v1786_v37 = vpop.f32.mrf.mxu1 }
 0x219   : > { %v797_v38 = vpop.f32.mrf.mxu1 }
 0x21a   : > { %v804_v39 = vsel %vm682_vm3, %v797_v38, -inf }
 0x21b   : > { %805 = vmax.xlane.f32.xlu0 %v804_v39  ;;  %v1797_v40 = vpop.f32.mrf.mxu1 }
 0x21d   : > { %v800_v41 = vpop.f32.mrf.mxu1 }
 0x21e   : > { %v807_v42 = vsel %vm682_vm3, %v800_v41, -inf }
 0x21f   : > { %808 = vmax.xlane.f32.xlu1 %v807_v42  ;;  %v1798_v43 = vpop.f32.mrf.mxu1 }
 0x231   : > { %v685_v44 = vpop.xlane.xlu1 %684  ;;  %973 = vrot.lane.b32.xlu0 %v2107_v23, %s1979_s27 }
 0x232   : > { %v689_v45 = vsub.f32 %v675_v32, %v685_v44 }
 0x234   : > { %v691_v46 = vmul.f32 1.442695, %v689_v45 }
 0x235   : > { %v688_v47 = vpop.xlane.xlu1 %687 }
 0x236   : > { %1908 = vpow2.f32 %v691_v46  ;;  %v690_v48 = vsub.f32 %v678_v35, %v688_v47 }
 0x238   : > { %v693_v49 = vmul.f32 1.442695, %v690_v48 }
 0x23a   : > { %1910 = vpow2.f32 %v693_v49 }
 0x243   : > { %v1909_v57 = vpop.eup %1908 }
 0x244   : > { %v695_v59 = vsel %vm682_vm3, %v1909_v57, 0.0 }
 0x245   : > { %696 = vadd.xlane.f32.xlu1 %v695_v59 }
 0x247   : > { %v1911_v60 = vpop.eup %1910 }
 0x248   : > { %v698_v61 = vsel %vm682_vm3, %v1911_v60, 0.0 }
 0x249   : > { %699 = vadd.xlane.f32.xlu1 %v698_v61 }
 0x2a4   : > { %v806_v62 = vpop.xlane.xlu0 %805 }
 0x2a5   : > { %v810_v63 = vsub.f32 %v797_v38, %v806_v62 }
 0x2a7   : > { %v812_v0 = vmul.f32 1.442695, %v810_v63 }
 0x2a8   : > { %v809_v2 = vpop.xlane.xlu1 %808  ;;  %v974_v39 = vpop.permute.xlu0 %973 }
 0x2a9   : > { %1912 = vpow2.f32 %v812_v0  ;;  %v811_v3 = vsub.f32 %v800_v41, %v809_v2  ;;  %v979_v43 = vsel %vm634_vm2, %v974_v39, 0 }
 0x2ab   : > { %v814_v4 = vmul.f32 1.442695, %v811_v3 }
 0x2ad   : > { %1914 = vpow2.f32 %v814_v4 }
 0x2b6   : > { %v1913_v7 = vpop.eup %1912 }
 0x2b7   : > { %v816_v8 = vsel %vm682_vm3, %v1913_v7, 0.0 }
 0x2b8   : > { %817 = vadd.xlane.f32.xlu1 %v816_v8 }
 0x2ba   : > { %v1915_v9 = vpop.eup %1914 }
 0x2bb   : > { %v819_v10 = vsel %vm682_vm3, %v1915_v9, 0.0 }
 0x2bc   : > { %820 = vadd.xlane.f32.xlu1 %v819_v10 }
 0x2cd   : > { %828 = vrot.lane.b32.xlu1 %v2147_v58, %s1978_s22 }
 0x2ce   : > { %v697_v11 = vpop.xlane.xlu1 %696 }
 0x2cf   : > { %1916 = vrcp.f32 %v697_v11 }
 0x2d1   : > { %971 = vrot.lane.b32.xlu1 %v2109_v25, %s1979_s27 }
 0x2d2   : > { %v700_v12 = vpop.xlane.xlu1 %699 }
 0x2d3   : > { %1918 = vrcp.f32 %v700_v12 }
 0x2dc   : > { %v1917_v13 = vpop.eup %1916 }
 0x2dd   : > { %v703_v15 = vmul.f32 %v1917_v13, %v1909_v57 }
 0x2e0   : > { %v1919_v14 = vpop.eup %1918 }
 0x2e1   : > { %v704_v16 = vmul.f32 %v1919_v14, %v1911_v60 }
 0x2e3   : > { %v705_v17 = vpack.c.bf16 %v704_v16, %v703_v15 }
 0x2e5   : > { %1790 = vmatmul.mubr.msk.bf16.vlgmr.msra.gmra.mxu0 %vm682_vm3, %v705_v17 }
 0x2e6   : > { %1801 = vmatprep.mubr.msk.bf16.mxu0 %vm1977_vm0, %v1976_v1 }
 0x341   : > { %v818_v18 = vpop.xlane.xlu1 %817 }
 0x342   : > { %1920 = vrcp.f32 %v818_v18 }
 0x345   : > { %v821_v19 = vpop.xlane.xlu1 %820 }
 0x346   : > { %1922 = vrcp.f32 %v821_v19 }
 0x349   : > { %v829_v20 = vpop.permute.xlu1 %828 }
 0x34a   : > { %1800 = vmatpush3.bf16.msra.mxu0 %v829_v20 }
 0x34b   : > { %1811 = vmatprep.subr.bf16.mxu0 %v1976_v1 }
 0x34d   : > { %v972_v44 = vpop.permute.xlu1 %971 }
 0x34f   : > { %v1921_v21 = vpop.eup %1920 }
 0x350   : > { %v824_v26 = vmul.f32 %v1921_v21, %v1913_v7 }
 0x353   : > { %v1923_v22 = vpop.eup %1922 }
 0x354   : > { %v825_v27 = vmul.f32 %v1923_v22, %v1915_v9 }
 0x356   : > { %v826_v28 = vpack.c.bf16 %v825_v27, %v824_v26 }
 0x358   : > { %1802 = vmatmul.mubr.msk.bf16.vlgmr.msra.gmra.mxu0 %vm682_vm3, %v826_v28 }
 0x359   : > { %1812 = vmatpush3.bf16.msra.mxu0 %v928_v29  ;;  %1813 = vmatprep.mubr.msk.bf16.mxu0 %vm1977_vm0, %v1976_v1 }
 0x35a   : > { %1823 = vmatprep.subr.bf16.mxu0 %v1976_v1 }
 0x3a5   : > { %v743_v32 = vpop.f32.mrf.mxu0 }
 0x3a7   : > { %v1791_v33 = vpop.f32.mrf.mxu0 }
 0x3a9   : > { %v746_v34 = vpop.f32.mrf.mxu0 }
 0x3aa   : > { %v750_v35 = vpack.c.bf16 %v746_v34, %v743_v32 }
 0x3ab   : > { %v1792_v36 = vpop.f32.mrf.mxu0 }
 0x3ac   : > { %1814 = vmatmul.mubr.msk.bf16.vlgmr.msra.gmra.mxu0 %vm634_vm2, %v750_v35 }
 0x3ad   : > { %1825 = vmatprep.mubr.msk.bf16.mxu0 %vm1977_vm0, %v1976_v1 }
 0x418   : > { %v868_v37 = vpop.f32.mrf.mxu0 }
 0x41a   : > { %v1803_v38 = vpop.f32.mrf.mxu0 }
 0x41c   : > { %v871_v40 = vpop.f32.mrf.mxu0 }
 0x41d   : > { %v875_v41 = vpack.c.bf16 %v871_v40, %v868_v37 }
 0x41e   : > { %v1804_v42 = vpop.f32.mrf.mxu0 }
 0x41f   : > { %1808 = vmatmul.mubr.msk.bf16.vlgmr.msra.gmra.mxu1 %vm634_vm2, %v875_v41 }
 0x420   : > { %1818 = vmatpush3.bf16.xpose.msra.mxu1 %v979_v43  ;;  %1819 = vmatprep.mubr.msk.bf16.mxu1 %vm1977_vm0, %v1976_v1 }
 0x421   : > { %1829 = vmatprep.subr.bf16.mxu1 %v1976_v1 }
 0x427   : > { %1820 = vmatmul.mubr.msk.bf16.vlgmr.msra.gmra.mxu1 %vm634_vm2, %v972_v44 }
 0x428   : > { %1831 = vmatprep.mubr.msk.bf16.mxu1 %vm1977_vm0, %v1976_v1 }
 0x46c   : > { %v2187_v45 = vpop.f32.mrf.mxu0 }
 0x46e   : > { %v1815_v46 = vpop.f32.mrf.mxu0 }
 0x470   : > { %v2189_v47 = vpop.f32.mrf.mxu0 }
 0x472   : > { %v1816_v48 = vpop.f32.mrf.mxu0 }
 0x4df   : > { %v2191_v49 = vpop.f32.mrf.mxu1 }
 0x4e1   : > { %v1809_v50 = vpop.f32.mrf.mxu1 }
 0x4e3   : > { %v2193_v51 = vpop.f32.mrf.mxu1 }
 0x4e4   : > { %v968_v50 = vadd.f32 %v2189_v47, %v2193_v51 }
 0x4e5   : > { %v1810_v52 = vpop.f32.mrf.mxu1 }
 0x4e7   : > { %v1015_v53 = vpop.f32.mrf.mxu1 }
 0x4e8   : > { %v1022_v54 = vsel %vm682_vm3, %v1015_v53, -inf }
 0x4e9   : > { %1023 = vmax.xlane.f32.xlu1 %v1022_v54  ;;  %v1821_v55 = vpop.f32.mrf.mxu1 }
 0x4eb   : > { %v1018_v56 = vpop.f32.mrf.mxu1 }
 0x4ec   : > { %v1025_v57 = vsel %vm682_vm3, %v1018_v56, -inf }
 0x4ed   : > { %1026 = vmax.xlane.f32.xlu0 %v1025_v57  ;;  %v1822_v59 = vpop.f32.mrf.mxu1 }
 0x503   : > { %1045 = vrot.lane.b32.xlu0 %v2147_v58, %s1979_s27 }
 0x572   : > { %v1024_v60 = vpop.xlane.xlu1 %1023 }
 0x573   : > { %v1028_v61 = vsub.f32 %v1015_v53, %v1024_v60 }
 0x575   : > { %v1030_v62 = vmul.f32 1.442695, %v1028_v61 }
 0x576   : > { %v1027_v63 = vpop.xlane.xlu0 %1026 }
 0x577   : > { %1924 = vpow2.f32 %v1030_v62  ;;  %v1029_v0 = vsub.f32 %v1018_v56, %v1027_v63 }
 0x579   : > { %v1032_v2 = vmul.f32 1.442695, %v1029_v0 }
 0x57a   : > { %v1046_v3 = vpop.permute.xlu0 %1045 }
 0x57b   : > { %1926 = vpow2.f32 %v1032_v2  ;;  %1824 = vmatpush3.bf16.msra.mxu0 %v1046_v3  ;;  %v1701_v3 = vld [vmem:[%s2309_s2 + $0x3] ss:$0 sm:$0xff] }
 0x57c   : > { %1835 = vmatprep.subr.bf16.mxu0 %v1976_v1 }
 0x584   : > { %v1925_v4 = vpop.eup %1924 }
 0x585   : > { %v1034_v7 = vsel %vm682_vm3, %v1925_v4, 0.0 }
 0x586   : > { %1035 = vadd.xlane.f32.xlu1 %v1034_v7 }
 0x588   : > { %v1927_v8 = vpop.eup %1926 }
 0x589   : > { %v1037_v9 = vsel %vm682_vm3, %v1927_v8, 0.0 }
 0x58a   : > { %1038 = vadd.xlane.f32.xlu1 %v1037_v9 }
 0x59b   : > { %1144 = vrot.lane.b32.xlu1 %v2107_v23, %s1980_s16 }
 0x59f   : > { %1142 = vrot.lane.b32.xlu1 %v2109_v25, %s1980_s16  ;;  %v1672_v25 = vld [vmem:[%s2308_s1 + $0x38] sm:$0xf] }
 0x5a0   : > { %v1097_v19 = vsel %vm879_vm4, %v1672_v25, 0 }
 0x5a1   : > { %1830 = vmatpush3.bf16.msra.mxu1 %v1097_v19 }
 0x5a2   : > { %1841 = vmatprep.subr.bf16.mxu1 %v1976_v1 }
 0x60f   : > { %v1036_v10 = vpop.xlane.xlu1 %1035 }
 0x610   : > { %1928 = vrcp.f32 %v1036_v10 }
 0x613   : > { %v1039_v11 = vpop.xlane.xlu1 %1038 }
 0x614   : > { %1930 = vrcp.f32 %v1039_v11 }
 0x617   : > { %v1145_v16 = vpop.permute.xlu1 %1144 }
 0x618   : > { %v1150_v18 = vsel %vm634_vm2, %v1145_v16, 0 }
 0x61b   : > { %v1143_v23 = vpop.permute.xlu1 %1142 }
 0x61d   : > { %v1929_v12 = vpop.eup %1928 }
 0x61e   : > { %v1042_v14 = vmul.f32 %v1929_v12, %v1925_v4 }
 0x621   : > { %v1931_v13 = vpop.eup %1930 }
 0x622   : > { %v1043_v15 = vmul.f32 %v1931_v13, %v1927_v8 }
 0x624   : > { %v1044_v17 = vpack.c.bf16 %v1043_v15, %v1042_v14 }
 0x626   : > { %1826 = vmatmul.mubr.msk.bf16.vlgmr.msra.gmra.mxu0 %vm682_vm3, %v1044_v17 }
 0x627   : > { %1836 = vmatpush3.bf16.xpose.msra.mxu0 %v1150_v18  ;;  %1837 = vmatprep.mubr.msk.bf16.mxu0 %vm1977_vm0, %v1976_v1 }
 0x628   : > { %1847 = vmatprep.subr.bf16.mxu0 %v1976_v1 }
 0x62e   : > { %1838 = vmatmul.mubr.msk.bf16.vlgmr.msra.gmra.mxu0 %vm634_vm2, %v1143_v23 }
 0x62f   : > { %1849 = vmatprep.mubr.msk.bf16.mxu0 %vm1977_vm0, %v1976_v1 }
 0x6e6   : > { %v1085_v20 = vpop.f32.mrf.mxu0 }
 0x6e8   : > { %v1827_v21 = vpop.f32.mrf.mxu0 }
 0x6ea   : > { %v1088_v22 = vpop.f32.mrf.mxu0 }
 0x6eb   : > { %v1092_v24 = vpack.c.bf16 %v1088_v22, %v1085_v20 }
 0x6ec   : > { %v1828_v26 = vpop.f32.mrf.mxu0 }
 0x6ed   : > { %1832 = vmatmul.mubr.msk.bf16.vlgmr.msra.gmra.mxu1 %vm634_vm2, %v1092_v24 }
 0x6ee   : > { %v1186_v27 = vpop.f32.mrf.mxu0  ;;  %1843 = vmatprep.mubr.msk.bf16.mxu1 %vm1977_vm0, %v1976_v1 }
 0x6ef   : > { %v1193_v28 = vsel %vm682_vm3, %v1186_v27, -inf }
 0x6f0   : > { %1194 = vmax.xlane.f32.xlu0 %v1193_v28  ;;  %v1839_v29 = vpop.f32.mrf.mxu0 }
 0x6f2   : > { %v1189_v30 = vpop.f32.mrf.mxu0 }
 0x6f3   : > { %v1196_v31 = vsel %vm682_vm3, %v1189_v30, -inf }
 0x6f4   : > { %1197 = vmax.xlane.f32.xlu1 %v1196_v31  ;;  %v1840_v32 = vpop.f32.mrf.mxu0 }
 0x705   : > { %1216 = vrot.lane.b32.xlu1 %v2147_v58, %s1980_s16  ;;  %v965_v58 = vadd.f32 %v2187_v45, %v2191_v49  ;;  %v1673_v45 = vld [vmem:[%s2308_s1 + $0x3c] sm:$0xf] }
 0x706   : > { %v1268_v47 = vsel %vm879_vm4, %v1673_v45, 0 }
 0x707   : > { %1848 = vmatpush3.bf16.msra.mxu0 %v1268_v47 }
 0x708   : > { %1861 = vmatprep.subr.bf16.mxu0 %v1976_v1 }
 0x779   : > { %v1195_v33 = vpop.xlane.xlu0 %1194 }
 0x77a   : > { %v1199_v34 = vsub.f32 %v1186_v27, %v1195_v33  ;;  %v1905_v27 = vld [vmem:[%s2312_s5] sm:$0xff]  }
 0x77c   : > { %v1201_v35 = vmul.f32 1.442695, %v1199_v34 }
 0x77d   : > { %v1198_v36 = vpop.xlane.xlu1 %1197 }
 0x77e   : > { %1932 = vpow2.f32 %v1201_v35  ;;  %v1200_v37 = vsub.f32 %v1189_v30, %v1198_v36  ;;  %v1702_v36 = vld [vmem:[%s2310_s3] ss:$0 sm:$0xff] }
 0x780   : > { %v1203_v38 = vmul.f32 1.442695, %v1200_v37 }
 0x781   : > { %v1217_v39 = vpop.permute.xlu1 %1216 }
 0x782   : > { %1934 = vpow2.f32 %v1203_v38  ;;  %1842 = vmatpush3.bf16.msra.mxu1 %v1217_v39 }
 0x783   : > { %1853 = vmatprep.subr.bf16.mxu1 %v1976_v1 }
 0x78b   : > { %v1933_v40 = vpop.eup %1932 }
 0x78c   : > { %v1205_v41 = vsel %vm682_vm3, %v1933_v40, 0.0 }
 0x78d   : > { %1206 = vadd.xlane.f32.xlu0 %v1205_v41 }
 0x78f   : > { %v1935_v42 = vpop.eup %1934 }
 0x790   : > { %v1208_v43 = vsel %vm682_vm3, %v1935_v42, 0.0 }
 0x791   : > { %1209 = vadd.xlane.f32.xlu0 %v1208_v43 }
 0x7ad   : > { %v1133_v44 = vpop.f32.mrf.mxu1 }
 0x7ae   : > { %v1140_v46 = vadd.f32 %v1133_v44, %v965_v58  ;;  %v1906_v44 = vld [vmem:[%s2314_s7 + $0x8] sm:$0xff]  }
 0x7af   : > { %v1833_v48 = vpop.f32.mrf.mxu1 }
 0x7b0   : > { %v1704_v48 = vld [vmem:[%s2313_s6] ss:$0 sm:$0xff] }
 0x7b1   : > { %v1136_v52 = vpop.f32.mrf.mxu1 }
 0x7b2   : > { %v1141_v53 = vadd.f32 %v1136_v52, %v968_v50 }
 0x7b3   : > { %v1834_v54 = vpop.f32.mrf.mxu1 }
 0x816   : > { %v1207_v55 = vpop.xlane.xlu0 %1206 }
 0x817   : > { %1936 = vrcp.f32 %v1207_v55 }
 0x81a   : > { %v1210_v56 = vpop.xlane.xlu0 %1209 }
 0x81b   : > { %1938 = vrcp.f32 %v1210_v56 }
 0x824   : > { %v1937_v57 = vpop.eup %1936 }
 0x825   : > { %v1213_v60 = vmul.f32 %v1937_v57, %v1933_v40  ;;  %v1703_v40 = vld [vmem:[%s2311_s4] ss:$0 sm:$0xff] }
 0x828   : > { %v1939_v59 = vpop.eup %1938 }
 0x829   : > { %v1214_v61 = vmul.f32 %v1939_v59, %v1935_v42 }
 0x82b   : > { %v1215_v62 = vpack.c.bf16 %v1214_v61, %v1213_v60 }
 0x82d   : > { %1844 = vmatmul.mubr.msk.bf16.vlgmr.msra.gmra.mxu1 %vm682_vm3, %v1215_v62 }
 0x82e   : > { %1857 = vmatprep.mubr.msk.bf16.mxu1 %vm1977_vm0, %v1976_v1 }
 0x8ed   : > { %v1256_v49 = vpop.f32.mrf.mxu1 }
 0x8ef   : > { %v1845_v51 = vpop.f32.mrf.mxu1 }
 0x8f1   : > { %v1259_v63 = vpop.f32.mrf.mxu1 }
 0x8f2   : > { %v1263_v0 = vpack.c.bf16 %v1259_v63, %v1256_v49 }
 0x8f3   : > { %v1846_v2 = vpop.f32.mrf.mxu1 }
 0x8f4   : > { %1850 = vmatmul.mubr.msk.bf16.vlgmr.msra.gmra.mxu0 %vm634_vm2, %v1263_v0 }
 0x8f5   : > { %1865 = vmatprep.mubr.msk.bf16.mxu0 %vm1977_vm0, %v1976_v1  ;;  %1862 = vmatpush3.bf16.msra.mxu0 %v1906_v44 }
 0x8f6   : > { %1863 = vmatprep.subr.bf16.mxu0 %v1976_v1 }
 0x9b4   : > { %v1304_v4 = vpop.f32.mrf.mxu0 }
 0x9b5   : > { %v1311_v7 = vadd.f32 %v1304_v4, %v1140_v46  ;;  %v1907_v46 = vld [vmem:[%s2314_s7] sm:$0xff]  }
 0x9b6   : > { %v1851_v8 = vpop.f32.mrf.mxu0  ;;  %1864 = vmatpush3.bf16.msra.mxu0 %v1907_v46 }
 0x9b7   : > { %v1319_v9 = vadd.f32 %v1701_v3, %v1311_v7 }
 0x9b8   : > { %v1307_v10 = vpop.f32.mrf.mxu0 }
 0x9b9   : > { %v1312_v11 = vadd.f32 %v1307_v10, %v1141_v53  ;;  %v1321_v12 = vadd.f32 %v1319_v9, %v2088_v5 }
 0x9ba   : > { %v1852_v13 = vpop.f32.mrf.mxu0 }
 0x9bb   : > { %v1320_v14 = vadd.f32 %v1701_v3, %v1312_v11  ;;  %v1325_v15 = vsel %vm462_vm1, %v1321_v12, 0.0  ;;  %v1708_v11 = vld [vmem:[%s2315_s8] ss:$0 sm:$0xff] }
 0x9bc   : > { %1326 = vadd.xlane.f32.xlu0 %v1325_v15 }
 0x9bd   : > { %v1322_v16 = vadd.f32 %v1320_v14, %v2090_v6  ;;  %v1904_v6 = vld [vmem:[%s2312_s5 + $0x8] sm:$0xff]  }
 0x9be   : > { %1854 = vmatpush3.bf16.msra.mxu1 %v1904_v6 }
 0x9bf   : > { %v1328_v17 = vsel %vm462_vm1, %v1322_v16, 0.0  ;;  %1855 = vmatprep.subr.bf16.mxu1 %v1976_v1 }
 0x9c0   : > { %1329 = vadd.xlane.f32.xlu0 %v1328_v17 }
 0x9c2   : > { %1856 = vmatpush3.bf16.msra.mxu1 %v1905_v27 }
 0xa45   : > { %v1327_v18 = vpop.xlane.xlu0 %1326 }
 0xa46   : > { %v1332_v23 = vmul.f32 0.03125, %v1327_v18 }
 0xa48   : > { %v1334_v25 = vsub.f32 %v1321_v12, %v1332_v23 }
 0xa49   : > { %v1330_v19 = vpop.xlane.xlu0 %1329 }
 0xa4a   : > { %v1333_v20 = vmul.f32 0.03125, %v1330_v19  ;;  %v1336_v21 = vmul.f32 %v1334_v25, %v1334_v25 }
 0xa4c   : > { %v1335_v22 = vsub.f32 %v1322_v16, %v1333_v20  ;;  %v1338_v24 = vsel %vm462_vm1, %v1336_v21, 0.0 }
 0xa4d   : > { %1339 = vadd.xlane.f32.xlu0 %v1338_v24 }
 0xa4e   : > { %v1337_v5 = vmul.f32 %v1335_v22, %v1335_v22 }
 0xa50   : > { %v1341_v26 = vsel %vm462_vm1, %v1337_v5, 0.0 }
 0xa51   : > { %1342 = vadd.xlane.f32.xlu0 %v1341_v26 }
 0xad6   : > { %v1340_v28 = vpop.xlane.xlu0 %1339 }
 0xad7   : > { %v1344_v29 = vmul.f32 0.03125, %v1340_v28 }
 0xad9   : > { %v1346_v30 = vadd.f32 1e-05, %v1344_v29 }
 0xada   : > { %v1343_v31 = vpop.xlane.xlu0 %1342 }
 0xadb   : > { %1940 = vrsqrt.f32 %v1346_v30  ;;  %v1345_v32 = vmul.f32 0.03125, %v1343_v31 }
 0xadd   : > { %v1347_v33 = vadd.f32 1e-05, %v1345_v32 }
 0xadf   : > { %1942 = vrsqrt.f32 %v1347_v33 }
 0xae8   : > { %v1941_v34 = vpop.eup %1940 }
 0xae9   : > { %v1350_v35 = vmul.f32 %v1941_v34, %v1334_v25 }
 0xaeb   : > { %v1358_v39 = vmul.f32 %v1702_v36, %v1350_v35 }
 0xaec   : > { %v1943_v37 = vpop.eup %1942 }
 0xaed   : > { %v1351_v38 = vmul.f32 %v1943_v37, %v1335_v22  ;;  %v1366_v42 = vadd.f32 %v1703_v40, %v1358_v39  ;;  %v1712_v37 = vld [vmem:[%s2316_s9] ss:$0 sm:$0xff] }
 0xaee   : > { %v1713_v39 = vld [vmem:[%s2317_s10] ss:$0 sm:$0xff] }
 0xaef   : > { %v1359_v41 = vmul.f32 %v1702_v36, %v1351_v38 }
 0xaf1   : > { %v1367_v43 = vadd.f32 %v1703_v40, %v1359_v41 }
 0xaf3   : > { %v1372_v58 = vpack.c.bf16 %v1367_v43, %v1366_v42 }
 0xaf5   : > { %1858 = vmatmul.mubr.msk.bf16.vlgmr.msra.gmra.mxu1 %vm462_vm1, %v1372_v58 }
 0xbb5   : > { %v1429_v50 = vpop.f32.mrf.mxu1 }
 0xbb6   : > { %v1430_v52 = vadd.f32 %v1704_v48, %v1429_v50 }
 0xbb7   : > { %v1859_v53 = vpop.f32.mrf.mxu1 }
 0xbb8   : > { %v1438_v54 = vmul.f32 0.044715, %v1430_v52  ;;  %v1436_v3 = vmul.f32 0.5, %v1430_v52 }
 0xbb9   : > { %v1432_v55 = vpop.f32.mrf.mxu1 }
 0xbba   : > { %v1440_v56 = vmul.f32 %v1438_v54, %v1430_v52  ;;  %v1433_v57 = vadd.f32 %v1704_v48, %v1432_v55 }
 0xbbb   : > { %v1860_v59 = vpop.f32.mrf.mxu1 }
 0xbbc   : > { %v1442_v60 = vmul.f32 %v1440_v56, %v1430_v52  ;;  %v1439_v61 = vmul.f32 0.044715, %v1433_v57  ;;  %v1437_v4 = vmul.f32 0.5, %v1433_v57 }
 0xbbe   : > { %v1444_v62 = vadd.f32 %v1442_v60, %v1430_v52  ;;  %v1441_v45 = vmul.f32 %v1439_v61, %v1433_v57 }
 0xbc0   : > { %v1446_v47 = vmul.f32 0.7978846, %v1444_v62  ;;  %v1443_v49 = vmul.f32 %v1441_v45, %v1433_v57 }
 0xbc2   : > { %1944 = vtanh.f32 %v1446_v47  ;;  %v1445_v1 = vadd.f32 %v1443_v49, %v1433_v57 }
 0xbc4   : > { %v1447_v51 = vmul.f32 0.7978846, %v1445_v1 }
 0xbc6   : > { %1946 = vtanh.f32 %v1447_v51 }
 0xbcf   : > { %v1945_v63 = vpop.eup %1944 }
 0xbd0   : > { %v1450_v0 = vadd.f32 1.0, %v1945_v63 }
 0xbd2   : > { %v1452_v8 = vmul.f32 %v1450_v0, %v1436_v3 }
 0xbd3   : > { %v1947_v2 = vpop.eup %1946 }
 0xbd4   : > { %v1451_v7 = vadd.f32 1.0, %v1947_v2 }
 0xbd6   : > { %v1453_v9 = vmul.f32 %v1451_v7, %v1437_v4 }
 0xbd8   : > { %v1458_v10 = vpack.c.bf16 %v1453_v9, %v1452_v8 }
 0xbda   : > { %1866 = vmatmul.mubr.msk.bf16.vlgmr.msra.gmra.mxu0 %vm462_vm1, %v1458_v10 }
 0xc9a   : > { %v1515_v12 = vpop.f32.mrf.mxu0 }
 0xc9b   : > { %v1516_v13 = vadd.f32 %v1708_v11, %v1515_v12 }
 0xc9c   : > { %v1867_v14 = vpop.f32.mrf.mxu0 }
 0xc9d   : > { %v1522_v15 = vadd.f32 %v1516_v13, %v1366_v42 }
 0xc9e   : > { %v1518_v16 = vpop.f32.mrf.mxu0 }
 0xc9f   : > { %v1519_v17 = vadd.f32 %v1708_v11, %v1518_v16  ;;  %v1526_v18 = vsel %vm462_vm1, %v1522_v15, 0.0 }
 0xca0   : > { %1527 = vadd.xlane.f32.xlu1 %v1526_v18  ;;  %v1868_v23 = vpop.f32.mrf.mxu0 }
 0xca1   : > { %v1523_v25 = vadd.f32 %v1519_v17, %v1367_v43 }
 0xca3   : > { %v1529_v19 = vsel %vm462_vm1, %v1523_v25, 0.0 }
 0xca4   : > { %1530 = vadd.xlane.f32.xlu0 %v1529_v19 }
 0xd29   : > { %v1528_v20 = vpop.xlane.xlu1 %1527 }
 0xd2a   : > { %v1532_v21 = vmul.f32 0.03125, %v1528_v20 }
 0xd2c   : > { %v1534_v22 = vsub.f32 %v1522_v15, %v1532_v21 }
 0xd2d   : > { %v1531_v24 = vpop.xlane.xlu0 %1530 }
 0xd2e   : > { %v1533_v5 = vmul.f32 0.03125, %v1531_v24  ;;  %v1536_v26 = vmul.f32 %v1534_v22, %v1534_v22 }
 0xd30   : > { %v1535_v6 = vsub.f32 %v1523_v25, %v1533_v5  ;;  %v1538_v27 = vsel %vm462_vm1, %v1536_v26, 0.0 }
 0xd31   : > { %1539 = vadd.xlane.f32.xlu0 %v1538_v27 }
 0xd32   : > { %v1537_v28 = vmul.f32 %v1535_v6, %v1535_v6 }
 0xd34   : > { %v1541_v29 = vsel %vm462_vm1, %v1537_v28, 0.0 }
 0xd35   : > { %1542 = vadd.xlane.f32.xlu0 %v1541_v29 }
 0xdba   : > { %v1540_v30 = vpop.xlane.xlu0 %1539 }
 0xdbb   : > { %v1544_v31 = vmul.f32 0.03125, %v1540_v30 }
 0xdbd   : > { %v1546_v32 = vadd.f32 1e-05, %v1544_v31 }
 0xdbe   : > { %v1543_v33 = vpop.xlane.xlu0 %1542 }
 0xdbf   : > { %1948 = vrsqrt.f32 %v1546_v32  ;;  %v1545_v34 = vmul.f32 0.03125, %v1543_v33 }
 0xdc1   : > { %v1547_v35 = vadd.f32 1e-05, %v1545_v34 }
 0xdc3   : > { %1950 = vrsqrt.f32 %v1547_v35 }
 0xdcc   : > { %v1949_v36 = vpop.eup %1948 }
 0xdcd   : > { %v1550_v38 = vmul.f32 %v1949_v36, %v1534_v22 }
 0xdcf   : > { %v1558_v40 = vmul.f32 %v1712_v37, %v1550_v38 }
 0xdd0   : > { %v1951_v41 = vpop.eup %1950 }
 0xdd1   : > { %v1566_v42 = vadd.f32 %v1713_v39, %v1558_v40  ;;  %v1551_v43 = vmul.f32 %v1951_v41, %v1535_v6 }
 0xdd3   : > { %1568 = vst.msk [vmem:[%s408_s21] sm:$0xff] %vm462_vm1, %v1566_v42  ;;  %v1559_v58 = vmul.f32 %v1712_v37, %v1551_v43 }
 0xdd5   : > { %v1567_v44 = vadd.f32 %v1713_v39, %v1559_v58 }
 0xdd7   : > { %1569 = vst.msk [vmem:[%s408_s21 + $0x8] sm:$0xff] %vm462_vm1, %v1567_v44 }
 0xdd8 PF: > { %s21_s19 = sadd.s32 1, %s1974_s19   ;;  %s2319_s17 = smov %s1970_s18 }
 0xdd9   : > { %p18_p5 = scmp.ge.s32.totalorder %s21_s19, 4   ;;  %s2320_s18 = smov %s2322_s20 }
 0xddb   :  { %20 = sbr.rel (!%p18_p5) target bundleno = 2 (0x2), region = 101 }

// kernel: informer_stack_forward.13
= control target key start
LH: loop header
LB: loop body
LE: loop exit
PB: predicated region body
PF: predicated region fallthrough
CT: control target
= control target key end

     0   :  { %s1896_s17 = smov 0   ;;  %s1898_s18 = smov 0   ;;  %s2138_s0 = inlined_call_operand.vmem [shape: f32[2,8,32], index: 0, kind: input, shape index: {}]   ;;  %s2139_s1 = inlined_call_operand.vmem [shape: bf16[4,32,32], index: 1, kind: input, shape index: {}]   ;;  %s2140_s2 = inlined_call_operand.vmem [shape: f32[4,1,32], index: 2, kind: input, shape index: {}]   ;;  %s2141_s3 = inlined_call_operand.vmem [shape: f32[1,32], index: 3, kind: input, shape index: {}]   ;;  %s2142_s4 = inlined_call_operand.vmem [shape: f32[1,32], index: 4, kind: input, shape index: {}]   ;;  %s2143_s5 = inlined_call_operand.vmem [shape: bf16[32,32], index: 5, kind: input, shape index: {}]   ;;  %s2144_s6 = inlined_call_operand.vmem [shape: f32[1,32], index: 6, kind: input, shape index: {}]   ;;  %s2145_s7 = inlined_call_operand.vmem [shape: bf16[32,32], index: 7, kind: input, shape index: {}]   ;;  %s2146_s8 = inlined_call_operand.vmem [shape: f32[1,32], index: 8, kind: input, shape index: {}]   ;;  %s2147_s9 = inlined_call_operand.vmem [shape: f32[1,32], index: 9, kind: input, shape index: {}]   ;;  %s2148_s10 = inlined_call_operand.vmem [shape: f32[1,32], index: 10, kind: input, shape index: {}]   ;;  %s2149_s11 = inlined_call_operand.vmem [shape: f32[2,8,32], index: 11, kind: output, shape index: {}]  }
   0x1   :  { %s1900_s19 = smov 0  }
   0x2 LB: > { %s33_s20 = sadd.s32 1, %s1825_s18  ;;  %p1538_p0 = scmp.ge.s32.totalorder %s1829_s19, 1  ;;  %s1829_s19 = sphi %s1900_s19, %s21_s19   ;;  %s1825_s18 = sphi %s1898_s18, %s2151_s18   ;;  %s1821_s17 = sphi %s1896_s17, %s2150_s17  }
   0x3   : > { %p35_p1 = scmp.ge.s32.totalorder %s33_s20, 2  ;;  %p350_p2 = scmp.lt.s32.totalorder %s1829_s19, 3 }
   0x5   : > { %s2153_s20 = smov (%p35_p1, %s33_s20), 0  ;;  %p351_p3 = pnand %p1538_p0, %p350_p2 }
   0x6   : > { %p391_p4 = scmp.lt.s32.totalorder (!%p351_p3), %s1821_s17, 1  ;;  %s1833_s22 = smov (!%p351_p3), 120  }
   0x7   : > { %354 = sbr.rel (%p351_p3) target bundleno = 3508 (0xdb4), region = 64  ;;  %s1834_s30 = smov (!%p351_p3), 112  }
   0x8   : > { %s1835_s16 = smov (!%p351_p3), 104  }
   0xc   : > { %v1775_v0 = vld [vmem:[%s2139_s1 + $0x18] sm:$0xff]   ;;  %v1831_v1 = vmov 0.0   ;;  %v1776_v2 = vld [vmem:[%s2139_s1 + $0x8] sm:$0xff]   ;;  %v1777_v3 = vld [vmem:[%s2139_s1 + $0x10] sm:$0xff]   ;;  %vm1832_vm0 = vmmov 0   ;;  %s2155_s17 = smov (!%p391_p4, %s1821_s17), 1 }
   0xd   : > { %1642 = vmatprep.subr.bf16.mxu1 %v1831_v1  ;;  %1634 = vmatprep.subr.bf16.mxu0 %v1831_v1  ;;  %v1778_v4 = vld [vmem:[%s2139_s1] sm:$0xff]   ;;  %s1539_s29 = sshll.u32 %s2155_s17, 3  ;;  %vm452_vm1 = vcmask 261120   ;;  %vm620_vm2 = vcmask 64512   ;;  %v1779_v23 = vld [vmem:[%s2139_s1 + $0x28] sm:$0xff]   ;;  %vm682_vm3 = vcmask 1043456  }
   0xe   : > { %1643 = vmatpush3.bf16.msra.mxu1 %v1775_v0  ;;  %1646 = vmatprep.mubr.msk.bf16.mxu1 %vm1832_vm0, %v1831_v1  ;;  %s394_s13 = scalar_lea.vmem %s2138_s0, %s1539_s29  ;;  %v1560_v7 = vld [vmem:[%s2140_s2 + $0x1] ss:$0 sm:$0xff]  ;;  %v1556_v8 = vld [vmem:[%s2140_s2] ss:$0 sm:$0xff]  ;;  %v1564_v47 = vld [vmem:[%s2140_s2 + $0x2] ss:$0 sm:$0xff]  ;;  %s401_s21 = scalar_lea.vmem %s2149_s11, %s1539_s29 }
   0xf   : > { %1635 = vmatpush3.bf16.msra.mxu0 %v1776_v2  ;;  %1644 = vmatprep.subr.bf16.mxu1 %v1831_v1  ;;  %v1943_v5 = vld [vmem:[%s394_s13] sm:$0xff]  ;;  %v1550_v60 = vld [vmem:[%s2139_s1 + $0x34] sm:$0xf] }
  0x10   : > { %1636 = vmatprep.subr.bf16.mxu0 %v1831_v1  ;;  %1638 = vmatprep.mubr.msk.bf16.mxu0 %vm1832_vm0, %v1831_v1  ;;  %v497_v6 = vpack.c.bf16 %v1943_v5, %v1943_v5  ;;  %v1780_v24 = vld [vmem:[%s2139_s1 + $0x20] sm:$0xff]   ;;  %v845_v61 = vsel %vm682_vm3, %v1550_v60, 0 }
  0x12   : > { %1645 = vmatpush3.bf16.msra.mxu1 %v1777_v3  ;;  %v1549_v3 = vld [vmem:[%s2139_s1 + $0x30] sm:$0xf] }
  0x13   : > { %1637 = vmatpush3.bf16.msra.mxu0 %v1778_v4  ;;  %1658 = vmatprep.subr.bf16.mxu1 %v1831_v1 }
  0x14   : > { %1650 = vmatprep.subr.bf16.mxu0 %v1831_v1 }
  0x15   : > { %1647 = vmatmul.mubr.msk.bf16.vlgmr.msra.gmra.mxu1 %vm452_vm1, %v497_v6 }
  0x16   : > { %1639 = vmatmul.mubr.msk.bf16.vlgmr.msra.gmra.mxu0 %vm452_vm1, %v497_v6  ;;  %1660 = vmatprep.mubr.msk.bf16.mxu1 %vm1832_vm0, %v1831_v1 }
  0x17   : > { %1654 = vmatprep.mubr.msk.bf16.mxu0 %vm1832_vm0, %v1831_v1  ;;  %1651 = vmatpush3.bf16.msra.mxu0 %v1779_v23 }
  0x18   : > { %1652 = vmatprep.subr.bf16.mxu0 %v1831_v1 }
  0x1b   : > { %1653 = vmatpush3.bf16.msra.mxu0 %v1780_v24 }
  0x1c   : > { %1664 = vmatprep.subr.bf16.mxu0 %v1831_v1 }
  0x1e   : > { %1655 = vmatmul.mubr.msk.bf16.vlgmr.msra.gmra.mxu0 %vm452_vm1, %v497_v6 }
  0x1f   : > { %1666 = vmatprep.mubr.msk.bf16.mxu0 %vm1832_vm0, %v1831_v1 }
  0xd5   : > { %v553_v9 = vpop.f32.mrf.mxu1 }
  0xd6   : > { %v490_v10 = vpop.f32.mrf.mxu0  ;;  %v554_v11 = vadd.f32 %v1560_v7, %v553_v9  ;;  %v891_v7 = vsel %vm682_vm3, %v1549_v3, 0 }
  0xd7   : > { %v491_v12 = vadd.f32 %v1556_v8, %v490_v10  ;;  %v1648_v13 = vpop.f32.mrf.mxu1 }
  0xd8   : > { %v1640_v14 = vpop.f32.mrf.mxu0  ;;  %v1960_v15 = vpack.c.bf16 %v554_v11, %v554_v11 }
  0xd9   : > { %v496_v16 = vmul.f32 0.35355338, %v491_v12  ;;  %v556_v17 = vpop.f32.mrf.mxu1 }
  0xda   : > { %v493_v18 = vpop.f32.mrf.mxu0  ;;  %731 = vrot.lane.b32.xlu0 %v1960_v15, %s1833_s22  ;;  %v625_v20 = vsel %vm620_vm2, %v1960_v15, 0 }
  0xdb   : > { %v1962_v19 = vpack.c.bf16 %v496_v16, %v496_v16  ;;  %v1649_v21 = vpop.f32.mrf.mxu1  ;;  %1659 = vmatpush3.bf16.xpose.msra.mxu1 %v625_v20 }
  0xdc   : > { %v1641_v22 = vpop.f32.mrf.mxu0  ;;  %1670 = vmatprep.subr.bf16.mxu1 %v1831_v1 }
  0xde   : > { %728 = vrot.lane.b32.xlu0 %v1962_v19, %s1833_s22  ;;  %v611_v41 = vpop.f32.mrf.mxu0 }
  0xdf   : > { %v612_v48 = vadd.f32 %v1564_v47, %v611_v41 }
  0xe0   : > { %v1656_v42 = vpop.f32.mrf.mxu0 }
  0xe1   : > { %v1997_v49 = vpack.c.bf16 %v612_v48, %v612_v48 }
  0xe2   : > { %1661 = vmatmul.mubr.msk.bf16.vlgmr.msra.gmra.mxu1 %vm620_vm2, %v1962_v19  ;;  %v614_v43 = vpop.f32.mrf.mxu0 }
  0xe3   : > { %1672 = vmatprep.mubr.msk.bf16.mxu1 %vm1832_vm0, %v1831_v1  ;;  %v684_v50 = vsel %vm682_vm3, %v1997_v49, 0 }
  0xe4   : > { %v1657_v44 = vpop.f32.mrf.mxu0  ;;  %1665 = vmatpush3.bf16.msra.mxu0 %v684_v50 }
  0xe5   : > { %1676 = vmatprep.subr.bf16.mxu0 %v1831_v1 }
 0x14c   : > { %v732_v25 = vpop.permute.xlu0 %731 }
 0x14d   : > { %v737_v26 = vsel %vm620_vm2, %v732_v25, 0 }
 0x14e   : > { %1671 = vmatpush3.bf16.xpose.msra.mxu1 %v737_v26 }
 0x14f   : > { %1682 = vmatprep.subr.bf16.mxu1 %v1831_v1 }
 0x150   : > { %v729_v27 = vpop.permute.xlu0 %728 }
 0x155   : > { %1673 = vmatmul.mubr.msk.bf16.vlgmr.msra.gmra.mxu1 %vm620_vm2, %v729_v27 }
 0x156   : > { %1684 = vmatprep.mubr.msk.bf16.mxu1 %vm1832_vm0, %v1831_v1  ;;  %1683 = vmatpush3.bf16.msra.mxu1 %v845_v61 }
 0x157   : > { %1694 = vmatprep.subr.bf16.mxu1 %v1831_v1 }
 0x1a2   : > { %v661_v28 = vpop.f32.mrf.mxu1 }
 0x1a3   : > { %v667_v29 = vsel %vm620_vm2, %v661_v28, -inf }
 0x1a4   : > { %668 = vmax.xlane.f32.xlu1 %v667_v29  ;;  %v1662_v30 = vpop.f32.mrf.mxu1 }
 0x1a6   : > { %v664_v31 = vpop.f32.mrf.mxu1 }
 0x1a8   : > { %v1663_v32 = vpop.f32.mrf.mxu1 }
 0x215   : > { %v773_v33 = vpop.f32.mrf.mxu1 }
 0x216   : > { %v779_v34 = vsel %vm620_vm2, %v773_v33, -inf }
 0x217   : > { %780 = vmax.xlane.f32.xlu1 %v779_v34  ;;  %v1674_v35 = vpop.f32.mrf.mxu1 }
 0x219   : > { %v776_v36 = vpop.f32.mrf.mxu1 }
 0x21b   : > { %v1675_v37 = vpop.f32.mrf.mxu1 }
 0x22d   : > { %v669_v38 = vpop.xlane.xlu1 %668 }
 0x22e   : > { %v670_v39 = vsub.f32 %v661_v28, %v669_v38 }
 0x230   : > { %v671_v40 = vmul.f32 1.442695, %v670_v39 }
 0x232   : > { %1785 = vpow2.f32 %v671_v40 }
 0x23f   : > { %v1786_v45 = vpop.eup %1785 }
 0x240   : > { %v673_v46 = vsel %vm620_vm2, %v1786_v45, 0.0 }
 0x241   : > { %674 = vadd.xlane.f32.xlu0 %v673_v46 }
 0x257   : > { %995 = vrot.lane.b32.xlu0 %v1997_v49, %s1834_s30 }
 0x2a0   : > { %v781_v51 = vpop.xlane.xlu1 %780 }
 0x2a1   : > { %v782_v52 = vsub.f32 %v773_v33, %v781_v51 }
 0x2a3   : > { %v783_v53 = vmul.f32 1.442695, %v782_v52 }
 0x2a5   : > { %1787 = vpow2.f32 %v783_v53 }
 0x2b2   : > { %v1788_v54 = vpop.eup %1787 }
 0x2b3   : > { %v785_v55 = vsel %vm620_vm2, %v1788_v54, 0.0 }
 0x2b4   : > { %786 = vadd.xlane.f32.xlu1 %v785_v55 }
 0x2c5   : > { %792 = vrot.lane.b32.xlu1 %v1997_v49, %s1833_s22 }
 0x2c9   : > { %935 = vrot.lane.b32.xlu1 %v1960_v15, %s1834_s30 }
 0x2ca   : > { %v675_v56 = vpop.xlane.xlu0 %674 }
 0x2cb   : > { %1789 = vrcp.f32 %v675_v56 }
 0x2cd   : > { %933 = vrot.lane.b32.xlu1 %v1962_v19, %s1834_s30 }
 0x2ce   : > { %v996_v8 = vpop.permute.xlu0 %995 }
 0x2cf   : > { %v1001_v12 = vsel %vm682_vm3, %v996_v8, 0 }
 0x2d8   : > { %v1790_v57 = vpop.eup %1789 }
 0x2d9   : > { %v677_v58 = vmul.f32 %v1790_v57, %v1786_v45 }
 0x2db   : > { %v678_v59 = vpack.c.bf16 %v677_v58, %v677_v58 }
 0x2dd   : > { %1667 = vmatmul.mubr.msk.bf16.vlgmr.msra.gmra.mxu0 %vm620_vm2, %v678_v59 }
 0x2de   : > { %1678 = vmatprep.mubr.msk.bf16.mxu0 %vm1832_vm0, %v1831_v1 }
 0x33d   : > { %v787_v62 = vpop.xlane.xlu1 %786 }
 0x33e   : > { %1791 = vrcp.f32 %v787_v62 }
 0x341   : > { %v793_v63 = vpop.permute.xlu1 %792 }
 0x342   : > { %v798_v0 = vsel %vm682_vm3, %v793_v63, 0 }
 0x343   : > { %1677 = vmatpush3.bf16.msra.mxu0 %v798_v0 }
 0x344   : > { %1688 = vmatprep.subr.bf16.mxu0 %v1831_v1 }
 0x345   : > { %v936_v16 = vpop.permute.xlu1 %935 }
 0x346   : > { %v941_v21 = vsel %vm620_vm2, %v936_v16, 0 }
 0x349   : > { %v934_v24 = vpop.permute.xlu1 %933 }
 0x34b   : > { %v1792_v2 = vpop.eup %1791 }
 0x34c   : > { %v789_v4 = vmul.f32 %v1792_v2, %v1788_v54 }
 0x34e   : > { %v790_v6 = vpack.c.bf16 %v789_v4, %v789_v4 }
 0x350   : > { %1679 = vmatmul.mubr.msk.bf16.vlgmr.msra.gmra.mxu0 %vm620_vm2, %v790_v6  ;;  %v1552_v6 = vld [vmem:[%s2139_s1 + $0x3c] sm:$0xf] }
 0x351   : > { %1689 = vmatpush3.bf16.msra.mxu0 %v891_v7  ;;  %1690 = vmatprep.mubr.msk.bf16.mxu0 %vm1832_vm0, %v1831_v1  ;;  %v1206_v8 = vsel %vm682_vm3, %v1552_v6, 0 }
 0x352   : > { %1700 = vmatprep.subr.bf16.mxu0 %v1831_v1 }
 0x39d   : > { %v720_v9 = vpop.f32.mrf.mxu0 }
 0x39e   : > { %v726_v10 = vpack.c.bf16 %v720_v9, %v720_v9 }
 0x39f   : > { %v1668_v11 = vpop.f32.mrf.mxu0 }
 0x3a0   : > { %1691 = vmatmul.mubr.msk.bf16.vlgmr.msra.gmra.mxu0 %vm620_vm2, %v726_v10 }
 0x3a1   : > { %1701 = vmatpush3.bf16.msra.mxu0 %v1001_v12  ;;  %v723_v13 = vpop.f32.mrf.mxu0  ;;  %1702 = vmatprep.mubr.msk.bf16.mxu0 %vm1832_vm0, %v1831_v1 }
 0x3a2   : > { %1712 = vmatprep.subr.bf16.mxu0 %v1831_v1 }
 0x3a3   : > { %v1669_v14 = vpop.f32.mrf.mxu0 }
 0x410   : > { %v834_v17 = vpop.f32.mrf.mxu0 }
 0x411   : > { %v840_v18 = vpack.c.bf16 %v834_v17, %v834_v17 }
 0x412   : > { %v1680_v20 = vpop.f32.mrf.mxu0 }
 0x413   : > { %1685 = vmatmul.mubr.msk.bf16.vlgmr.msra.gmra.mxu1 %vm620_vm2, %v840_v18 }
 0x414   : > { %1695 = vmatpush3.bf16.xpose.msra.mxu1 %v941_v21  ;;  %v837_v22 = vpop.f32.mrf.mxu0  ;;  %1696 = vmatprep.mubr.msk.bf16.mxu1 %vm1832_vm0, %v1831_v1 }
 0x415   : > { %1706 = vmatprep.subr.bf16.mxu1 %v1831_v1 }
 0x416   : > { %v1681_v23 = vpop.f32.mrf.mxu0 }
 0x41b   : > { %1697 = vmatmul.mubr.msk.bf16.vlgmr.msra.gmra.mxu1 %vm620_vm2, %v934_v24  ;;  %v1580_v24 = vld [vmem:[%s2140_s2 + $0x3] ss:$0 sm:$0xff] }
 0x41c   : > { %1708 = vmatprep.mubr.msk.bf16.mxu1 %vm1832_vm0, %v1831_v1 }
 0x460   : > { %v2039_v25 = vpop.f32.mrf.mxu0 }
 0x462   : > { %v1692_v26 = vpop.f32.mrf.mxu0 }
 0x464   : > { %v930_v27 = vpop.f32.mrf.mxu0 }
 0x466   : > { %v1693_v28 = vpop.f32.mrf.mxu0 }
 0x4d3   : > { %v881_v29 = vpop.f32.mrf.mxu1 }
 0x4d4   : > { %v928_v3 = vadd.f32 %v2039_v25, %v881_v29 }
 0x4d5   : > { %v1686_v30 = vpop.f32.mrf.mxu1 }
 0x4d7   : > { %v884_v31 = vpop.f32.mrf.mxu1 }
 0x4d9   : > { %v1687_v32 = vpop.f32.mrf.mxu1 }
 0x4db   : > { %v977_v33 = vpop.f32.mrf.mxu1 }
 0x4dc   : > { %v983_v34 = vsel %vm620_vm2, %v977_v33, -inf }
 0x4dd   : > { %984 = vmax.xlane.f32.xlu1 %v983_v34  ;;  %v1698_v35 = vpop.f32.mrf.mxu1 }
 0x4df   : > { %v980_v36 = vpop.f32.mrf.mxu1 }
 0x4e1   : > { %v1699_v37 = vpop.f32.mrf.mxu1 }
 0x566   : > { %v985_v38 = vpop.xlane.xlu1 %984 }
 0x567   : > { %v986_v39 = vsub.f32 %v977_v33, %v985_v38  ;;  %v1781_v38 = vld [vmem:[%s2143_s5 + $0x8] sm:$0xff]  }
 0x569   : > { %v987_v40 = vmul.f32 1.442695, %v986_v39 }
 0x56b   : > { %1793 = vpow2.f32 %v987_v40 }
 0x578   : > { %v1794_v41 = vpop.eup %1793 }
 0x579   : > { %v989_v42 = vsel %vm620_vm2, %v1794_v41, 0.0 }
 0x57a   : > { %990 = vadd.xlane.f32.xlu0 %v989_v42 }
 0x590   : > { %1093 = vrot.lane.b32.xlu0 %v1960_v15, %s1835_s16 }
 0x594   : > { %1091 = vrot.lane.b32.xlu0 %v1962_v19, %s1835_s16  ;;  %v1551_v19 = vld [vmem:[%s2139_s1 + $0x38] sm:$0xf] }
 0x595   : > { %v1048_v50 = vsel %vm682_vm3, %v1551_v19, 0  ;;  %v1784_v19 = vld [vmem:[%s2145_s7] sm:$0xff]  }
 0x596   : > { %1707 = vmatpush3.bf16.msra.mxu1 %v1048_v50  ;;  %v1583_v50 = vld [vmem:[%s2144_s6] ss:$0 sm:$0xff] }
 0x597   : > { %1718 = vmatprep.subr.bf16.mxu1 %v1831_v1 }
 0x603   : > { %v991_v43 = vpop.xlane.xlu0 %990 }
 0x604   : > { %1795 = vrcp.f32 %v991_v43  ;;  %v1581_v43 = vld [vmem:[%s2141_s3] ss:$0 sm:$0xff] }
 0x607   : > { %v1094_v46 = vpop.permute.xlu0 %1093 }
 0x608   : > { %v1099_v48 = vsel %vm620_vm2, %v1094_v46, 0 }
 0x60b   : > { %v1092_v15 = vpop.permute.xlu0 %1091 }
 0x611   : > { %v1796_v44 = vpop.eup %1795 }
 0x612   : > { %v993_v45 = vmul.f32 %v1796_v44, %v1794_v41 }
 0x614   : > { %v994_v47 = vpack.c.bf16 %v993_v45, %v993_v45  ;;  %v1582_v45 = vld [vmem:[%s2142_s4] ss:$0 sm:$0xff] }
 0x616   : > { %1703 = vmatmul.mubr.msk.bf16.vlgmr.msra.gmra.mxu0 %vm620_vm2, %v994_v47 }
 0x617   : > { %1713 = vmatpush3.bf16.xpose.msra.mxu0 %v1099_v48  ;;  %1714 = vmatprep.mubr.msk.bf16.mxu0 %vm1832_vm0, %v1831_v1 }
 0x618   : > { %1724 = vmatprep.subr.bf16.mxu0 %v1831_v1 }
 0x61e   : > { %1715 = vmatmul.mubr.msk.bf16.vlgmr.msra.gmra.mxu0 %vm620_vm2, %v1092_v15  ;;  %v1783_v15 = vld [vmem:[%s2145_s7 + $0x8] sm:$0xff]  }
 0x61f   : > { %1726 = vmatprep.mubr.msk.bf16.mxu0 %vm1832_vm0, %v1831_v1  ;;  %1725 = vmatpush3.bf16.msra.mxu0 %v1206_v8 }
 0x620   : > { %1738 = vmatprep.subr.bf16.mxu0 %v1831_v1 }
 0x6d6   : > { %v1037_v51 = vpop.f32.mrf.mxu0 }
 0x6d7   : > { %v1043_v52 = vpack.c.bf16 %v1037_v51, %v1037_v51 }
 0x6d8   : > { %v1704_v53 = vpop.f32.mrf.mxu0 }
 0x6d9   : > { %1709 = vmatmul.mubr.msk.bf16.vlgmr.msra.gmra.mxu1 %vm620_vm2, %v1043_v52 }
 0x6da   : > { %v1040_v54 = vpop.f32.mrf.mxu0  ;;  %1720 = vmatprep.mubr.msk.bf16.mxu1 %vm1832_vm0, %v1831_v1 }
 0x6dc   : > { %v1705_v55 = vpop.f32.mrf.mxu0 }
 0x6de   : > { %v1135_v56 = vpop.f32.mrf.mxu0 }
 0x6df   : > { %v1141_v57 = vsel %vm620_vm2, %v1135_v56, -inf }
 0x6e0   : > { %1142 = vmax.xlane.f32.xlu0 %v1141_v57  ;;  %v1716_v58 = vpop.f32.mrf.mxu0 }
 0x6e2   : > { %v1138_v59 = vpop.f32.mrf.mxu0 }
 0x6e4   : > { %v1717_v60 = vpop.f32.mrf.mxu0 }
 0x769   : > { %v1143_v61 = vpop.xlane.xlu0 %1142 }
 0x76a   : > { %v1144_v62 = vsub.f32 %v1135_v56, %v1143_v61 }
 0x76c   : > { %v1145_v63 = vmul.f32 1.442695, %v1144_v62 }
 0x76e   : > { %1797 = vpow2.f32 %v1145_v63 }
 0x77b   : > { %v1798_v0 = vpop.eup %1797 }
 0x77c   : > { %v1147_v2 = vsel %vm620_vm2, %v1798_v0, 0.0 }
 0x77d   : > { %1148 = vadd.xlane.f32.xlu1 %v1147_v2  ;;  %v1587_v2 = vld [vmem:[%s2146_s8] ss:$0 sm:$0xff] }
 0x78e   : > { %1153 = vrot.lane.b32.xlu1 %v1997_v49, %s1835_s16 }
 0x799   : > { %v1084_v4 = vpop.f32.mrf.mxu1 }
 0x79a   : > { %v1090_v7 = vadd.f32 %v1084_v4, %v928_v3 }
 0x79b   : > { %v1710_v9 = vpop.f32.mrf.mxu1 }
 0x79d   : > { %v1087_v10 = vpop.f32.mrf.mxu1 }
 0x79f   : > { %v1711_v11 = vpop.f32.mrf.mxu1 }
 0x806   : > { %v1149_v12 = vpop.xlane.xlu1 %1148 }
 0x807   : > { %1799 = vrcp.f32 %v1149_v12 }
 0x80a   : > { %v1154_v13 = vpop.permute.xlu1 %1153 }
 0x80b   : > { %v1159_v49 = vsel %vm682_vm3, %v1154_v13, 0 }
 0x80c   : > { %1719 = vmatpush3.bf16.msra.mxu1 %v1159_v49 }
 0x80d   : > { %1730 = vmatprep.subr.bf16.mxu1 %v1831_v1 }
 0x814   : > { %v1800_v14 = vpop.eup %1799 }
 0x815   : > { %v1151_v16 = vmul.f32 %v1800_v14, %v1798_v0 }
 0x817   : > { %v1152_v17 = vpack.c.bf16 %v1151_v16, %v1151_v16 }
 0x819   : > { %1721 = vmatmul.mubr.msk.bf16.vlgmr.msra.gmra.mxu1 %vm620_vm2, %v1152_v17 }
 0x81a   : > { %1734 = vmatprep.mubr.msk.bf16.mxu1 %vm1832_vm0, %v1831_v1  ;;  %1731 = vmatpush3.bf16.msra.mxu1 %v1781_v38 }
 0x81b   : > { %1732 = vmatprep.subr.bf16.mxu1 %v1831_v1 }
 0x8d9   : > { %v1195_v18 = vpop.f32.mrf.mxu1 }
 0x8da   : > { %v1201_v20 = vpack.c.bf16 %v1195_v18, %v1195_v18 }
 0x8db   : > { %v1722_v21 = vpop.f32.mrf.mxu1 }
 0x8dc   : > { %1727 = vmatmul.mubr.msk.bf16.vlgmr.msra.gmra.mxu0 %vm620_vm2, %v1201_v20  ;;  %v1591_v21 = vld [vmem:[%s2147_s9] ss:$0 sm:$0xff] }
 0x8dd   : > { %v1198_v22 = vpop.f32.mrf.mxu1  ;;  %1742 = vmatprep.mubr.msk.bf16.mxu0 %vm1832_vm0, %v1831_v1  ;;  %1739 = vmatpush3.bf16.msra.mxu0 %v1783_v15 }
 0x8de   : > { %1740 = vmatprep.subr.bf16.mxu0 %v1831_v1 }
 0x8df   : > { %v1723_v23 = vpop.f32.mrf.mxu1 }
 0x8e0   : > { %v1592_v23 = vld [vmem:[%s2148_s10] ss:$0 sm:$0xff] }
 0x8e1   : > { %1741 = vmatpush3.bf16.msra.mxu0 %v1784_v19 }
 0x99c   : > { %v1242_v25 = vpop.f32.mrf.mxu0 }
 0x99d   : > { %v1248_v26 = vadd.f32 %v1242_v25, %v1090_v7 }
 0x99e   : > { %v1728_v27 = vpop.f32.mrf.mxu0 }
 0x99f   : > { %v1255_v28 = vadd.f32 %v1580_v24, %v1248_v26 }
 0x9a0   : > { %v1245_v29 = vpop.f32.mrf.mxu0 }
 0x9a1   : > { %v1256_v30 = vadd.f32 %v1255_v28, %v1943_v5  ;;  %v1782_v5 = vld [vmem:[%s2143_s5] sm:$0xff]  }
 0x9a2   : > { %v1729_v31 = vpop.f32.mrf.mxu0  ;;  %1733 = vmatpush3.bf16.msra.mxu1 %v1782_v5 }
 0x9a3   : > { %v1259_v32 = vsel %vm452_vm1, %v1256_v30, 0.0 }
 0x9a4   : > { %1260 = vadd.xlane.f32.xlu1 %v1259_v32 }
 0xa2d   : > { %v1261_v33 = vpop.xlane.xlu1 %1260 }
 0xa2e   : > { %v1263_v34 = vmul.f32 0.03125, %v1261_v33 }
 0xa30   : > { %v1264_v35 = vsub.f32 %v1256_v30, %v1263_v34 }
 0xa32   : > { %v1265_v36 = vmul.f32 %v1264_v35, %v1264_v35 }
 0xa34   : > { %v1266_v37 = vsel %vm452_vm1, %v1265_v36, 0.0 }
 0xa35   : > { %1267 = vadd.xlane.f32.xlu0 %v1266_v37 }
 0xabe   : > { %v1268_v39 = vpop.xlane.xlu0 %1267 }
 0xabf   : > { %v1269_v40 = vmul.f32 0.03125, %v1268_v39 }
 0xac1   : > { %v1270_v41 = vadd.f32 1e-05, %v1269_v40 }
 0xac3   : > { %1801 = vrsqrt.f32 %v1270_v41 }
 0xad0   : > { %v1802_v42 = vpop.eup %1801 }
 0xad1   : > { %v1272_v44 = vmul.f32 %v1802_v42, %v1264_v35 }
 0xad3   : > { %v1279_v46 = vmul.f32 %v1581_v43, %v1272_v44 }
 0xad5   : > { %v1286_v47 = vadd.f32 %v1582_v45, %v1279_v46 }
 0xad7   : > { %v1291_v48 = vpack.c.bf16 %v1286_v47, %v1286_v47 }
 0xad9   : > { %1735 = vmatmul.mubr.msk.bf16.vlgmr.msra.gmra.mxu1 %vm452_vm1, %v1291_v48 }
 0xb99   : > { %v1348_v51 = vpop.f32.mrf.mxu1 }
 0xb9a   : > { %v1349_v52 = vadd.f32 %v1583_v50, %v1348_v51 }
 0xb9b   : > { %v1736_v53 = vpop.f32.mrf.mxu1 }
 0xb9c   : > { %v1355_v54 = vmul.f32 0.044715, %v1349_v52  ;;  %v1354_v62 = vmul.f32 0.5, %v1349_v52 }
 0xb9d   : > { %v1351_v55 = vpop.f32.mrf.mxu1 }
 0xb9e   : > { %v1356_v56 = vmul.f32 %v1355_v54, %v1349_v52 }
 0xb9f   : > { %v1737_v57 = vpop.f32.mrf.mxu1 }
 0xba0   : > { %v1357_v58 = vmul.f32 %v1356_v56, %v1349_v52 }
 0xba2   : > { %v1358_v59 = vadd.f32 %v1357_v58, %v1349_v52 }
 0xba4   : > { %v1359_v60 = vmul.f32 0.7978846, %v1358_v59 }
 0xba6   : > { %1803 = vtanh.f32 %v1359_v60 }
 0xbb3   : > { %v1804_v61 = vpop.eup %1803 }
 0xbb4   : > { %v1361_v63 = vadd.f32 1.0, %v1804_v61 }
 0xbb6   : > { %v1362_v1 = vmul.f32 %v1361_v63, %v1354_v62 }
 0xbb8   : > { %v1367_v0 = vpack.c.bf16 %v1362_v1, %v1362_v1 }
 0xbba   : > { %1743 = vmatmul.mubr.msk.bf16.vlgmr.msra.gmra.mxu0 %vm452_vm1, %v1367_v0 }
 0xc7a   : > { %v1424_v3 = vpop.f32.mrf.mxu0 }
 0xc7b   : > { %v1425_v4 = vadd.f32 %v1587_v2, %v1424_v3 }
 0xc7c   : > { %v1744_v6 = vpop.f32.mrf.mxu0 }
 0xc7d   : > { %v1430_v7 = vadd.f32 %v1425_v4, %v1286_v47 }
 0xc7e   : > { %v1427_v8 = vpop.f32.mrf.mxu0 }
 0xc7f   : > { %v1433_v9 = vsel %vm452_vm1, %v1430_v7, 0.0 }
 0xc80   : > { %1434 = vadd.xlane.f32.xlu0 %v1433_v9  ;;  %v1745_v10 = vpop.f32.mrf.mxu0 }
 0xd09   : > { %v1435_v11 = vpop.xlane.xlu0 %1434 }
 0xd0a   : > { %v1436_v12 = vmul.f32 0.03125, %v1435_v11 }
 0xd0c   : > { %v1437_v13 = vsub.f32 %v1430_v7, %v1436_v12 }
 0xd0e   : > { %v1438_v49 = vmul.f32 %v1437_v13, %v1437_v13 }
 0xd10   : > { %v1439_v14 = vsel %vm452_vm1, %v1438_v49, 0.0 }
 0xd11   : > { %1440 = vadd.xlane.f32.xlu0 %v1439_v14 }
 0xd9a   : > { %v1441_v16 = vpop.xlane.xlu0 %1440 }
 0xd9b   : > { %v1442_v17 = vmul.f32 0.03125, %v1441_v16 }
 0xd9d   : > { %v1443_v18 = vadd.f32 1e-05, %v1442_v17 }
 0xd9f   : > { %1805 = vrsqrt.f32 %v1443_v18 }
 0xdac   : > { %v1806_v20 = vpop.eup %1805 }
 0xdad   : > { %v1445_v22 = vmul.f32 %v1806_v20, %v1437_v13 }
 0xdaf   : > { %v1452_v24 = vmul.f32 %v1591_v21, %v1445_v22 }
 0xdb1   : > { %v1459_v25 = vadd.f32 %v1592_v23, %v1452_v24 }
 0xdb3   : > { %1460 = vst.msk [vmem:[%s401_s21] sm:$0xff] %vm452_vm1, %v1459_v25 }
 0xdb4 PF: > { %s21_s19 = sadd.s32 1, %s1829_s19   ;;  %s2150_s17 = smov %s1825_s18 }
 0xdb5   : > { %p18_p5 = scmp.ge.s32.totalorder %s21_s19, 4   ;;  %s2151_s18 = smov %s2153_s20 }
 0xdb7   :  { %20 = sbr.rel (!%p18_p5) target bundleno = 2 (0x2), region = 101 }

// kernel: informer_stack_forward.14
= control target key start
LH: loop header
LB: loop body
LE: loop exit
PB: predicated region body
PF: predicated region fallthrough
CT: control target
= control target key end

     0   :  { %vm18_vm0 = vcmask 261120   ;;  %s118_s0 = inlined_call_operand.vmem [shape: f32[16,32], index: 0, kind: input, shape index: {}]   ;;  %s119_s1 = inlined_call_operand.vmem [shape: f32[1,32], index: 1, kind: input, shape index: {}]   ;;  %s120_s2 = inlined_call_operand.vmem [shape: f32[1,32], index: 2, kind: input, shape index: {}]   ;;  %s121_s3 = inlined_call_operand.vmem [shape: f32[16,32], index: 3, kind: output, shape index: {}]  }
   0x1   :  { %v14_v0 = vld [vmem:[%s118_s0] sm:$0xff]  ;;  %v15_v1 = vld [vmem:[%s118_s0 + $0x8] sm:$0xff] }
   0x2   :  { %v19_v2 = vsel %vm18_vm0, %v14_v0, 0.0  ;;  %v22_v3 = vsel %vm18_vm0, %v15_v1, 0.0  ;;  %v68_v21 = vld [vmem:[%s119_s1] ss:$0 sm:$0xff] }
   0x3   :  { %20 = vadd.xlane.f32.xlu0 %v19_v2  ;;  %v69_v23 = vld [vmem:[%s120_s2] ss:$0 sm:$0xff] }
   0x7   :  { %23 = vadd.xlane.f32.xlu0 %v22_v3 }
  0x8c   :  { %v21_v4 = vpop.xlane.xlu0 %20 }
  0x8d   :  { %v26_v5 = vmul.f32 0.03125, %v21_v4 }
  0x8f   :  { %v28_v6 = vsub.f32 %v14_v0, %v26_v5 }
  0x90   :  { %v24_v7 = vpop.xlane.xlu0 %23 }
  0x91   :  { %v27_v8 = vmul.f32 0.03125, %v24_v7  ;;  %v30_v9 = vmul.f32 %v28_v6, %v28_v6 }
  0x93   :  { %v29_v10 = vsub.f32 %v15_v1, %v27_v8  ;;  %v32_v11 = vsel %vm18_vm0, %v30_v9, 0.0 }
  0x94   :  { %33 = vadd.xlane.f32.xlu1 %v32_v11 }
  0x95   :  { %v31_v12 = vmul.f32 %v29_v10, %v29_v10 }
  0x97   :  { %v35_v13 = vsel %vm18_vm0, %v31_v12, 0.0 }
  0x98   :  { %36 = vadd.xlane.f32.xlu1 %v35_v13 }
 0x11d   :  { %v34_v14 = vpop.xlane.xlu1 %33 }
 0x11e   :  { %v38_v15 = vmul.f32 0.03125, %v34_v14 }
 0x120   :  { %v40_v16 = vadd.f32 1e-05, %v38_v15 }
 0x121   :  { %v37_v17 = vpop.xlane.xlu1 %36 }
 0x122   :  { %70 = vrsqrt.f32 %v40_v16  ;;  %v39_v18 = vmul.f32 0.03125, %v37_v17 }
 0x124   :  { %v41_v19 = vadd.f32 1e-05, %v39_v18 }
 0x126   :  { %72 = vrsqrt.f32 %v41_v19 }
 0x12f   :  { %v71_v20 = vpop.eup %70 }
 0x130   :  { %v44_v22 = vmul.f32 %v71_v20, %v28_v6 }
 0x132   :  { %v52_v24 = vmul.f32 %v68_v21, %v44_v22 }
 0x133   :  { %v73_v25 = vpop.eup %72 }
 0x134   :  { %v60_v26 = vadd.f32 %v69_v23, %v52_v24  ;;  %v45_v27 = vmul.f32 %v73_v25, %v29_v10 }
 0x136   :  { %62 = vst.msk [vmem:[%s121_s3] sm:$0xff] %vm18_vm0, %v60_v26  ;;  %v53_v28 = vmul.f32 %v68_v21, %v45_v27 }
 0x138   :  { %v61_v29 = vadd.f32 %v69_v23, %v53_v28 }
 0x13a   :  { %63 = vst.msk [vmem:[%s121_s3 + $0x8] sm:$0xff] %vm18_vm0, %v61_v29 }

// kernel: informer_stack_forward.19
= control target key start
LH: loop header
LB: loop body
LE: loop exit
PB: predicated region body
PF: predicated region fallthrough
CT: control target
= control target key end

     0   :  { %vm27_vm0 = vcmask 261120   ;;  %vm181_vm1 = vcmask 31744   ;;  %s298_s0 = inlined_call_operand.vmem [shape: f32[32,32], index: 0, kind: input, shape index: {}]   ;;  %s299_s3 = inlined_call_operand.vmem [shape: bf16[32,4], index: 3, kind: input, shape index: {}]   ;;  %s300_s1 = inlined_call_operand.vmem [shape: f32[1,32], index: 1, kind: input, shape index: {}]   ;;  %s301_s2 = inlined_call_operand.vmem [shape: f32[1,32], index: 2, kind: input, shape index: {}]   ;;  %s302_s4 = inlined_call_operand.vmem [shape: f32[1,4], index: 4, kind: input, shape index: {}]   ;;  %s303_s5 = inlined_call_operand.vmem [shape: f32[32,4], index: 5, kind: output, shape index: {}]  }
   0x1   :  { %v21_v0 = vld [vmem:[%s298_s0] sm:$0xff]  ;;  %v23_v1 = vld [vmem:[%s298_s0 + $0x10] sm:$0xff]  ;;  %v22_v2 = vld [vmem:[%s298_s0 + $0x8] sm:$0xff] }
   0x2   :  { %v28_v3 = vsel %vm27_vm0, %v21_v0, 0.0  ;;  %v34_v4 = vsel %vm27_vm0, %v23_v1, 0.0  ;;  %v24_v5 = vld [vmem:[%s298_s0 + $0x18] sm:$0xff]  ;;  %v31_v6 = vsel %vm27_vm0, %v22_v2, 0.0  ;;  %v209_v28 = vld [vmem:[%s299_s3 + $0x8] sm:$0xff]   ;;  %v210_v29 = vld [vmem:[%s299_s3] sm:$0xff]  }
   0x3   :  { %29 = vadd.xlane.f32.xlu0 %v28_v3  ;;  %35 = vadd.xlane.f32.xlu1 %v34_v4  ;;  %v37_v7 = vsel %vm27_vm0, %v24_v5, 0.0  ;;  %v190_v44 = vld [vmem:[%s300_s1] ss:$0 sm:$0xff] }
   0x4   :  { %201 = vmatprep.subr.bf16.mxu0 %v209_v28  ;;  %v191_v49 = vld [vmem:[%s301_s2] ss:$0 sm:$0xff] }
   0x5   :  { %202 = vmatpush3.bf16.msra.mxu0 %v209_v28  ;;  %v192_v62 = vld [vmem:[%s302_s4] ss:$0 sm:$0xff] }
   0x6   :  { %203 = vmatprep.subr.bf16.mxu0 %v210_v29 }
   0x7   :  { %32 = vadd.xlane.f32.xlu0 %v31_v6  ;;  %38 = vadd.xlane.f32.xlu1 %v37_v7 }
   0x9   :  { %204 = vmatpush3.bf16.msra.mxu0 %v210_v29 }
  0x8c   :  { %v30_v8 = vpop.xlane.xlu0 %29  ;;  %v36_v9 = vpop.xlane.xlu1 %35 }
  0x8d   :  { %v41_v10 = vmul.f32 0.03125, %v30_v8  ;;  %v43_v11 = vmul.f32 0.03125, %v36_v9 }
  0x8f   :  { %v45_v12 = vsub.f32 %v21_v0, %v41_v10  ;;  %v47_v13 = vsub.f32 %v23_v1, %v43_v11 }
  0x90   :  { %v33_v14 = vpop.xlane.xlu0 %32  ;;  %v39_v15 = vpop.xlane.xlu1 %38 }
  0x91   :  { %v42_v16 = vmul.f32 0.03125, %v33_v14  ;;  %v44_v17 = vmul.f32 0.03125, %v39_v15  ;;  %v49_v18 = vmul.f32 %v45_v12, %v45_v12  ;;  %v51_v19 = vmul.f32 %v47_v13, %v47_v13 }
  0x93   :  { %v46_v20 = vsub.f32 %v22_v2, %v42_v16  ;;  %v48_v21 = vsub.f32 %v24_v5, %v44_v17  ;;  %v53_v22 = vsel %vm27_vm0, %v49_v18, 0.0  ;;  %v59_v23 = vsel %vm27_vm0, %v51_v19, 0.0 }
  0x94   :  { %54 = vadd.xlane.f32.xlu0 %v53_v22 }
  0x95   :  { %v50_v24 = vmul.f32 %v46_v20, %v46_v20  ;;  %v52_v25 = vmul.f32 %v48_v21, %v48_v21 }
  0x97   :  { %v56_v26 = vsel %vm27_vm0, %v50_v24, 0.0  ;;  %v62_v27 = vsel %vm27_vm0, %v52_v25, 0.0 }
  0x98   :  { %60 = vadd.xlane.f32.xlu0 %v59_v23  ;;  %57 = vadd.xlane.f32.xlu1 %v56_v26 }
  0x9c   :  { %63 = vadd.xlane.f32.xlu1 %v62_v27 }
 0x11d   :  { %v55_v30 = vpop.xlane.xlu0 %54 }
 0x11e   :  { %v65_v31 = vmul.f32 0.03125, %v55_v30 }
 0x120   :  { %v69_v32 = vadd.f32 1e-05, %v65_v31 }
 0x121   :  { %v58_v33 = vpop.xlane.xlu1 %57  ;;  %v61_v34 = vpop.xlane.xlu0 %60 }
 0x122   :  { %211 = vrsqrt.f32 %v69_v32  ;;  %v66_v35 = vmul.f32 0.03125, %v58_v33  ;;  %v67_v36 = vmul.f32 0.03125, %v61_v34 }
 0x124   :  { %v70_v37 = vadd.f32 1e-05, %v66_v35  ;;  %v71_v38 = vadd.f32 1e-05, %v67_v36 }
 0x125   :  { %v64_v39 = vpop.xlane.xlu1 %63 }
 0x126   :  { %213 = vrsqrt.f32 %v70_v37  ;;  %v68_v40 = vmul.f32 0.03125, %v64_v39 }
 0x127   :  { %215 = vrsqrt.f32 %v71_v38 }
 0x128   :  { %v72_v41 = vadd.f32 1e-05, %v68_v40 }
 0x12a   :  { %217 = vrsqrt.f32 %v72_v41 }
 0x12f   :  { %v212_v42 = vpop.eup %211 }
 0x130   :  { %v77_v43 = vmul.f32 %v212_v42, %v45_v12 }
 0x132   :  { %v87_v48 = vmul.f32 %v190_v44, %v77_v43 }
 0x133   :  { %v214_v45 = vpop.eup %213 }
 0x134   :  { %v216_v46 = vpop.eup %215  ;;  %v78_v47 = vmul.f32 %v214_v45, %v46_v20  ;;  %v97_v53 = vadd.f32 %v191_v49, %v87_v48 }
 0x135   :  { %v79_v50 = vmul.f32 %v216_v46, %v47_v13 }
 0x136   :  { %v88_v51 = vmul.f32 %v190_v44, %v78_v47 }
 0x137   :  { %v218_v52 = vpop.eup %217  ;;  %v89_v56 = vmul.f32 %v190_v44, %v79_v50 }
 0x138   :  { %v98_v54 = vadd.f32 %v191_v49, %v88_v51  ;;  %v80_v55 = vmul.f32 %v218_v52, %v48_v21 }
 0x139   :  { %v99_v59 = vadd.f32 %v191_v49, %v89_v56 }
 0x13a   :  { %v105_v57 = vpack.c.bf16 %v98_v54, %v97_v53  ;;  %v90_v58 = vmul.f32 %v190_v44, %v80_v55 }
 0x13c   :  { %205 = vmatprep.mubr.msk.bf16.mxu0 %vm27_vm0, %v105_v57  ;;  %v100_v60 = vadd.f32 %v191_v49, %v90_v58 }
 0x13e   :  { %v106_v61 = vpack.c.bf16 %v100_v60, %v99_v59 }
 0x140   :  { %206 = vmatmul.mubr.msk.bf16.vlgmr.msra.gmra.mxu0 %vm27_vm0, %v106_v61 }
 0x200   :  { %v207_v63 = vpop.f32.mrf.mxu0 }
 0x201   :  { %v175_v0 = vadd.f32 %v207_v63, %v192_v62 }
 0x202   :  { %v166_v1 = vpop.f32.mrf.mxu0 }
 0x203   :  { %184 = vst.msk [vmem:[%s303_s5 + $0x10] sm:$0xff] %vm181_vm1, %v175_v0  ;;  %v167_v2 = vadd.f32 %v192_v62, %v166_v1 }
 0x204   :  { %v208_v3 = vpop.f32.mrf.mxu0 }
 0x205   :  { %182 = vst.msk [vmem:[%s303_s5] sm:$0xff] %vm181_vm1, %v167_v2  ;;  %v178_v4 = vadd.f32 %v208_v3, %v192_v62 }
 0x206   :  { %v169_v5 = vpop.f32.mrf.mxu0 }
 0x207   :  { %185 = vst.msk [vmem:[%s303_s5 + $0x18] sm:$0xff] %vm181_vm1, %v178_v4  ;;  %v170_v6 = vadd.f32 %v192_v62, %v169_v5 }
 0x209   :  { %183 = vst.msk [vmem:[%s303_s5 + $0x8] sm:$0xff] %vm181_vm1, %v170_v6 }

// kernel: informer_stack_forward.18
= control target key start
LH: loop header
LB: loop body
LE: loop exit
PB: predicated region body
PF: predicated region fallthrough
CT: control target
= control target key end

     0   :  { %s3344_s21 = smov 0   ;;  %s3777_s0 = inlined_call_operand.vmem [shape: f32[2,16,32], index: 0, kind: input, shape index: {}]   ;;  %s3778_s1 = inlined_call_operand.vmem [shape: f32[2,16,32], index: 1, kind: input, shape index: {}]   ;;  %s3779_s2 = inlined_call_operand.vmem [shape: bf16[4,32,32], index: 2, kind: input, shape index: {}]   ;;  %s3780_s3 = inlined_call_operand.vmem [shape: f32[4,1,32], index: 3, kind: input, shape index: {}]   ;;  %s3781_s4 = inlined_call_operand.vmem [shape: bf16[4,32,32], index: 4, kind: input, shape index: {}]   ;;  %s3782_s5 = inlined_call_operand.vmem [shape: f32[4,1,32], index: 5, kind: input, shape index: {}]   ;;  %s3783_s6 = inlined_call_operand.vmem [shape: f32[1,32], index: 6, kind: input, shape index: {}]   ;;  %s3784_s7 = inlined_call_operand.vmem [shape: f32[1,32], index: 7, kind: input, shape index: {}]   ;;  %s3785_s8 = inlined_call_operand.vmem [shape: f32[1,32], index: 8, kind: input, shape index: {}]   ;;  %s3786_s9 = inlined_call_operand.vmem [shape: f32[1,32], index: 9, kind: input, shape index: {}]   ;;  %s3787_s10 = inlined_call_operand.vmem [shape: bf16[32,32], index: 10, kind: input, shape index: {}]   ;;  %s3788_s11 = inlined_call_operand.vmem [shape: f32[1,32], index: 11, kind: input, shape index: {}]   ;;  %s3789_s12 = inlined_call_operand.vmem [shape: bf16[32,32], index: 12, kind: input, shape index: {}]   ;;  %s3790_s13 = inlined_call_operand.vmem [shape: f32[1,32], index: 13, kind: input, shape index: {}]   ;;  %s3791_s14 = inlined_call_operand.vmem [shape: f32[1,32], index: 14, kind: input, shape index: {}]   ;;  %s3792_s15 = inlined_call_operand.vmem [shape: f32[1,32], index: 15, kind: input, shape index: {}]   ;;  %s3793_s16 = inlined_call_operand.vmem [shape: f32[2,16,32], index: 16, kind: output, shape index: {}]  }
   0x1   :  { %3794 = sst [smem:[#allocation3_spill]] %s3777_s0 }
   0x2 LB: > { %s2747_s22 = sadd.s32 4294967295, %s3252_s21   ;;  %p2751_p0 = scmp.ge.s32.totalorder %s3252_s21, 1  ;;  %s3252_s21 = sphi %s3344_s21, %s26_s21  }
   0x3   : > { %p472_p1 = scmp.lt.s32.totalorder %s3252_s21, 3 }
   0x5   : > { %p473_p2 = pnand %p2751_p0, %p472_p1 }
   0x6   : > { %p527_p3 = scmp.lt.s32.totalorder (!%p473_p2), %s2747_s22, 1  ;;  %s3795_s19 = sld [smem:[#allocation3_spill]] (!%p473_p2) }
   0x7   : > { %476 = sbr.rel (%p473_p2) target bundleno = 5121 (0x1401), region = 84  ;;  %s3256_s26 = smov (!%p473_p2), 112  }
   0x8   : > { %s3257_s27 = smov (!%p473_p2), 120   ;;  %s3258_s28 = smov (!%p473_p2), 104  }
   0xc   : > { %v3150_v0 = vld [vmem:[%s3779_s2 + $0x8] sm:$0xff]   ;;  %v3254_v1 = vmov 0.0   ;;  %v3151_v2 = vld [vmem:[%s3779_s2 + $0x18] sm:$0xff]   ;;  %v3152_v3 = vld [vmem:[%s3779_s2] sm:$0xff]   ;;  %vm3255_vm0 = vmmov 0   ;;  %s3797_s22 = smov (!%p527_p3, %s2747_s22), 1  ;;  %v760_v38 = vlaneseq }
   0xd   : > { %2929 = vmatprep.subr.bf16.mxu0 %v3254_v1  ;;  %2937 = vmatprep.subr.bf16.mxu1 %v3254_v1  ;;  %v3153_v4 = vld [vmem:[%s3779_s2 + $0x10] sm:$0xff]   ;;  %s3372_s0 = sshll.u32 %s3797_s22, 4  ;;  %vm592_vm1 = vcmask 261120   ;;  %v2773_v8 = vld [vmem:[%s3780_s3] ss:$0 sm:$0xff]  ;;  %vm767_vm2 = vcmask 64512  }
   0xe   : > { %2930 = vmatpush3.bf16.msra.mxu0 %v3150_v0  ;;  %2933 = vmatprep.mubr.msk.bf16.mxu0 %vm3255_vm0, %v3254_v1  ;;  %s531_s20 = scalar_lea.vmem %s3795_s19, %s3372_s0  ;;  %v2777_v12 = vld [vmem:[%s3780_s3 + $0x1] ss:$0 sm:$0xff]  ;;  %v3154_v27 = vld [vmem:[%s3779_s2 + $0x28] sm:$0xff]   ;;  %v761_v39 = vshrl.u32 %v760_v38, 7  ;;  %v764_v40 = vand.u32 127, %v760_v38  ;;  %vm817_vm4 = vcmask 130048   ;;  %s536_s17 = scalar_lea.vmem %s3778_s1, %s3372_s0 }
   0xf   : > { %2938 = vmatpush3.bf16.msra.mxu1 %v3151_v2  ;;  %2931 = vmatprep.subr.bf16.mxu0 %v3254_v1  ;;  %v3379_v5 = vld [vmem:[%s531_s20] sm:$0xff]  ;;  %v3381_v6 = vld [vmem:[%s531_s20 + $0x8] sm:$0xff]  ;;  %vm1277_vm6 = vcmask 1043456  }
  0x10   : > { %2939 = vmatprep.subr.bf16.mxu1 %v3254_v1  ;;  %2941 = vmatprep.mubr.msk.bf16.mxu1 %vm3255_vm0, %v3254_v1  ;;  %v573_v7 = vpack.c.bf16 %v3381_v6, %v3379_v5  ;;  %v3155_v28 = vld [vmem:[%s3779_s2 + $0x20] sm:$0xff]   ;;  %vm765_vm3 = vcmp.gt.s32.totalorder %v764_v40, %v761_v39  ;;  %v762_v41 = vadd.s32 8, %v761_v39 }
  0x11   : > { %v2781_v50 = vld [vmem:[%s3780_s3 + $0x2] ss:$0 sm:$0xff] }
  0x12   : > { %2932 = vmatpush3.bf16.msra.mxu0 %v3152_v3  ;;  %vm766_vm5 = vcmp.gt.s32.totalorder %v764_v40, %v762_v41 }
  0x13   : > { %2940 = vmatpush3.bf16.msra.mxu1 %v3153_v4  ;;  %2945 = vmatprep.subr.bf16.mxu0 %v3254_v1 }
  0x14   : > { %2953 = vmatprep.subr.bf16.mxu1 %v3254_v1 }
  0x15   : > { %2934 = vmatmul.mubr.msk.bf16.vlgmr.msra.gmra.mxu0 %vm592_vm1, %v573_v7 }
  0x16   : > { %2942 = vmatmul.mubr.msk.bf16.vlgmr.msra.gmra.mxu1 %vm592_vm1, %v573_v7  ;;  %2949 = vmatprep.mubr.msk.bf16.mxu0 %vm3255_vm0, %v3254_v1 }
  0x17   : > { %2955 = vmatprep.mubr.msk.bf16.mxu1 %vm3255_vm0, %v3254_v1  ;;  %2946 = vmatpush3.bf16.msra.mxu0 %v3154_v27 }
  0x18   : > { %2947 = vmatprep.subr.bf16.mxu0 %v3254_v1 }
  0x1b   : > { %2948 = vmatpush3.bf16.msra.mxu0 %v3155_v28 }
  0x1c   : > { %2959 = vmatprep.subr.bf16.mxu0 %v3254_v1 }
  0x1e   : > { %2950 = vmatmul.mubr.msk.bf16.vlgmr.msra.gmra.mxu0 %vm592_vm1, %v573_v7 }
  0x1f   : > { %2961 = vmatprep.mubr.msk.bf16.mxu0 %vm3255_vm0, %v3254_v1 }
  0xd5   : > { %v630_v9 = vpop.f32.mrf.mxu0 }
  0xd6   : > { %v691_v10 = vpop.f32.mrf.mxu1  ;;  %v631_v11 = vadd.f32 %v2773_v8, %v630_v9 }
  0xd7   : > { %v2935_v13 = vpop.f32.mrf.mxu0  ;;  %v692_v18 = vadd.f32 %v2777_v12, %v691_v10 }
  0xd8   : > { %v2943_v14 = vpop.f32.mrf.mxu1  ;;  %v637_v17 = vmul.f32 0.35355338, %v631_v11 }
  0xd9   : > { %v633_v15 = vpop.f32.mrf.mxu0 }
  0xda   : > { %v694_v16 = vpop.f32.mrf.mxu1  ;;  %v634_v19 = vadd.f32 %v2773_v8, %v633_v15 }
  0xdb   : > { %v695_v20 = vadd.f32 %v2777_v12, %v694_v16  ;;  %v2936_v21 = vpop.f32.mrf.mxu0 }
  0xdc   : > { %v2944_v22 = vpop.f32.mrf.mxu1  ;;  %v638_v23 = vmul.f32 0.35355338, %v634_v19 }
  0xdd   : > { %v758_v24 = vpack.c.bf16 %v695_v20, %v692_v18 }
  0xde   : > { %v757_v25 = vpack.c.bf16 %v638_v23, %v637_v17  ;;  %v750_v51 = vpop.f32.mrf.mxu0 }
  0xdf   : > { %1017 = vrot.lane.b32.xlu1 %v758_v24, %s3256_s26  ;;  %891 = vrot.lane.b32.xlu0 %v758_v24, %s3257_s27  ;;  %v772_v26 = vsel %vm767_vm2, %v758_v24, 0  ;;  %v751_v53 = vadd.f32 %v2781_v50, %v750_v51 }
  0xe0   : > { %2954 = vmatpush3.bf16.xpose.msra.mxu1 %v772_v26  ;;  %v2951_v52 = vpop.f32.mrf.mxu0 }
  0xe1   : > { %2965 = vmatprep.subr.bf16.mxu1 %v3254_v1 }
  0xe2   : > { %v753_v54 = vpop.f32.mrf.mxu0 }
  0xe3   : > { %1015 = vrot.lane.b32.xlu1 %v757_v25, %s3256_s26  ;;  %888 = vrot.lane.b32.xlu0 %v757_v25, %s3257_s27  ;;  %v754_v55 = vadd.f32 %v2781_v50, %v753_v54 }
  0xe4   : > { %v2952_v56 = vpop.f32.mrf.mxu0 }
  0xe5   : > { %v3442_v57 = vpack.c.bf16 %v754_v55, %v751_v53 }
  0xe7   : > { %1140 = vrot.lane.b32.xlu1 %v757_v25, %s3258_s28  ;;  %1142 = vrot.lane.b32.xlu0 %v758_v24, %s3258_s28 }
  0xe8   : > { %2956 = vmatmul.mubr.msk.bf16.vlgmr.msra.gmra.mxu1 %vm767_vm2, %v757_v25  ;;  %2960 = vmatpush3.bf16.msra.mxu0 %v3442_v57 }
  0xe9   : > { %2967 = vmatprep.mubr.msk.bf16.mxu1 %vm3255_vm0, %v3254_v1  ;;  %2971 = vmatprep.subr.bf16.mxu0 %v3254_v1 }
 0x151   : > { %v892_v29 = vpop.permute.xlu0 %891  ;;  %v1018_v31 = vpop.permute.xlu1 %1017 }
 0x152   : > { %v897_v30 = vsel %vm767_vm2, %v892_v29, 0  ;;  %v1023_v33 = vsel %vm767_vm2, %v1018_v31, 0 }
 0x153   : > { %2966 = vmatpush3.bf16.xpose.msra.mxu1 %v897_v30 }
 0x154   : > { %2977 = vmatprep.subr.bf16.mxu1 %v3254_v1 }
 0x155   : > { %v889_v32 = vpop.permute.xlu0 %888  ;;  %v1016_v35 = vpop.permute.xlu1 %1015 }
 0x159   : > { %v1143_v34 = vpop.permute.xlu0 %1142  ;;  %v1141_v37 = vpop.permute.xlu1 %1140 }
 0x15a   : > { %2968 = vmatmul.mubr.msk.bf16.vlgmr.msra.gmra.mxu1 %vm767_vm2, %v889_v32  ;;  %v1148_v36 = vsel %vm767_vm2, %v1143_v34, 0 }
 0x15b   : > { %2978 = vmatpush3.bf16.xpose.msra.mxu1 %v1023_v33  ;;  %2979 = vmatprep.mubr.msk.bf16.mxu1 %vm3255_vm0, %v3254_v1 }
 0x15c   : > { %2989 = vmatprep.subr.bf16.mxu1 %v3254_v1 }
 0x162   : > { %2980 = vmatmul.mubr.msk.bf16.vlgmr.msra.gmra.mxu1 %vm767_vm2, %v1016_v35 }
 0x163   : > { %2990 = vmatpush3.bf16.xpose.msra.mxu1 %v1148_v36  ;;  %2991 = vmatprep.mubr.msk.bf16.mxu1 %vm3255_vm0, %v3254_v1 }
 0x164   : > { %3001 = vmatprep.subr.bf16.mxu1 %v3254_v1 }
 0x16a   : > { %2992 = vmatmul.mubr.msk.bf16.vlgmr.msra.gmra.mxu1 %vm767_vm2, %v1141_v37 }
 0x16b   : > { %3003 = vmatprep.mubr.msk.bf16.mxu1 %vm3255_vm0, %v3254_v1 }
 0x1a8   : > { %v808_v42 = vpop.f32.mrf.mxu1 }
 0x1a9   : > { %v815_v43 = vsel %vm765_vm3, -inf, %v808_v42 }
 0x1aa   : > { %v2957_v44 = vpop.f32.mrf.mxu1  ;;  %v818_v45 = vsel %vm817_vm4, %v815_v43, -inf }
 0x1ab   : > { %819 = vmax.xlane.f32.xlu0 %v818_v45 }
 0x1ac   : > { %v811_v46 = vpop.f32.mrf.mxu1 }
 0x1ad   : > { %v816_v47 = vsel %vm766_vm5, -inf, %v811_v46 }
 0x1ae   : > { %v2958_v48 = vpop.f32.mrf.mxu1  ;;  %v821_v49 = vsel %vm817_vm4, %v816_v47, -inf }
 0x1af   : > { %822 = vmax.xlane.f32.xlu1 %v821_v49 }
 0x21a   : > { %v933_v58 = vpop.f32.mrf.mxu1 }
 0x21b   : > { %v940_v59 = vsel %vm765_vm3, -inf, %v933_v58 }
 0x21c   : > { %v2969_v60 = vpop.f32.mrf.mxu1  ;;  %v942_v61 = vsel %vm817_vm4, %v940_v59, -inf }
 0x21d   : > { %943 = vmax.xlane.f32.xlu0 %v942_v61 }
 0x21e   : > { %v936_v62 = vpop.f32.mrf.mxu1 }
 0x21f   : > { %v941_v63 = vsel %vm766_vm5, -inf, %v936_v62 }
 0x220   : > { %v2970_v0 = vpop.f32.mrf.mxu1  ;;  %v945_v2 = vsel %vm817_vm4, %v941_v63, -inf }
 0x221   : > { %946 = vmax.xlane.f32.xlu0 %v945_v2 }
 0x222   : > { %v1059_v3 = vpop.f32.mrf.mxu1 }
 0x223   : > { %v1066_v4 = vsel %vm765_vm3, -inf, %v1059_v3 }
 0x224   : > { %v2981_v7 = vpop.f32.mrf.mxu1  ;;  %v1068_v8 = vsel %vm817_vm4, %v1066_v4, -inf }
 0x225   : > { %1069 = vmax.xlane.f32.xlu1 %v1068_v8 }
 0x226   : > { %v1062_v9 = vpop.f32.mrf.mxu1 }
 0x227   : > { %v1067_v10 = vsel %vm766_vm5, -inf, %v1062_v9 }
 0x228   : > { %v2982_v11 = vpop.f32.mrf.mxu1  ;;  %v1071_v12 = vsel %vm817_vm4, %v1067_v10, -inf }
 0x229   : > { %1072 = vmax.xlane.f32.xlu0 %v1071_v12 }
 0x22a   : > { %v1184_v13 = vpop.f32.mrf.mxu1 }
 0x22b   : > { %v1191_v14 = vsel %vm765_vm3, -inf, %v1184_v13 }
 0x22c   : > { %v2993_v15 = vpop.f32.mrf.mxu1  ;;  %v1193_v16 = vsel %vm817_vm4, %v1191_v14, -inf }
 0x22d   : > { %1194 = vmax.xlane.f32.xlu1 %v1193_v16 }
 0x22e   : > { %v1187_v17 = vpop.f32.mrf.mxu1 }
 0x22f   : > { %v1192_v18 = vsel %vm766_vm5, -inf, %v1187_v17 }
 0x230   : > { %v2994_v19 = vpop.f32.mrf.mxu1  ;;  %v1196_v20 = vsel %vm817_vm4, %v1192_v18, -inf }
 0x231   : > { %1197 = vmax.xlane.f32.xlu0 %v1196_v20 }
 0x234   : > { %v820_v21 = vpop.xlane.xlu0 %819 }
 0x235   : > { %v824_v22 = vsub.f32 %v815_v43, %v820_v21 }
 0x237   : > { %v826_v23 = vmul.f32 1.442695, %v824_v22 }
 0x238   : > { %v823_v24 = vpop.xlane.xlu1 %822 }
 0x239   : > { %3166 = vpow2.f32 %v826_v23  ;;  %v825_v25 = vsub.f32 %v816_v47, %v823_v24 }
 0x23b   : > { %v828_v26 = vmul.f32 1.442695, %v825_v25 }
 0x23d   : > { %3168 = vpow2.f32 %v828_v26 }
 0x246   : > { %v3167_v27 = vpop.eup %3166 }
 0x247   : > { %v830_v28 = vsel %vm817_vm4, %v3167_v27, 0.0 }
 0x248   : > { %831 = vadd.xlane.f32.xlu1 %v830_v28 }
 0x24a   : > { %v3169_v29 = vpop.eup %3168 }
 0x24b   : > { %v833_v30 = vsel %vm817_vm4, %v3169_v29, 0.0 }
 0x24c   : > { %834 = vadd.xlane.f32.xlu0 %v833_v30 }
 0x259   : > { %966 = vrot.lane.b32.xlu1 %v3442_v57, %s3257_s27 }
 0x2a6   : > { %v944_v31 = vpop.xlane.xlu0 %943 }
 0x2a7   : > { %v948_v32 = vsub.f32 %v940_v59, %v944_v31 }
 0x2a9   : > { %v950_v33 = vmul.f32 1.442695, %v948_v32 }
 0x2aa   : > { %v947_v34 = vpop.xlane.xlu0 %946 }
 0x2ab   : > { %3170 = vpow2.f32 %v950_v33  ;;  %v949_v35 = vsub.f32 %v941_v63, %v947_v34 }
 0x2ad   : > { %v952_v36 = vmul.f32 1.442695, %v949_v35  ;;  %v2767_v35 = vld [vmem:[%s3779_s2 + $0x34] sm:$0xf] }
 0x2ae   : > { %v1070_v37 = vpop.xlane.xlu1 %1069 }
 0x2af   : > { %3172 = vpow2.f32 %v952_v36  ;;  %v1074_v38 = vsub.f32 %v1066_v4, %v1070_v37  ;;  %v2766_v36 = vld [vmem:[%s3779_s2 + $0x30] sm:$0xf]  ;;  %v1279_v37 = vsel %vm1277_vm6, %v2767_v35, 0 }
 0x2b0   : > { %3002 = vmatpush3.bf16.msra.mxu1 %v1279_v37 }
 0x2b1   : > { %v1076_v39 = vmul.f32 1.442695, %v1074_v38  ;;  %v1326_v38 = vsel %vm1277_vm6, %v2766_v36, 0  ;;  %3013 = vmatprep.subr.bf16.mxu1 %v3254_v1 }
 0x2b2   : > { %v1073_v40 = vpop.xlane.xlu0 %1072 }
 0x2b3   : > { %3174 = vpow2.f32 %v1076_v39  ;;  %v1075_v41 = vsub.f32 %v1067_v10, %v1073_v40 }
 0x2b5   : > { %v1078_v42 = vmul.f32 1.442695, %v1075_v41 }
 0x2b6   : > { %v1195_v43 = vpop.xlane.xlu1 %1194 }
 0x2b7   : > { %3176 = vpow2.f32 %v1078_v42  ;;  %v1199_v44 = vsub.f32 %v1191_v14, %v1195_v43 }
 0x2b8   : > { %v3171_v45 = vpop.eup %3170 }
 0x2b9   : > { %v1201_v46 = vmul.f32 1.442695, %v1199_v44  ;;  %v954_v47 = vsel %vm817_vm4, %v3171_v45, 0.0 }
 0x2ba   : > { %v1198_v48 = vpop.xlane.xlu0 %1197  ;;  %955 = vadd.xlane.f32.xlu1 %v954_v47 }
 0x2bb   : > { %3178 = vpow2.f32 %v1201_v46  ;;  %v1200_v49 = vsub.f32 %v1192_v18, %v1198_v48 }
 0x2bc   : > { %v3173_v50 = vpop.eup %3172 }
 0x2bd   : > { %v1203_v51 = vmul.f32 1.442695, %v1200_v49  ;;  %v957_v52 = vsel %vm817_vm4, %v3173_v50, 0.0 }
 0x2be   : > { %958 = vadd.xlane.f32.xlu0 %v957_v52  ;;  %v2769_v52 = vld [vmem:[%s3779_s2 + $0x3c] sm:$0xf] }
 0x2bf   : > { %3180 = vpow2.f32 %v1203_v51  ;;  %v2768_v51 = vld [vmem:[%s3779_s2 + $0x38] sm:$0xf] }
 0x2c0   : > { %v3175_v53 = vpop.eup %3174 }
 0x2c1   : > { %v1080_v54 = vsel %vm817_vm4, %v3175_v53, 0.0 }
 0x2c2   : > { %1081 = vadd.xlane.f32.xlu1 %v1080_v54 }
 0x2c4   : > { %v3177_v55 = vpop.eup %3176 }
 0x2c5   : > { %v1083_v56 = vsel %vm817_vm4, %v3177_v55, 0.0 }
 0x2c6   : > { %1084 = vadd.xlane.f32.xlu0 %v1083_v56 }
 0x2c8   : > { %v3179_v58 = vpop.eup %3178 }
 0x2c9   : > { %v1205_v59 = vsel %vm817_vm4, %v3179_v58, 0.0 }
 0x2ca   : > { %1206 = vadd.xlane.f32.xlu1 %v1205_v59 }
 0x2cc   : > { %v3181_v60 = vpop.eup %3180 }
 0x2cd   : > { %v1208_v61 = vsel %vm817_vm4, %v3181_v60, 0.0 }
 0x2ce   : > { %1209 = vadd.xlane.f32.xlu0 %v1208_v61  ;;  %v1432_v61 = vsel %vm1277_vm6, %v2769_v52, 0 }
 0x2d1   : > { %v832_v62 = vpop.xlane.xlu1 %831 }
 0x2d2   : > { %3182 = vrcp.f32 %v832_v62 }
 0x2d5   : > { %v835_v63 = vpop.xlane.xlu0 %834  ;;  %v967_v8 = vpop.permute.xlu1 %966 }
 0x2d6   : > { %3184 = vrcp.f32 %v835_v63 }
 0x2db   : > { %1216 = vrot.lane.b32.xlu1 %v3442_v57, %s3258_s28 }
 0x2df   : > { %v3183_v0 = vpop.eup %3182 }
 0x2e0   : > { %v838_v3 = vmul.f32 %v3183_v0, %v3167_v27 }
 0x2e3   : > { %v3185_v2 = vpop.eup %3184 }
 0x2e4   : > { %1091 = vrot.lane.b32.xlu0 %v3442_v57, %s3256_s26  ;;  %v839_v4 = vmul.f32 %v3185_v2, %v3169_v29 }
 0x2e6   : > { %v840_v7 = vpack.c.bf16 %v839_v4, %v838_v3 }
 0x2e8   : > { %2962 = vmatmul.mubr.msk.bf16.vlgmr.msra.gmra.mxu0 %vm817_vm4, %v840_v7 }
 0x2e9   : > { %2972 = vmatpush3.bf16.msra.mxu0 %v967_v8  ;;  %2973 = vmatprep.mubr.msk.bf16.mxu0 %vm3255_vm0, %v3254_v1 }
 0x2ea   : > { %2983 = vmatprep.subr.bf16.mxu0 %v3254_v1 }
 0x343   : > { %v956_v9 = vpop.xlane.xlu1 %955 }
 0x344   : > { %3186 = vrcp.f32 %v956_v9 }
 0x347   : > { %v959_v10 = vpop.xlane.xlu0 %958 }
 0x348   : > { %3188 = vrcp.f32 %v959_v10 }
 0x34b   : > { %v1082_v11 = vpop.xlane.xlu1 %1081 }
 0x34c   : > { %3190 = vrcp.f32 %v1082_v11 }
 0x34f   : > { %v1085_v12 = vpop.xlane.xlu0 %1084 }
 0x350   : > { %3192 = vrcp.f32 %v1085_v12 }
 0x351   : > { %v3187_v57 = vpop.eup %3186 }
 0x352   : > { %v962_v15 = vmul.f32 %v3187_v57, %v3171_v45 }
 0x353   : > { %v1207_v13 = vpop.xlane.xlu1 %1206 }
 0x354   : > { %3194 = vrcp.f32 %v1207_v13 }
 0x355   : > { %v3189_v14 = vpop.eup %3188 }
 0x356   : > { %v963_v16 = vmul.f32 %v3189_v14, %v3173_v50 }
 0x357   : > { %v1210_v17 = vpop.xlane.xlu0 %1209  ;;  %v1217_v25 = vpop.permute.xlu1 %1216 }
 0x358   : > { %3196 = vrcp.f32 %v1210_v17  ;;  %v964_v18 = vpack.c.bf16 %v963_v16, %v962_v15 }
 0x359   : > { %v3191_v19 = vpop.eup %3190 }
 0x35a   : > { %2974 = vmatmul.mubr.msk.bf16.vlgmr.msra.gmra.mxu0 %vm817_vm4, %v964_v18  ;;  %v1088_v22 = vmul.f32 %v3191_v19, %v3175_v53  ;;  %v2797_v18 = vld [vmem:[%s3780_s3 + $0x3] ss:$0 sm:$0xff] }
 0x35b   : > { %v1092_v20 = vpop.permute.xlu0 %1091  ;;  %2985 = vmatprep.mubr.msk.bf16.mxu0 %vm3255_vm0, %v3254_v1 }
 0x35c   : > { %2984 = vmatpush3.bf16.msra.mxu0 %v1092_v20 }
 0x35d   : > { %v3193_v21 = vpop.eup %3192  ;;  %2995 = vmatprep.subr.bf16.mxu0 %v3254_v1 }
 0x35e   : > { %v1089_v23 = vmul.f32 %v3193_v21, %v3177_v55 }
 0x360   : > { %v1090_v24 = vpack.c.bf16 %v1089_v23, %v1088_v22 }
 0x361   : > { %v3195_v26 = vpop.eup %3194 }
 0x362   : > { %2986 = vmatmul.mubr.msk.bf16.vlgmr.msra.gmra.mxu0 %vm817_vm4, %v1090_v24  ;;  %v1213_v28 = vmul.f32 %v3195_v26, %v3179_v58 }
 0x363   : > { %2996 = vmatpush3.bf16.msra.mxu0 %v1217_v25  ;;  %2997 = vmatprep.mubr.msk.bf16.mxu0 %vm3255_vm0, %v3254_v1 }
 0x364   : > { %3007 = vmatprep.subr.bf16.mxu0 %v3254_v1 }
 0x365   : > { %v3197_v27 = vpop.eup %3196 }
 0x366   : > { %v1214_v29 = vmul.f32 %v3197_v27, %v3181_v60  ;;  %v1378_v60 = vsel %vm1277_vm6, %v2768_v51, 0 }
 0x368   : > { %v1215_v30 = vpack.c.bf16 %v1214_v29, %v1213_v28 }
 0x36a   : > { %2998 = vmatmul.mubr.msk.bf16.vlgmr.msra.gmra.mxu0 %vm817_vm4, %v1215_v30 }
 0x36b   : > { %3009 = vmatprep.mubr.msk.bf16.mxu0 %vm3255_vm0, %v3254_v1  ;;  %3008 = vmatpush3.bf16.msra.mxu0 %v1326_v38 }
 0x36c   : > { %3019 = vmatprep.subr.bf16.mxu0 %v3254_v1 }
 0x3a8   : > { %v878_v31 = vpop.f32.mrf.mxu0 }
 0x3a9   : > { %885 = vst.msk [vmem:[#allocation2] sm:$0xff] %vm767_vm2, %v878_v31 }
 0x3aa   : > { %v2963_v32 = vpop.f32.mrf.mxu0 }
 0x3ac   : > { %v881_v33 = vpop.f32.mrf.mxu0 }
 0x3ad   : > { %886 = vst.msk [vmem:[#allocation2 + $0x8] sm:$0xff] %vm767_vm2, %v881_v33 }
 0x3ae   : > { %v2964_v34 = vpop.f32.mrf.mxu0 }
 0x41a   : > { %v1006_v39 = vpop.f32.mrf.mxu0 }
 0x41b   : > { %1013 = vst.msk [vmem:[#allocation2 + $0x10] sm:$0xff] %vm767_vm2, %v1006_v39 }
 0x41c   : > { %v2975_v40 = vpop.f32.mrf.mxu0 }
 0x41e   : > { %v1009_v41 = vpop.f32.mrf.mxu0 }
 0x41f   : > { %1014 = vst.msk [vmem:[#allocation2 + $0x18] sm:$0xff] %vm767_vm2, %v1009_v41 }
 0x420   : > { %v2976_v42 = vpop.f32.mrf.mxu0 }
 0x422   : > { %v1131_v43 = vpop.f32.mrf.mxu0 }
 0x423   : > { %1138 = vst.msk [vmem:[#allocation2 + $0x20] sm:$0xff] %vm767_vm2, %v1131_v43 }
 0x424   : > { %v2987_v44 = vpop.f32.mrf.mxu0 }
 0x425   : > { %v3157_v44 = vld [vmem:[%s3781_s4 + $0x10] sm:$0xff]  }
 0x426   : > { %v1134_v45 = vpop.f32.mrf.mxu0  ;;  %v1270_v53 = vld [vmem:[#allocation2 + $0x1] ss:$4 sm:$0xff]  ;;  %v1265_v55 = vld [vmem:[#allocation2] ss:$4 sm:$0xff]  ;;  %v1370_v0 = vld [vmem:[#allocation2 + $0x2] ss:$4 sm:$0xff] }
 0x427   : > { %1139 = vst.msk [vmem:[#allocation2 + $0x28] sm:$0xff] %vm767_vm2, %v1134_v45  ;;  %v1424_v2 = vld [vmem:[#allocation2 + $0x3] ss:$4 sm:$0xff] }
 0x428   : > { %v2988_v46 = vpop.f32.mrf.mxu0  ;;  %v545_v45 = vld [vmem:[%s536_s17] sm:$0xff] }
 0x429   : > { %v546_v46 = vld [vmem:[%s536_s17 + $0x8] sm:$0xff] }
 0x42a   : > { %v1256_v47 = vpop.f32.mrf.mxu0 }
 0x42b   : > { %1263 = vst.msk [vmem:[#allocation2 + $0x30] sm:$0xff] %vm767_vm2, %v1256_v47  ;;  %v3547_v47 = vpack.c.bf16 %v546_v46, %v545_v45 }
 0x42c   : > { %v2999_v48 = vpop.f32.mrf.mxu0 }
 0x42d   : > { %v3158_v48 = vld [vmem:[%s3781_s4 + $0x8] sm:$0xff]  }
 0x42e   : > { %v1259_v49 = vpop.f32.mrf.mxu0 }
 0x42f   : > { %1264 = vst.msk [vmem:[#allocation2 + $0x38] sm:$0xff] %vm767_vm2, %v1259_v49  ;;  %v3159_v49 = vld [vmem:[%s3781_s4] sm:$0xff]  }
 0x430   : > { %v3000_v50 = vpop.f32.mrf.mxu0 }
 0x436   : > { %v1272_v54 = vld [vmem:[#allocation2 + $0x21] ss:$4 sm:$0xff]  ;;  %v1267_v56 = vld [vmem:[#allocation2 + $0x20] ss:$4 sm:$0xff]  ;;  %v1372_v62 = vld [vmem:[#allocation2 + $0x22] ss:$4 sm:$0xff] }
 0x437   : > { %v1273_v58 = vpack.c.bf16 %v1272_v54, %v1270_v53  ;;  %v1268_v59 = vpack.c.bf16 %v1267_v56, %v1265_v55  ;;  %v1426_v63 = vld [vmem:[#allocation2 + $0x23] ss:$4 sm:$0xff]  ;;  %v1373_v3 = vpack.c.bf16 %v1372_v62, %v1370_v0 }
 0x438   : > { %v1427_v4 = vpack.c.bf16 %v1426_v63, %v1424_v2  ;;  %v2799_v63 = vld [vmem:[%s3784_s7] ss:$0 sm:$0xff] }
 0x439   : > { %3004 = vmatmul.mubr.msk.bf16.vlgmr.msra.gmra.mxu1 %vm767_vm2, %v1273_v58  ;;  %3010 = vmatmul.mubr.msk.bf16.vlgmr.msra.gmra.mxu0 %vm767_vm2, %v1268_v59  ;;  %v2798_v59 = vld [vmem:[%s3783_s6] ss:$0 sm:$0xff] }
 0x43a   : > { %3014 = vmatpush3.bf16.msra.mxu1 %v1378_v60  ;;  %3020 = vmatpush3.bf16.msra.mxu0 %v1432_v61 }
 0x43b   : > { %3015 = vmatprep.mubr.msk.bf16.mxu1 %vm3255_vm0, %v3254_v1  ;;  %3021 = vmatprep.mubr.msk.bf16.mxu0 %vm3255_vm0, %v3254_v1 }
 0x43c   : > { %3033 = vmatprep.subr.bf16.mxu0 %v3254_v1  ;;  %3025 = vmatprep.subr.bf16.mxu1 %v3254_v1 }
 0x441   : > { %3016 = vmatmul.mubr.msk.bf16.vlgmr.msra.gmra.mxu1 %vm767_vm2, %v1373_v3  ;;  %3022 = vmatmul.mubr.msk.bf16.vlgmr.msra.gmra.mxu0 %vm767_vm2, %v1427_v4 }
 0x442   : > { %3037 = vmatprep.mubr.msk.bf16.mxu0 %vm3255_vm0, %v3254_v1  ;;  %3029 = vmatprep.mubr.msk.bf16.mxu1 %vm3255_vm0, %v3254_v1 }
 0x443   : > { %3026 = vmatpush3.bf16.msra.mxu1 %v3158_v48 }
 0x444   : > { %3027 = vmatprep.subr.bf16.mxu1 %v3254_v1 }
 0x447   : > { %3028 = vmatpush3.bf16.msra.mxu1 %v3159_v49 }
 0x448   : > { %3041 = vmatprep.subr.bf16.mxu1 %v3254_v1 }
 0x4f9   : > { %v1315_v7 = vpop.f32.mrf.mxu1  ;;  %v1362_v8 = vpop.f32.mrf.mxu0 }
 0x4fa   : > { %v1363_v14 = vadd.f32 %v1362_v8, %v1315_v7  ;;  %v2819_v7 = vld [vmem:[%s3782_s5 + $0x1] ss:$0 sm:$0xff] }
 0x4fb   : > { %v3005_v9 = vpop.f32.mrf.mxu1  ;;  %v3011_v10 = vpop.f32.mrf.mxu0 }
 0x4fd   : > { %v1318_v11 = vpop.f32.mrf.mxu1  ;;  %v1365_v12 = vpop.f32.mrf.mxu0 }
 0x4fe   : > { %v1366_v21 = vadd.f32 %v1365_v12, %v1318_v11 }
 0x4ff   : > { %v3006_v57 = vpop.f32.mrf.mxu1  ;;  %v3012_v13 = vpop.f32.mrf.mxu0 }
 0x501   : > { %v1414_v15 = vpop.f32.mrf.mxu1  ;;  %v1468_v16 = vpop.f32.mrf.mxu0 }
 0x502   : > { %v1421_v17 = vadd.f32 %v1414_v15, %v1363_v14  ;;  %v2815_v15 = vld [vmem:[%s3782_s5] ss:$0 sm:$0xff] }
 0x503   : > { %v3017_v19 = vpop.f32.mrf.mxu1  ;;  %v3023_v20 = vpop.f32.mrf.mxu0 }
 0x504   : > { %v1475_v22 = vadd.f32 %v1468_v16, %v1421_v17 }
 0x505   : > { %v1417_v23 = vpop.f32.mrf.mxu1  ;;  %v1471_v24 = vpop.f32.mrf.mxu0 }
 0x506   : > { %v1483_v25 = vadd.f32 %v2797_v18, %v1475_v22  ;;  %v1422_v26 = vadd.f32 %v1417_v23, %v1366_v21 }
 0x507   : > { %v3018_v27 = vpop.f32.mrf.mxu1  ;;  %v3024_v28 = vpop.f32.mrf.mxu0 }
 0x508   : > { %v1476_v29 = vadd.f32 %v1471_v24, %v1422_v26  ;;  %v1485_v30 = vadd.f32 %v1483_v25, %v3379_v5  ;;  %v3160_v27 = vld [vmem:[%s3781_s4 + $0x28] sm:$0xff]   ;;  %v3161_v28 = vld [vmem:[%s3781_s4 + $0x20] sm:$0xff]  }
 0x50a   : > { %v1484_v31 = vadd.f32 %v2797_v18, %v1476_v29  ;;  %v1489_v32 = vsel %vm592_vm1, %v1485_v30, 0.0 }
 0x50b   : > { %1490 = vadd.xlane.f32.xlu1 %v1489_v32 }
 0x50c   : > { %v1486_v33 = vadd.f32 %v1484_v31, %v3381_v6  ;;  %v3156_v6 = vld [vmem:[%s3781_s4 + $0x18] sm:$0xff]  }
 0x50d   : > { %3034 = vmatpush3.bf16.msra.mxu0 %v3156_v6 }
 0x50e   : > { %v1492_v34 = vsel %vm592_vm1, %v1486_v33, 0.0  ;;  %3035 = vmatprep.subr.bf16.mxu0 %v3254_v1 }
 0x50f   : > { %1493 = vadd.xlane.f32.xlu0 %v1492_v34 }
 0x511   : > { %3036 = vmatpush3.bf16.msra.mxu0 %v3157_v44 }
 0x512   : > { %3049 = vmatprep.subr.bf16.mxu0 %v3254_v1 }
 0x514   : > { %3038 = vmatmul.mubr.msk.bf16.vlgmr.msra.gmra.mxu0 %vm592_vm1, %v3547_v47 }
 0x515   : > { %3051 = vmatprep.mubr.msk.bf16.mxu0 %vm3255_vm0, %v3254_v1 }
 0x594   : > { %v1491_v35 = vpop.xlane.xlu1 %1490 }
 0x595   : > { %v1496_v36 = vmul.f32 0.03125, %v1491_v35 }
 0x597   : > { %v1498_v37 = vsub.f32 %v1485_v30, %v1496_v36 }
 0x598   : > { %v1494_v38 = vpop.xlane.xlu0 %1493 }
 0x599   : > { %v1497_v39 = vmul.f32 0.03125, %v1494_v38  ;;  %v1500_v40 = vmul.f32 %v1498_v37, %v1498_v37 }
 0x59b   : > { %v1499_v41 = vsub.f32 %v1486_v33, %v1497_v39  ;;  %v1502_v42 = vsel %vm592_vm1, %v1500_v40, 0.0 }
 0x59c   : > { %1503 = vadd.xlane.f32.xlu0 %v1502_v42 }
 0x59d   : > { %v1501_v5 = vmul.f32 %v1499_v41, %v1499_v41 }
 0x59f   : > { %v1505_v43 = vsel %vm592_vm1, %v1501_v5, 0.0 }
 0x5a0   : > { %1506 = vadd.xlane.f32.xlu1 %v1505_v43 }
 0x5d4   : > { %v1679_v8 = vpop.f32.mrf.mxu0 }
 0x5d5   : > { %v1680_v10 = vadd.f32 %v2819_v7, %v1679_v8 }
 0x5d6   : > { %v3039_v9 = vpop.f32.mrf.mxu0 }
 0x5d8   : > { %v1682_v11 = vpop.f32.mrf.mxu0 }
 0x5d9   : > { %v1683_v12 = vadd.f32 %v2819_v7, %v1682_v11 }
 0x5da   : > { %v3040_v57 = vpop.f32.mrf.mxu0 }
 0x5db   : > { %v3580_v13 = vpack.c.bf16 %v1683_v12, %v1680_v10 }
 0x5dd   : > { %1867 = vrot.lane.b32.xlu0 %v3580_v13, %s3257_s27  ;;  %v1752_v14 = vsel %vm767_vm2, %v3580_v13, 0 }
 0x5de   : > { %3050 = vmatpush3.bf16.xpose.msra.mxu0 %v1752_v14 }
 0x5df   : > { %3061 = vmatprep.subr.bf16.mxu0 %v3254_v1 }
 0x625   : > { %v1504_v50 = vpop.xlane.xlu0 %1503 }
 0x626   : > { %v1508_v51 = vmul.f32 0.03125, %v1504_v50  ;;  %v2823_v50 = vld [vmem:[%s3782_s5 + $0x2] ss:$0 sm:$0xff] }
 0x628   : > { %v1510_v52 = vadd.f32 1e-05, %v1508_v51 }
 0x629   : > { %v1507_v53 = vpop.xlane.xlu1 %1506 }
 0x62a   : > { %3198 = vrsqrt.f32 %v1510_v52  ;;  %v1509_v54 = vmul.f32 0.03125, %v1507_v53 }
 0x62c   : > { %v1511_v55 = vadd.f32 1e-05, %v1509_v54 }
 0x62e   : > { %3200 = vrsqrt.f32 %v1511_v55 }
 0x637   : > { %v3199_v56 = vpop.eup %3198 }
 0x638   : > { %v1514_v58 = vmul.f32 %v3199_v56, %v1498_v37 }
 0x63a   : > { %v1522_v62 = vmul.f32 %v2798_v59, %v1514_v58 }
 0x63b   : > { %v3201_v60 = vpop.eup %3200 }
 0x63c   : > { %v1515_v61 = vmul.f32 %v3201_v60, %v1499_v41  ;;  %v3568_v2 = vadd.f32 %v2799_v63, %v1522_v62 }
 0x63e   : > { %v1523_v0 = vmul.f32 %v2798_v59, %v1515_v61 }
 0x640   : > { %v3570_v3 = vadd.f32 %v2799_v63, %v1523_v0 }
 0x642   : > { %v1558_v4 = vpack.c.bf16 %v3570_v3, %v3568_v2 }
 0x644   : > { %3030 = vmatmul.mubr.msk.bf16.vlgmr.msra.gmra.mxu1 %vm592_vm1, %v1558_v4 }
 0x645   : > { %3045 = vmatprep.mubr.msk.bf16.mxu1 %vm3255_vm0, %v3254_v1  ;;  %3042 = vmatpush3.bf16.msra.mxu1 %v3160_v27 }
 0x646   : > { %3043 = vmatprep.subr.bf16.mxu1 %v3254_v1 }
 0x649   : > { %3044 = vmatpush3.bf16.msra.mxu1 %v3161_v28  ;;  %v2809_v28 = vld [vmem:[%s3781_s4 + $0x34] sm:$0xf] }
 0x64a   : > { %3055 = vmatprep.subr.bf16.mxu1 %v3254_v1 }
 0x64c   : > { %3046 = vmatmul.mubr.msk.bf16.vlgmr.msra.gmra.mxu1 %vm592_vm1, %v3547_v47 }
 0x64d   : > { %3057 = vmatprep.mubr.msk.bf16.mxu1 %vm3255_vm0, %v3254_v1 }
 0x64f   : > { %v1868_v22 = vpop.permute.xlu0 %1867 }
 0x650   : > { %v1873_v26 = vsel %vm767_vm2, %v1868_v22, 0  ;;  %v2808_v22 = vld [vmem:[%s3781_s4 + $0x30] sm:$0xf] }
 0x651   : > { %v2039_v27 = vsel %vm1277_vm6, %v2808_v22, 0 }
 0x704   : > { %v1614_v16 = vpop.f32.mrf.mxu1 }
 0x705   : > { %v1615_v18 = vadd.f32 %v2815_v15, %v1614_v16 }
 0x706   : > { %v3031_v17 = vpop.f32.mrf.mxu1 }
 0x707   : > { %v1621_v23 = vmul.f32 0.35355338, %v1615_v18 }
 0x708   : > { %v1617_v19 = vpop.f32.mrf.mxu1 }
 0x709   : > { %v1618_v20 = vadd.f32 %v2815_v15, %v1617_v19 }
 0x70a   : > { %v3032_v21 = vpop.f32.mrf.mxu1 }
 0x70b   : > { %v1622_v24 = vmul.f32 0.35355338, %v1618_v20 }
 0x70c   : > { %v1738_v51 = vpop.f32.mrf.mxu1 }
 0x70d   : > { %v3590_v25 = vpack.c.bf16 %v1622_v24, %v1621_v23  ;;  %v1739_v53 = vadd.f32 %v2823_v50, %v1738_v51 }
 0x70e   : > { %v3047_v52 = vpop.f32.mrf.mxu1 }
 0x70f   : > { %1864 = vrot.lane.b32.xlu1 %v3590_v25, %s3257_s27  ;;  %3052 = vmatmul.mubr.msk.bf16.vlgmr.msra.gmra.mxu0 %vm767_vm2, %v3590_v25 }
 0x710   : > { %3062 = vmatpush3.bf16.xpose.msra.mxu0 %v1873_v26  ;;  %3063 = vmatprep.mubr.msk.bf16.mxu0 %vm3255_vm0, %v3254_v1  ;;  %v1741_v54 = vpop.f32.mrf.mxu1 }
 0x711   : > { %3073 = vmatprep.subr.bf16.mxu0 %v3254_v1  ;;  %v1742_v55 = vadd.f32 %v2823_v50, %v1741_v54 }
 0x712   : > { %v3048_v56 = vpop.f32.mrf.mxu1 }
 0x713   : > { %v3624_v58 = vpack.c.bf16 %v1742_v55, %v1739_v53 }
 0x715   : > { %3056 = vmatpush3.bf16.msra.mxu1 %v3624_v58 }
 0x716   : > { %3067 = vmatprep.subr.bf16.mxu1 %v3254_v1 }
 0x781   : > { %v1865_v29 = vpop.permute.xlu1 %1864 }
 0x782   : > { %3064 = vmatmul.mubr.msk.bf16.vlgmr.msra.gmra.mxu0 %vm767_vm2, %v1865_v29  ;;  %v1992_v29 = vsel %vm1277_vm6, %v2809_v28, 0 }
 0x783   : > { %3075 = vmatprep.mubr.msk.bf16.mxu0 %vm3255_vm0, %v3254_v1  ;;  %3074 = vmatpush3.bf16.msra.mxu0 %v1992_v29 }
 0x784   : > { %3085 = vmatprep.subr.bf16.mxu0 %v3254_v1 }
 0x7cf   : > { %v1788_v30 = vpop.f32.mrf.mxu0 }
 0x7d0   : > { %v1795_v31 = vsel %vm817_vm4, %v1788_v30, -inf }
 0x7d1   : > { %1796 = vmax.xlane.f32.xlu1 %v1795_v31  ;;  %v3053_v32 = vpop.f32.mrf.mxu0 }
 0x7d3   : > { %v1791_v33 = vpop.f32.mrf.mxu0 }
 0x7d4   : > { %v1798_v34 = vsel %vm817_vm4, %v1791_v33, -inf }
 0x7d5   : > { %1799 = vmax.xlane.f32.xlu0 %v1798_v34  ;;  %v3054_v35 = vpop.f32.mrf.mxu0 }
 0x842   : > { %v1909_v36 = vpop.f32.mrf.mxu0 }
 0x843   : > { %v1916_v37 = vsel %vm817_vm4, %v1909_v36, -inf }
 0x844   : > { %1917 = vmax.xlane.f32.xlu0 %v1916_v37  ;;  %v3065_v38 = vpop.f32.mrf.mxu0 }
 0x846   : > { %v1912_v39 = vpop.f32.mrf.mxu0 }
 0x847   : > { %v1919_v40 = vsel %vm817_vm4, %v1912_v39, -inf }
 0x848   : > { %1920 = vmax.xlane.f32.xlu1 %v1919_v40  ;;  %v3066_v41 = vpop.f32.mrf.mxu0 }
 0x85a   : > { %v1797_v42 = vpop.xlane.xlu1 %1796 }
 0x85b   : > { %v1801_v5 = vsub.f32 %v1788_v30, %v1797_v42 }
 0x85d   : > { %v1803_v43 = vmul.f32 1.442695, %v1801_v5 }
 0x85e   : > { %v1800_v6 = vpop.xlane.xlu0 %1799 }
 0x85f   : > { %3202 = vpow2.f32 %v1803_v43  ;;  %v1802_v44 = vsub.f32 %v1791_v33, %v1800_v6 }
 0x861   : > { %v1805_v45 = vmul.f32 1.442695, %v1802_v44 }
 0x863   : > { %3204 = vpow2.f32 %v1805_v45 }
 0x86c   : > { %v3203_v46 = vpop.eup %3202 }
 0x86d   : > { %v1807_v47 = vsel %vm817_vm4, %v3203_v46, 0.0 }
 0x86e   : > { %1808 = vadd.xlane.f32.xlu0 %v1807_v47 }
 0x870   : > { %v3205_v48 = vpop.eup %3204 }
 0x871   : > { %v1810_v49 = vsel %vm817_vm4, %v3205_v48, 0.0 }
 0x872   : > { %1811 = vadd.xlane.f32.xlu1 %v1810_v49 }
 0x8cd   : > { %v1918_v59 = vpop.xlane.xlu0 %1917 }
 0x8ce   : > { %v1922_v60 = vsub.f32 %v1909_v36, %v1918_v59 }
 0x8d0   : > { %v1924_v61 = vmul.f32 1.442695, %v1922_v60 }
 0x8d1   : > { %v1921_v62 = vpop.xlane.xlu1 %1920 }
 0x8d2   : > { %3206 = vpow2.f32 %v1924_v61  ;;  %v1923_v63 = vsub.f32 %v1912_v39, %v1921_v62 }
 0x8d4   : > { %v1926_v0 = vmul.f32 1.442695, %v1923_v63 }
 0x8d6   : > { %3208 = vpow2.f32 %v1926_v0 }
 0x8df   : > { %v3207_v4 = vpop.eup %3206 }
 0x8e0   : > { %v1928_v7 = vsel %vm817_vm4, %v3207_v4, 0.0 }
 0x8e1   : > { %1929 = vadd.xlane.f32.xlu0 %v1928_v7 }
 0x8e3   : > { %v3209_v8 = vpop.eup %3208 }
 0x8e4   : > { %v1931_v9 = vsel %vm817_vm4, %v3209_v8, 0.0 }
 0x8e5   : > { %1932 = vadd.xlane.f32.xlu1 %v1931_v9 }
 0x8f6   : > { %2084 = vrot.lane.b32.xlu1 %v3580_v13, %s3256_s26 }
 0x8f7   : > { %v1809_v10 = vpop.xlane.xlu0 %1808  ;;  %1940 = vrot.lane.b32.xlu0 %v3624_v58, %s3257_s27 }
 0x8f8   : > { %3210 = vrcp.f32 %v1809_v10 }
 0x8fa   : > { %2082 = vrot.lane.b32.xlu1 %v3590_v25, %s3256_s26 }
 0x8fb   : > { %v1812_v11 = vpop.xlane.xlu1 %1811 }
 0x8fc   : > { %3212 = vrcp.f32 %v1812_v11 }
 0x905   : > { %v3211_v12 = vpop.eup %3210 }
 0x906   : > { %v1815_v14 = vmul.f32 %v3211_v12, %v3203_v46 }
 0x909   : > { %v3213_v57 = vpop.eup %3212 }
 0x90a   : > { %v1816_v15 = vmul.f32 %v3213_v57, %v3205_v48 }
 0x90c   : > { %v1817_v16 = vpack.c.bf16 %v1816_v15, %v1815_v14 }
 0x90e   : > { %3058 = vmatmul.mubr.msk.bf16.vlgmr.msra.gmra.mxu1 %vm817_vm4, %v1817_v16 }
 0x90f   : > { %3069 = vmatprep.mubr.msk.bf16.mxu1 %vm3255_vm0, %v3254_v1 }
 0x96a   : > { %v1930_v17 = vpop.xlane.xlu0 %1929 }
 0x96b   : > { %3214 = vrcp.f32 %v1930_v17  ;;  %v2810_v17 = vld [vmem:[%s3781_s4 + $0x38] sm:$0xf] }
 0x96e   : > { %v1933_v18 = vpop.xlane.xlu1 %1932  ;;  %v1941_v19 = vpop.permute.xlu0 %1940 }
 0x96f   : > { %3216 = vrcp.f32 %v1933_v18  ;;  %3068 = vmatpush3.bf16.msra.mxu1 %v1941_v19  ;;  %v2208_v18 = vsel %vm1277_vm6, %v2810_v17, 0 }
 0x970   : > { %3079 = vmatprep.subr.bf16.mxu1 %v3254_v1 }
 0x972   : > { %v2085_v37 = vpop.permute.xlu1 %2084 }
 0x973   : > { %v2090_v41 = vsel %vm767_vm2, %v2085_v37, 0 }
 0x976   : > { %v2083_v42 = vpop.permute.xlu1 %2082 }
 0x978   : > { %v3215_v20 = vpop.eup %3214 }
 0x979   : > { %v1936_v23 = vmul.f32 %v3215_v20, %v3207_v4 }
 0x97c   : > { %v3217_v21 = vpop.eup %3216 }
 0x97d   : > { %v1937_v24 = vmul.f32 %v3217_v21, %v3209_v8 }
 0x97f   : > { %v1938_v26 = vpack.c.bf16 %v1937_v24, %v1936_v23 }
 0x981   : > { %3070 = vmatmul.mubr.msk.bf16.vlgmr.msra.gmra.mxu1 %vm817_vm4, %v1938_v26 }
 0x982   : > { %3080 = vmatpush3.bf16.msra.mxu1 %v2039_v27  ;;  %3081 = vmatprep.mubr.msk.bf16.mxu1 %vm3255_vm0, %v3254_v1 }
 0x983   : > { %3091 = vmatprep.subr.bf16.mxu1 %v3254_v1 }
 0x9ce   : > { %v1855_v30 = vpop.f32.mrf.mxu1 }
 0x9d0   : > { %v3059_v31 = vpop.f32.mrf.mxu1 }
 0x9d2   : > { %v1858_v32 = vpop.f32.mrf.mxu1 }
 0x9d3   : > { %v1862_v33 = vpack.c.bf16 %v1858_v32, %v1855_v30 }
 0x9d4   : > { %v3060_v34 = vpop.f32.mrf.mxu1 }
 0x9d5   : > { %3082 = vmatmul.mubr.msk.bf16.vlgmr.msra.gmra.mxu1 %vm767_vm2, %v1862_v33 }
 0x9d6   : > { %3093 = vmatprep.mubr.msk.bf16.mxu1 %vm3255_vm0, %v3254_v1 }
 0xa41   : > { %v1980_v35 = vpop.f32.mrf.mxu1 }
 0xa43   : > { %v3071_v36 = vpop.f32.mrf.mxu1 }
 0xa45   : > { %v1983_v38 = vpop.f32.mrf.mxu1 }
 0xa46   : > { %v1987_v39 = vpack.c.bf16 %v1983_v38, %v1980_v35 }
 0xa47   : > { %v3072_v40 = vpop.f32.mrf.mxu1 }
 0xa48   : > { %3076 = vmatmul.mubr.msk.bf16.vlgmr.msra.gmra.mxu0 %vm767_vm2, %v1987_v39 }
 0xa49   : > { %3086 = vmatpush3.bf16.xpose.msra.mxu0 %v2090_v41  ;;  %3087 = vmatprep.mubr.msk.bf16.mxu0 %vm3255_vm0, %v3254_v1 }
 0xa4a   : > { %3097 = vmatprep.subr.bf16.mxu0 %v3254_v1 }
 0xa50   : > { %3088 = vmatmul.mubr.msk.bf16.vlgmr.msra.gmra.mxu0 %vm767_vm2, %v2083_v42 }
 0xa51   : > { %3099 = vmatprep.mubr.msk.bf16.mxu0 %vm3255_vm0, %v3254_v1  ;;  %3098 = vmatpush3.bf16.msra.mxu0 %v2208_v18 }
 0xa52   : > { %3109 = vmatprep.subr.bf16.mxu0 %v3254_v1 }
 0xa95   : > { %v3664_v5 = vpop.f32.mrf.mxu1 }
 0xa97   : > { %v3083_v43 = vpop.f32.mrf.mxu1 }
 0xa99   : > { %v3666_v6 = vpop.f32.mrf.mxu1 }
 0xa9b   : > { %v3084_v44 = vpop.f32.mrf.mxu1 }
 0xb08   : > { %v3668_v45 = vpop.f32.mrf.mxu0 }
 0xb09   : > { %v2076_v41 = vadd.f32 %v3664_v5, %v3668_v45 }
 0xb0a   : > { %v3077_v46 = vpop.f32.mrf.mxu0 }
 0xb0c   : > { %v3670_v47 = vpop.f32.mrf.mxu0 }
 0xb0d   : > { %v2079_v46 = vadd.f32 %v3666_v6, %v3670_v47  ;;  %v2811_v6 = vld [vmem:[%s3781_s4 + $0x3c] sm:$0xf] }
 0xb0e   : > { %v3078_v48 = vpop.f32.mrf.mxu0  ;;  %v2379_v47 = vsel %vm1277_vm6, %v2811_v6, 0 }
 0xb10   : > { %v2126_v49 = vpop.f32.mrf.mxu0 }
 0xb11   : > { %v2133_v50 = vsel %vm817_vm4, %v2126_v49, -inf }
 0xb12   : > { %2134 = vmax.xlane.f32.xlu0 %v2133_v50  ;;  %v3089_v51 = vpop.f32.mrf.mxu0 }
 0xb14   : > { %v2129_v52 = vpop.f32.mrf.mxu0 }
 0xb15   : > { %v2136_v53 = vsel %vm817_vm4, %v2129_v52, -inf }
 0xb16   : > { %2137 = vmax.xlane.f32.xlu1 %v2136_v53  ;;  %v3090_v54 = vpop.f32.mrf.mxu0 }
 0xb27   : > { %2156 = vrot.lane.b32.xlu1 %v3624_v58, %s3256_s26 }
 0xb2b   : > { %2253 = vrot.lane.b32.xlu1 %v3590_v25, %s3258_s28 }
 0xb9b   : > { %v2135_v55 = vpop.xlane.xlu0 %2134 }
 0xb9c   : > { %v2139_v56 = vsub.f32 %v2126_v49, %v2135_v55 }
 0xb9e   : > { %v2141_v59 = vmul.f32 1.442695, %v2139_v56 }
 0xb9f   : > { %v2138_v60 = vpop.xlane.xlu1 %2137 }
 0xba0   : > { %3218 = vpow2.f32 %v2141_v59  ;;  %v2140_v61 = vsub.f32 %v2129_v52, %v2138_v60 }
 0xba2   : > { %v2143_v62 = vmul.f32 1.442695, %v2140_v61 }
 0xba3   : > { %v2157_v63 = vpop.permute.xlu1 %2156 }
 0xba4   : > { %3220 = vpow2.f32 %v2143_v62  ;;  %3092 = vmatpush3.bf16.msra.mxu1 %v2157_v63  ;;  %v2839_v63 = vld [vmem:[%s3782_s5 + $0x3] ss:$0 sm:$0xff] }
 0xba5   : > { %3103 = vmatprep.subr.bf16.mxu1 %v3254_v1 }
 0xbad   : > { %v3219_v0 = vpop.eup %3218 }
 0xbae   : > { %v2145_v4 = vsel %vm817_vm4, %v3219_v0, 0.0 }
 0xbaf   : > { %2146 = vadd.xlane.f32.xlu0 %v2145_v4 }
 0xbb1   : > { %v3221_v7 = vpop.eup %3220 }
 0xbb2   : > { %v2148_v8 = vsel %vm817_vm4, %v3221_v7, 0.0 }
 0xbb3   : > { %2149 = vadd.xlane.f32.xlu0 %v2148_v8 }
 0xbc9   : > { %2255 = vrot.lane.b32.xlu0 %v3580_v13, %s3258_s28  ;;  %v2254_v13 = vpop.permute.xlu1 %2253 }
 0xc38   : > { %v2147_v25 = vpop.xlane.xlu0 %2146 }
 0xc39   : > { %3222 = vrcp.f32 %v2147_v25 }
 0xc3c   : > { %v2150_v9 = vpop.xlane.xlu0 %2149 }
 0xc3d   : > { %3224 = vrcp.f32 %v2150_v9 }
 0xc40   : > { %v2256_v14 = vpop.permute.xlu0 %2255 }
 0xc41   : > { %v2261_v16 = vsel %vm767_vm2, %v2256_v14, 0 }
 0xc46   : > { %v3223_v10 = vpop.eup %3222 }
 0xc47   : > { %v2153_v12 = vmul.f32 %v3223_v10, %v3219_v0 }
 0xc4a   : > { %v3225_v11 = vpop.eup %3224 }
 0xc4b   : > { %v2154_v57 = vmul.f32 %v3225_v11, %v3221_v7 }
 0xc4d   : > { %v2155_v15 = vpack.c.bf16 %v2154_v57, %v2153_v12 }
 0xc4f   : > { %3094 = vmatmul.mubr.msk.bf16.vlgmr.msra.gmra.mxu1 %vm817_vm4, %v2155_v15 }
 0xc50   : > { %3104 = vmatpush3.bf16.xpose.msra.mxu1 %v2261_v16  ;;  %3105 = vmatprep.mubr.msk.bf16.mxu1 %vm3255_vm0, %v3254_v1 }
 0xc51   : > { %3115 = vmatprep.subr.bf16.mxu1 %v3254_v1 }
 0xc57   : > { %3106 = vmatmul.mubr.msk.bf16.vlgmr.msra.gmra.mxu1 %vm767_vm2, %v2254_v13 }
 0xc58   : > { %3117 = vmatprep.mubr.msk.bf16.mxu1 %vm3255_vm0, %v3254_v1  ;;  %3116 = vmatpush3.bf16.msra.mxu1 %v2379_v47 }
 0xc59   : > { %3129 = vmatprep.subr.bf16.mxu1 %v3254_v1 }
 0xd0f   : > { %v2196_v19 = vpop.f32.mrf.mxu1 }
 0xd11   : > { %v3095_v20 = vpop.f32.mrf.mxu1 }
 0xd13   : > { %v2199_v21 = vpop.f32.mrf.mxu1 }
 0xd14   : > { %v2203_v22 = vpack.c.bf16 %v2199_v21, %v2196_v19 }
 0xd15   : > { %v3096_v23 = vpop.f32.mrf.mxu1 }
 0xd16   : > { %3100 = vmatmul.mubr.msk.bf16.vlgmr.msra.gmra.mxu0 %vm767_vm2, %v2203_v22 }
 0xd17   : > { %v2297_v24 = vpop.f32.mrf.mxu1  ;;  %3111 = vmatprep.mubr.msk.bf16.mxu0 %vm3255_vm0, %v3254_v1 }
 0xd18   : > { %v2304_v26 = vsel %vm817_vm4, %v2297_v24, -inf }
 0xd19   : > { %2305 = vmax.xlane.f32.xlu1 %v2304_v26  ;;  %v3107_v27 = vpop.f32.mrf.mxu1 }
 0xd1b   : > { %v2300_v28 = vpop.f32.mrf.mxu1 }
 0xd1c   : > { %v2307_v29 = vsel %vm817_vm4, %v2300_v28, -inf }
 0xd1d   : > { %2308 = vmax.xlane.f32.xlu0 %v2307_v29  ;;  %v3108_v30 = vpop.f32.mrf.mxu1 }
 0xda2   : > { %v2306_v31 = vpop.xlane.xlu1 %2305 }
 0xda3   : > { %v2310_v32 = vsub.f32 %v2297_v24, %v2306_v31  ;;  %v3163_v24 = vld [vmem:[%s3787_s10] sm:$0xff]  }
 0xda5   : > { %v2312_v33 = vmul.f32 1.442695, %v2310_v32 }
 0xda6   : > { %v2309_v34 = vpop.xlane.xlu0 %2308 }
 0xda7   : > { %3226 = vpow2.f32 %v2312_v33  ;;  %v2311_v35 = vsub.f32 %v2300_v28, %v2309_v34  ;;  %v2840_v34 = vld [vmem:[%s3785_s8] ss:$0 sm:$0xff] }
 0xda9   : > { %v2314_v36 = vmul.f32 1.442695, %v2311_v35 }
 0xdab   : > { %3228 = vpow2.f32 %v2314_v36 }
 0xdb4   : > { %v3227_v37 = vpop.eup %3226 }
 0xdb5   : > { %v2316_v38 = vsel %vm817_vm4, %v3227_v37, 0.0 }
 0xdb6   : > { %2317 = vadd.xlane.f32.xlu0 %v2316_v38  ;;  %v2841_v38 = vld [vmem:[%s3786_s9] ss:$0 sm:$0xff] }
 0xdb8   : > { %v3229_v39 = vpop.eup %3228 }
 0xdb9   : > { %v2319_v40 = vsel %vm817_vm4, %v3229_v39, 0.0 }
 0xdba   : > { %2320 = vadd.xlane.f32.xlu1 %v2319_v40 }
 0xdcc   : > { %2327 = vrot.lane.b32.xlu0 %v3624_v58, %s3258_s28  ;;  %s541_s28 = scalar_lea.vmem %s3793_s16, %s3372_s0 }
 0xdd6   : > { %v2244_v42 = vpop.f32.mrf.mxu0 }
 0xdd7   : > { %v2251_v43 = vadd.f32 %v2244_v42, %v2076_v41 }
 0xdd8   : > { %v3101_v44 = vpop.f32.mrf.mxu0 }
 0xdd9   : > { %v3165_v44 = vld [vmem:[%s3789_s12] sm:$0xff]  }
 0xdda   : > { %v2247_v48 = vpop.f32.mrf.mxu0 }
 0xddb   : > { %v2252_v49 = vadd.f32 %v2247_v48, %v2079_v46  ;;  %v2842_v46 = vld [vmem:[%s3788_s11] ss:$0 sm:$0xff] }
 0xddc   : > { %v3102_v50 = vpop.f32.mrf.mxu0 }
 0xe3f   : > { %v2318_v51 = vpop.xlane.xlu0 %2317 }
 0xe40   : > { %3230 = vrcp.f32 %v2318_v51 }
 0xe43   : > { %v2321_v52 = vpop.xlane.xlu1 %2320  ;;  %v2328_v53 = vpop.permute.xlu0 %2327 }
 0xe44   : > { %3232 = vrcp.f32 %v2321_v52  ;;  %3110 = vmatpush3.bf16.msra.mxu0 %v2328_v53 }
 0xe45   : > { %3121 = vmatprep.subr.bf16.mxu0 %v3254_v1 }
 0xe4d   : > { %v3231_v58 = vpop.eup %3230 }
 0xe4e   : > { %v2324_v5 = vmul.f32 %v3231_v58, %v3227_v37 }
 0xe51   : > { %v3233_v54 = vpop.eup %3232 }
 0xe52   : > { %v2325_v45 = vmul.f32 %v3233_v54, %v3229_v39 }
 0xe54   : > { %v2326_v55 = vpack.c.bf16 %v2325_v45, %v2324_v5 }
 0xe56   : > { %3112 = vmatmul.mubr.msk.bf16.vlgmr.msra.gmra.mxu0 %vm817_vm4, %v2326_v55 }
 0xe57   : > { %3125 = vmatprep.mubr.msk.bf16.mxu0 %vm3255_vm0, %v3254_v1 }
 0xf16   : > { %v2367_v56 = vpop.f32.mrf.mxu0 }
 0xf18   : > { %v3113_v59 = vpop.f32.mrf.mxu0 }
 0xf1a   : > { %v2370_v60 = vpop.f32.mrf.mxu0 }
 0xf1b   : > { %v2374_v61 = vpack.c.bf16 %v2370_v60, %v2367_v56 }
 0xf1c   : > { %v3114_v62 = vpop.f32.mrf.mxu0 }
 0xf1d   : > { %3118 = vmatmul.mubr.msk.bf16.vlgmr.msra.gmra.mxu1 %vm767_vm2, %v2374_v61 }
 0xf1e   : > { %3133 = vmatprep.mubr.msk.bf16.mxu1 %vm3255_vm0, %v3254_v1 }
 0xfdd   : > { %v2415_v0 = vpop.f32.mrf.mxu1 }
 0xfde   : > { %v2422_v4 = vadd.f32 %v2415_v0, %v2251_v43  ;;  %v3164_v43 = vld [vmem:[%s3789_s12 + $0x8] sm:$0xff]  }
 0xfdf   : > { %v3119_v7 = vpop.f32.mrf.mxu1  ;;  %3130 = vmatpush3.bf16.msra.mxu1 %v3164_v43 }
 0xfe0   : > { %v2430_v8 = vadd.f32 %v2839_v63, %v2422_v4  ;;  %3131 = vmatprep.subr.bf16.mxu1 %v3254_v1 }
 0xfe1   : > { %v2418_v25 = vpop.f32.mrf.mxu1 }
 0xfe2   : > { %v2423_v9 = vadd.f32 %v2418_v25, %v2252_v49  ;;  %v2432_v10 = vadd.f32 %v2430_v8, %v3568_v2 }
 0xfe3   : > { %v3120_v11 = vpop.f32.mrf.mxu1  ;;  %3132 = vmatpush3.bf16.msra.mxu1 %v3165_v44 }
 0xfe4   : > { %v2431_v12 = vadd.f32 %v2839_v63, %v2423_v9  ;;  %v2436_v57 = vsel %vm592_vm1, %v2432_v10, 0.0  ;;  %v2846_v9 = vld [vmem:[%s3790_s13] ss:$0 sm:$0xff] }
 0xfe5   : > { %2437 = vadd.xlane.f32.xlu1 %v2436_v57 }
 0xfe6   : > { %v2433_v14 = vadd.f32 %v2431_v12, %v3570_v3  ;;  %v3162_v3 = vld [vmem:[%s3787_s10 + $0x8] sm:$0xff]  }
 0xfe7   : > { %3122 = vmatpush3.bf16.msra.mxu0 %v3162_v3 }
 0xfe8   : > { %v2439_v15 = vsel %vm592_vm1, %v2433_v14, 0.0  ;;  %3123 = vmatprep.subr.bf16.mxu0 %v3254_v1 }
 0xfe9   : > { %2440 = vadd.xlane.f32.xlu1 %v2439_v15 }
 0xfeb   : > { %3124 = vmatpush3.bf16.msra.mxu0 %v3163_v24 }
0x106e   : > { %v2438_v16 = vpop.xlane.xlu1 %2437 }
0x106f   : > { %v2442_v13 = vmul.f32 0.03125, %v2438_v16 }
0x1071   : > { %v2444_v17 = vsub.f32 %v2432_v10, %v2442_v13 }
0x1072   : > { %v2441_v18 = vpop.xlane.xlu1 %2440 }
0x1073   : > { %v2443_v19 = vmul.f32 0.03125, %v2441_v18  ;;  %v2446_v20 = vmul.f32 %v2444_v17, %v2444_v17 }
0x1075   : > { %v2445_v21 = vsub.f32 %v2433_v14, %v2443_v19  ;;  %v2448_v22 = vsel %vm592_vm1, %v2446_v20, 0.0 }
0x1076   : > { %2449 = vadd.xlane.f32.xlu1 %v2448_v22 }
0x1077   : > { %v2447_v2 = vmul.f32 %v2445_v21, %v2445_v21 }
0x1079   : > { %v2451_v23 = vsel %vm592_vm1, %v2447_v2, 0.0 }
0x107a   : > { %2452 = vadd.xlane.f32.xlu1 %v2451_v23 }
0x10ff   : > { %v2450_v26 = vpop.xlane.xlu1 %2449 }
0x1100   : > { %v2454_v27 = vmul.f32 0.03125, %v2450_v26 }
0x1102   : > { %v2456_v28 = vadd.f32 1e-05, %v2454_v27 }
0x1103   : > { %v2453_v29 = vpop.xlane.xlu1 %2452 }
0x1104   : > { %3234 = vrsqrt.f32 %v2456_v28  ;;  %v2455_v30 = vmul.f32 0.03125, %v2453_v29 }
0x1106   : > { %v2457_v31 = vadd.f32 1e-05, %v2455_v30 }
0x1108   : > { %3236 = vrsqrt.f32 %v2457_v31 }
0x1111   : > { %v3235_v32 = vpop.eup %3234 }
0x1112   : > { %v2460_v33 = vmul.f32 %v3235_v32, %v2444_v17 }
0x1114   : > { %v2468_v37 = vmul.f32 %v2840_v34, %v2460_v33 }
0x1115   : > { %v3237_v35 = vpop.eup %3236 }
0x1116   : > { %v2461_v36 = vmul.f32 %v3237_v35, %v2445_v21  ;;  %v2476_v40 = vadd.f32 %v2841_v38, %v2468_v37  ;;  %v2850_v35 = vld [vmem:[%s3791_s14] ss:$0 sm:$0xff] }
0x1117   : > { %v2851_v37 = vld [vmem:[%s3792_s15] ss:$0 sm:$0xff] }
0x1118   : > { %v2469_v39 = vmul.f32 %v2840_v34, %v2461_v36 }
0x111a   : > { %v2477_v41 = vadd.f32 %v2841_v38, %v2469_v39 }
0x111c   : > { %v2482_v42 = vpack.c.bf16 %v2477_v41, %v2476_v40 }
0x111e   : > { %3126 = vmatmul.mubr.msk.bf16.vlgmr.msra.gmra.mxu0 %vm592_vm1, %v2482_v42 }
0x11de   : > { %v2539_v48 = vpop.f32.mrf.mxu0 }
0x11df   : > { %v2540_v49 = vadd.f32 %v2842_v46, %v2539_v48 }
0x11e0   : > { %v3127_v50 = vpop.f32.mrf.mxu0 }
0x11e1   : > { %v2548_v51 = vmul.f32 0.044715, %v2540_v49  ;;  %v2546_v63 = vmul.f32 0.5, %v2540_v49 }
0x11e2   : > { %v2542_v52 = vpop.f32.mrf.mxu0 }
0x11e3   : > { %v2550_v53 = vmul.f32 %v2548_v51, %v2540_v49  ;;  %v2543_v58 = vadd.f32 %v2842_v46, %v2542_v52 }
0x11e4   : > { %v3128_v54 = vpop.f32.mrf.mxu0 }
0x11e5   : > { %v2552_v5 = vmul.f32 %v2550_v53, %v2540_v49  ;;  %v2549_v45 = vmul.f32 0.044715, %v2543_v58  ;;  %v2547_v0 = vmul.f32 0.5, %v2543_v58 }
0x11e7   : > { %v2554_v55 = vadd.f32 %v2552_v5, %v2540_v49  ;;  %v2551_v6 = vmul.f32 %v2549_v45, %v2543_v58 }
0x11e9   : > { %v2556_v47 = vmul.f32 0.7978846, %v2554_v55  ;;  %v2553_v56 = vmul.f32 %v2551_v6, %v2543_v58 }
0x11eb   : > { %3238 = vtanh.f32 %v2556_v47  ;;  %v2555_v1 = vadd.f32 %v2553_v56, %v2543_v58 }
0x11ed   : > { %v2557_v59 = vmul.f32 0.7978846, %v2555_v1 }
0x11ef   : > { %3240 = vtanh.f32 %v2557_v59 }
0x11f8   : > { %v3239_v60 = vpop.eup %3238 }
0x11f9   : > { %v2560_v61 = vadd.f32 1.0, %v3239_v60 }
0x11fb   : > { %v2562_v7 = vmul.f32 %v2560_v61, %v2546_v63 }
0x11fc   : > { %v3241_v62 = vpop.eup %3240 }
0x11fd   : > { %v2561_v4 = vadd.f32 1.0, %v3241_v62 }
0x11ff   : > { %v2563_v8 = vmul.f32 %v2561_v4, %v2547_v0 }
0x1201   : > { %v2568_v25 = vpack.c.bf16 %v2563_v8, %v2562_v7 }
0x1203   : > { %3134 = vmatmul.mubr.msk.bf16.vlgmr.msra.gmra.mxu1 %vm592_vm1, %v2568_v25 }
0x12c3   : > { %v2625_v10 = vpop.f32.mrf.mxu1 }
0x12c4   : > { %v2626_v11 = vadd.f32 %v2846_v9, %v2625_v10 }
0x12c5   : > { %v3135_v12 = vpop.f32.mrf.mxu1 }
0x12c6   : > { %v2632_v57 = vadd.f32 %v2626_v11, %v2476_v40 }
0x12c7   : > { %v2628_v14 = vpop.f32.mrf.mxu1 }
0x12c8   : > { %v2629_v15 = vadd.f32 %v2846_v9, %v2628_v14  ;;  %v2636_v16 = vsel %vm592_vm1, %v2632_v57, 0.0 }
0x12c9   : > { %2637 = vadd.xlane.f32.xlu1 %v2636_v16  ;;  %v3136_v13 = vpop.f32.mrf.mxu1 }
0x12ca   : > { %v2633_v17 = vadd.f32 %v2629_v15, %v2477_v41 }
0x12cc   : > { %v2639_v18 = vsel %vm592_vm1, %v2633_v17, 0.0 }
0x12cd   : > { %2640 = vadd.xlane.f32.xlu1 %v2639_v18 }
0x1352   : > { %v2638_v19 = vpop.xlane.xlu1 %2637 }
0x1353   : > { %v2642_v20 = vmul.f32 0.03125, %v2638_v19 }
0x1355   : > { %v2644_v21 = vsub.f32 %v2632_v57, %v2642_v20 }
0x1356   : > { %v2641_v22 = vpop.xlane.xlu1 %2640 }
0x1357   : > { %v2643_v2 = vmul.f32 0.03125, %v2641_v22  ;;  %v2646_v23 = vmul.f32 %v2644_v21, %v2644_v21 }
0x1359   : > { %v2645_v3 = vsub.f32 %v2633_v17, %v2643_v2  ;;  %v2648_v24 = vsel %vm592_vm1, %v2646_v23, 0.0 }
0x135a   : > { %2649 = vadd.xlane.f32.xlu0 %v2648_v24 }
0x135b   : > { %v2647_v26 = vmul.f32 %v2645_v3, %v2645_v3 }
0x135d   : > { %v2651_v27 = vsel %vm592_vm1, %v2647_v26, 0.0 }
0x135e   : > { %2652 = vadd.xlane.f32.xlu1 %v2651_v27 }
0x13e3   : > { %v2650_v28 = vpop.xlane.xlu0 %2649 }
0x13e4   : > { %v2654_v29 = vmul.f32 0.03125, %v2650_v28 }
0x13e6   : > { %v2656_v30 = vadd.f32 1e-05, %v2654_v29 }
0x13e7   : > { %v2653_v31 = vpop.xlane.xlu1 %2652 }
0x13e8   : > { %3242 = vrsqrt.f32 %v2656_v30  ;;  %v2655_v32 = vmul.f32 0.03125, %v2653_v31 }
0x13ea   : > { %v2657_v33 = vadd.f32 1e-05, %v2655_v32 }
0x13ec   : > { %3244 = vrsqrt.f32 %v2657_v33 }
0x13f5   : > { %v3243_v34 = vpop.eup %3242 }
0x13f6   : > { %v2660_v36 = vmul.f32 %v3243_v34, %v2644_v21 }
0x13f8   : > { %v2668_v38 = vmul.f32 %v2850_v35, %v2660_v36 }
0x13f9   : > { %v3245_v39 = vpop.eup %3244 }
0x13fa   : > { %v2676_v40 = vadd.f32 %v2851_v37, %v2668_v38  ;;  %v2661_v41 = vmul.f32 %v3245_v39, %v2645_v3 }
0x13fc   : > { %2678 = vst.msk [vmem:[%s541_s28] sm:$0xff] %vm592_vm1, %v2676_v40  ;;  %v2669_v42 = vmul.f32 %v2850_v35, %v2661_v41 }
0x13fe   : > { %v2677_v43 = vadd.f32 %v2851_v37, %v2669_v42 }
0x1400   : > { %2679 = vst.msk [vmem:[%s541_s28 + $0x8] sm:$0xff] %vm592_vm1, %v2677_v43 }
0x1401 PF: > { %s26_s21 = sadd.s32 1, %s3252_s21  }
0x1402   : > { %p23_p4 = scmp.ge.s32.totalorder %s26_s21, 4  }
0x1404   :  { %25 = sbr.rel (!%p23_p4) target bundleno = 2 (0x2), region = 136 }

</bundles_post_ra>
